<compile_context>
chip_gen: v6e
topology: v6e:2x2x1
jax: 0.10.0
libtpu: 0.0.40
codegen_flags: <defaults>
</compile_context>

<pallas_src>
import functools

import jax
import jax.numpy as jnp
from jax.experimental import pallas as pl
from jax.experimental.pallas import tpu as pltpu

_EPS = 1e-5


def _gelu(t):
    # TODO(synk): torch nn.GELU() defaults to the exact erf form; the tanh
    # approximation is used here (and in the reference) for Mosaic-safe lowering.
    c = 0.7978845608028654  # sqrt(2/pi)
    return 0.5 * t * (1.0 + jnp.tanh(c * (t + 0.044715 * t * t * t)))


def _layer_norm(t, gamma, beta, eps):
    mu = jnp.mean(t, axis=-1, keepdims=True)
    tc = t - mu
    var = jnp.mean(tc * tc, axis=-1, keepdims=True)
    return tc * jax.lax.rsqrt(var + eps) * gamma + beta


def _graph_transformer_kernel(
        # ---- inputs ----
        x_in_ref, e_in_ref,
        w_ne_ref, b_ne_ref, w_ee_ref, b_ee_ref,
        ln_x_ref, ln_e_ref,
        w_qkv_ref, w_e_ref, w_o_ref, w_eo_ref,
        ffx_w1_ref, ffx_b1_ref, ffx_w2_ref, ffx_b2_ref,
        ffe_w1_ref, ffe_b1_ref, ffe_w2_ref, ffe_b2_ref,
        w_no_ref, b_no_ref, w_el_ref, b_el_ref,
        # ---- outputs ----
        x_out_ref, e_out_ref,
        # ---- scratch (resident across the layer grid axis) ----
        x_state, e_state,
        *, n, d, eps):
    l = pl.program_id(1)
    n_layers = pl.num_programs(1)

    # ------- embeddings: once per batch, at the first layer step -------
    @pl.when(l == 0)
    def _():
        x_state[...] = (jnp.dot(x_in_ref[0], w_ne_ref[...],
                                preferred_element_type=jnp.float32)
                        + b_ne_ref[...])
        e_flat_in = e_in_ref[0].reshape(n * n, e_in_ref.shape[-1])
        e_state[...] = (jnp.dot(e_flat_in, w_ee_ref[...],
                                preferred_element_type=jnp.float32)
                        + b_ee_ref[...])

    x = x_state[...]            # [N, D]      node features
    e = e_state[...]            # [N*N, DE]   edge features (flattened)

    # ======= GraphAttentionLayer: pre-LN edge-gated attention + residual =====
    xn = _layer_norm(x, ln_x_ref[0, 0:1, :], ln_x_ref[0, 1:2, :], eps)
    en = _layer_norm(e, ln_e_ref[0, 0:1, :], ln_e_ref[0, 1:2, :], eps)

    # Fused QKV projection (single wide MXU matmul); 1/sqrt(D) folded into q.
    qkv = jnp.dot(xn, w_qkv_ref[0], preferred_element_type=jnp.float32)
    q = qkv[:, 0 * d:1 * d] * (1.0 / d ** 0.5)
    k = qkv[:, 1 * d:2 * d]
    v = qkv[:, 2 * d:3 * d]

    ep = jnp.dot(en, w_e_ref[0], preferred_element_type=jnp.float32)  # [N*N,D]
    w = (q[:, None, :] * k[None, :, :]) * ep.reshape(n, n, d)         # [N,N,D]
    score = jnp.sum(w, axis=-1)                                       # [N,N]

    score = score - jnp.max(score, axis=-1, keepdims=True)
    p = jnp.exp(score)
    attn = p * pl.reciprocal(jnp.sum(p, axis=-1, keepdims=True), approx=True)

    agg = jnp.dot(attn, v, preferred_element_type=jnp.float32)        # [N,D]
    x = x + jnp.dot(agg, w_o_ref[0], preferred_element_type=jnp.float32)
    e = e + jnp.dot(w.reshape(n * n, d), w_eo_ref[0],
                    preferred_element_type=jnp.float32)

    # ======= FeedForward on nodes: LN -> Linear -> GELU -> Linear -> +res ====
    xn2 = _layer_norm(x, ln_x_ref[0, 2:3, :], ln_x_ref[0, 3:4, :], eps)
    h = _gelu(jnp.dot(xn2, ffx_w1_ref[0],
                      preferred_element_type=jnp.float32) + ffx_b1_ref[0])
    x = x + jnp.dot(h, ffx_w2_ref[0],
                    preferred_element_type=jnp.float32) + ffx_b2_ref[0]

    # ======= FeedForward on edges =============================================
    en2 = _layer_norm(e, ln_e_ref[0, 2:3, :], ln_e_ref[0, 3:4, :], eps)
    he = _gelu(jnp.dot(en2, ffe_w1_ref[0],
                       preferred_element_type=jnp.float32) + ffe_b1_ref[0])
    e = e + jnp.dot(he, ffe_w2_ref[0],
                    preferred_element_type=jnp.float32) + ffe_b2_ref[0]

    x_state[...] = x
    e_state[...] = e

    # ------- output heads: once per batch, at the last layer step -------
    @pl.when(l == n_layers - 1)
    def _():
        x_out_ref[0] = (jnp.dot(x, w_no_ref[...],
                                preferred_element_type=jnp.float32)
                        + b_no_ref[...])
        e_out_ref[0] = (jnp.dot(e, w_el_ref[...],
                                preferred_element_type=jnp.float32)
                        + b_el_ref[...]).reshape(e_out_ref.shape[1:])


def graph_transformer_forward(x_in, e_in, params):
    """GraphTransformer.forward: x_in [B,N,Dn_in], e_in [B,N,N,De_in]."""
    b, n, d_node_in = x_in.shape
    d_edge_in = e_in.shape[-1]
    n_layers, d, _ = params["w_o"].shape
    de = params["w_el"].shape[0]
    d_node_out = params["w_no"].shape[1]
    d_edge_out = params["w_el"].shape[1]

    def const_spec(a):                     # whole array, same block every step
        nd = a.ndim
        return pl.BlockSpec(a.shape, lambda bi, li, _nd=nd: (0,) * _nd)

    def layer_spec(a):                     # [L, ...] stacked, indexed by layer
        nd = a.ndim
        return pl.BlockSpec((1,) + a.shape[1:],
                            lambda bi, li, _nd=nd: (li,) + (0,) * (_nd - 1))

    ordered = [
        ("w_ne", const_spec), ("b_ne", const_spec),
        ("w_ee", const_spec), ("b_ee", const_spec),
        ("ln_x", layer_spec), ("ln_e", layer_spec),
        ("w_qkv", layer_spec), ("w_e", layer_spec),
        ("w_o", layer_spec), ("w_eo", layer_spec),
        ("ffx_w1", layer_spec), ("ffx_b1", layer_spec),
        ("ffx_w2", layer_spec), ("ffx_b2", layer_spec),
        ("ffe_w1", layer_spec), ("ffe_b1", layer_spec),
        ("ffe_w2", layer_spec), ("ffe_b2", layer_spec),
        ("w_no", const_spec), ("b_no", const_spec),
        ("w_el", const_spec), ("b_el", const_spec),
    ]
    weight_args = [params[name] for name, _ in ordered]
    weight_specs = [mk(params[name]) for name, mk in ordered]

    in_specs = [
        pl.BlockSpec((1, n, d_node_in), lambda bi, li: (bi, 0, 0)),
        pl.BlockSpec((1, n, n, d_edge_in), lambda bi, li: (bi, 0, 0, 0)),
    ] + weight_specs
    out_specs = [
        pl.BlockSpec((1, n, d_node_out), lambda bi, li: (bi, 0, 0)),
        pl.BlockSpec((1, n, n, d_edge_out), lambda bi, li: (bi, 0, 0, 0)),
    ]

    kernel = functools.partial(_graph_transformer_kernel, n=n, d=d, eps=_EPS)

    x_out, e_out = pl.pallas_call(
        kernel,
        out_shape=(jax.ShapeDtypeStruct((b, n, d_node_out), jnp.float32),
                   jax.ShapeDtypeStruct((b, n, n, d_edge_out), jnp.float32)),
        grid_spec=pltpu.PrefetchScalarGridSpec(
            num_scalar_prefetch=0,
            grid=(b, n_layers),               # layer axis innermost
            in_specs=in_specs,
            out_specs=out_specs,
            scratch_shapes=[pltpu.VMEM((n, d), jnp.float32),
                            pltpu.VMEM((n * n, de), jnp.float32)]),
        compiler_params=pltpu.CompilerParams(
            dimension_semantics=("parallel", "arbitrary")),
    )(x_in, e_in, *weight_args)
    return x_out, e_out


def _reference_forward(x_in, e_in, params):
    """Pure-JAX reference of the full forward for validation."""
    def ln(t, g, b):
        mu = jnp.mean(t, axis=-1, keepdims=True)
        tc = t - mu
        var = jnp.mean(tc * tc, axis=-1, keepdims=True)
        return tc * jax.lax.rsqrt(var + _EPS) * g + b

    d = params["w_o"].shape[1]
    x = x_in @ params["w_ne"] + params["b_ne"]
    e = e_in @ params["w_ee"] + params["b_ee"]
    for i in range(params["w_o"].shape[0]):
        lnx, lne = params["ln_x"][i], params["ln_e"][i]
        xn = ln(x, lnx[0], lnx[1])
        en = ln(e, lne[0], lne[1])
        qkv = xn @ params["w_qkv"][i]
        q, k, v = qkv[..., :d], qkv[..., d:2 * d], qkv[..., 2 * d:]
        ep = en @ params["w_e"][i]
        w = q[:, :, None, :] * k[:, None, :, :] * ep / (d ** 0.5)
        attn = jax.nn.softmax(w.sum(-1), axis=-1)
        x = x + jnp.einsum("bij,bjd->bid", attn, v) @ params["w_o"][i]
        e = e + w @ params["w_eo"][i]
        xn2 = ln(x, lnx[2], lnx[3])
        x = (x + _gelu(xn2 @ params["ffx_w1"][i] + params["ffx_b1"][i])
             @ params["ffx_w2"][i] + params["ffx_b2"][i])
        en2 = ln(e, lne[2], lne[3])
        e = (e + _gelu(en2 @ params["ffe_w1"][i] + params["ffe_b1"][i])
             @ params["ffe_w2"][i] + params["ffe_b2"][i])
    return x @ params["w_no"] + params["b_no"], e @ params["w_el"] + params["b_el"]


def _init_params(key, *, n_layers, d_node_in, d_edge_in, d, de, d_ff, de_ff,
                 d_node_out, d_edge_out):
    def nrm(k, shape, scale):
        return scale * jax.random.normal(k, shape, jnp.float32)

    keys = iter(jax.random.split(key, 32))
    p = {}
    p["w_ne"] = nrm(next(keys), (d_node_in, d), d_node_in ** -0.5)
    p["b_ne"] = nrm(next(keys), (1, d), 0.02)
    p["w_ee"] = nrm(next(keys), (d_edge_in, de), d_edge_in ** -0.5)
    p["b_ee"] = nrm(next(keys), (1, de), 0.02)
    # LayerNorm params, rows = [attn_gamma, attn_beta, ff_gamma, ff_beta].
    gx = 1.0 + nrm(next(keys), (n_layers, 2, d), 0.1)
    bx = nrm(next(keys), (n_layers, 2, d), 0.1)
    p["ln_x"] = jnp.stack([gx[:, 0], bx[:, 0], gx[:, 1], bx[:, 1]], axis=1)
    ge = 1.0 + nrm(next(keys), (n_layers, 2, de), 0.1)
    be = nrm(next(keys), (n_layers, 2, de), 0.1)
    p["ln_e"] = jnp.stack([ge[:, 0], be[:, 0], ge[:, 1], be[:, 1]], axis=1)
    # Attention projections (fused QKV) and edge gating / output.
    p["w_qkv"] = nrm(next(keys), (n_layers, d, 3 * d), d ** -0.5)
    p["w_e"] = nrm(next(keys), (n_layers, de, d), de ** -0.5)
    p["w_o"] = nrm(next(keys), (n_layers, d, d), d ** -0.5)
    p["w_eo"] = nrm(next(keys), (n_layers, d, de), d ** -0.5)
    # FeedForward (node / edge).
    p["ffx_w1"] = nrm(next(keys), (n_layers, d, d_ff), d ** -0.5)
    p["ffx_b1"] = nrm(next(keys), (n_layers, 1, d_ff), 0.02)
    p["ffx_w2"] = nrm(next(keys), (n_layers, d_ff, d), d_ff ** -0.5)
    p["ffx_b2"] = nrm(next(keys), (n_layers, 1, d), 0.02)
    p["ffe_w1"] = nrm(next(keys), (n_layers, de, de_ff), de ** -0.5)
    p["ffe_b1"] = nrm(next(keys), (n_layers, 1, de_ff), 0.02)
    p["ffe_w2"] = nrm(next(keys), (n_layers, de_ff, de), de_ff ** -0.5)
    p["ffe_b2"] = nrm(next(keys), (n_layers, 1, de), 0.02)
    # Output heads.
    p["w_no"] = nrm(next(keys), (d, d_node_out), d ** -0.5)
    p["b_no"] = nrm(next(keys), (1, d_node_out), 0.02)
    p["w_el"] = nrm(next(keys), (de, d_edge_out), de ** -0.5)
    p["b_el"] = nrm(next(keys), (1, d_edge_out), 0.02)
    return p


if __name__ == "__main__":
    B, N, L = 2, 8, 2                       # batch, nodes, layers
    D_NODE_IN, D_EDGE_IN = 16, 16           # raw node / edge feature dims
    D, DE = 128, 128                        # d_embed, d_e_embed (lane-dense)
    D_FF, DE_FF = 256, 256                  # feed-forward hidden dims
    D_NODE_OUT, D_EDGE_OUT = 16, 16         # output dims

    key = jax.random.PRNGKey(0)
    kx, ke, kp = jax.random.split(key, 3)
    x_in = jax.random.normal(kx, (B, N, D_NODE_IN), jnp.float32)
    e_in = jax.random.normal(ke, (B, N, N, D_EDGE_IN), jnp.float32)
    params = _init_params(kp, n_layers=L, d_node_in=D_NODE_IN,
                          d_edge_in=D_EDGE_IN, d=D, de=DE, d_ff=D_FF,
                          de_ff=DE_FF, d_node_out=D_NODE_OUT,
                          d_edge_out=D_EDGE_OUT)

    x_out, e_out = graph_transformer_forward(x_in, e_in, params)
    jax.block_until_ready((x_out, e_out))

    x_ref, e_ref = _reference_forward(x_in, e_in, params)
    assert x_out.shape == (B, N, D_NODE_OUT)
    assert e_out.shape == (B, N, N, D_EDGE_OUT)
    # Tolerance covers the approximate-EUP reciprocal in the softmax.
    assert jnp.allclose(x_out, x_ref, atol=5e-3, rtol=5e-3), (
        "x mismatch, max abs diff", float(jnp.max(jnp.abs(x_out - x_ref))))
    assert jnp.allclose(e_out, e_ref, atol=5e-3, rtol=5e-3), (
        "e mismatch, max abs diff", float(jnp.max(jnp.abs(e_out - e_ref))))
    print("KERNEL_OK")
</pallas_src>

<mosaic_0001>
module attributes {stable_mosaic.version = 11 : i64} {
  func.func @_graph_transformer_kernel(%arg0: i32, %arg1: i32, %arg2: memref<1x8x16xf32, #tpu.memory_space<vmem>>, %arg3: memref<1x8x8x16xf32, #tpu.memory_space<vmem>>, %arg4: memref<16x128xf32, #tpu.memory_space<vmem>>, %arg5: memref<1x128xf32, #tpu.memory_space<vmem>>, %arg6: memref<16x128xf32, #tpu.memory_space<vmem>>, %arg7: memref<1x128xf32, #tpu.memory_space<vmem>>, %arg8: memref<1x4x128xf32, #tpu.memory_space<vmem>>, %arg9: memref<1x4x128xf32, #tpu.memory_space<vmem>>, %arg10: memref<1x128x384xf32, #tpu.memory_space<vmem>>, %arg11: memref<1x128x128xf32, #tpu.memory_space<vmem>>, %arg12: memref<1x128x128xf32, #tpu.memory_space<vmem>>, %arg13: memref<1x128x128xf32, #tpu.memory_space<vmem>>, %arg14: memref<1x128x256xf32, #tpu.memory_space<vmem>>, %arg15: memref<1x1x256xf32, #tpu.memory_space<vmem>>, %arg16: memref<1x256x128xf32, #tpu.memory_space<vmem>>, %arg17: memref<1x1x128xf32, #tpu.memory_space<vmem>>, %arg18: memref<1x128x256xf32, #tpu.memory_space<vmem>>, %arg19: memref<1x1x256xf32, #tpu.memory_space<vmem>>, %arg20: memref<1x256x128xf32, #tpu.memory_space<vmem>>, %arg21: memref<1x1x128xf32, #tpu.memory_space<vmem>>, %arg22: memref<128x16xf32, #tpu.memory_space<vmem>>, %arg23: memref<1x16xf32, #tpu.memory_space<vmem>>, %arg24: memref<128x16xf32, #tpu.memory_space<vmem>>, %arg25: memref<1x16xf32, #tpu.memory_space<vmem>>, %arg26: memref<1x8x16xf32, #tpu.memory_space<vmem>>, %arg27: memref<1x8x8x16xf32, #tpu.memory_space<vmem>>, %arg28: memref<8x128xf32, #tpu.memory_space<vmem>>, %arg29: memref<64x128xf32, #tpu.memory_space<vmem>>) attributes {dimension_semantics = [#tpu.dimension_semantics<parallel>, #tpu.dimension_semantics<arbitrary>], iteration_bounds = array<i64: 2, 2>, scalar_prefetch = 0 : i64, scratch_operands = 2 : i64, tpu.core_type = #tpu.core_type<tc>, window_params = [{transform_indices = @transform_0, window_bounds = array<i64: 1, 8, 16>}, {transform_indices = @transform_1, window_bounds = array<i64: 1, 8, 8, 16>}, {pipeline_mode = #tpu.pipeline_mode<synchronous>, transform_indices = @transform_2, window_bounds = array<i64: 16, 128>}, {pipeline_mode = #tpu.pipeline_mode<synchronous>, transform_indices = @transform_3, window_bounds = array<i64: 1, 128>}, {pipeline_mode = #tpu.pipeline_mode<synchronous>, transform_indices = @transform_4, window_bounds = array<i64: 16, 128>}, {pipeline_mode = #tpu.pipeline_mode<synchronous>, transform_indices = @transform_5, window_bounds = array<i64: 1, 128>}, {transform_indices = @transform_6, window_bounds = array<i64: 1, 4, 128>}, {transform_indices = @transform_7, window_bounds = array<i64: 1, 4, 128>}, {transform_indices = @transform_8, window_bounds = array<i64: 1, 128, 384>}, {transform_indices = @transform_9, window_bounds = array<i64: 1, 128, 128>}, {transform_indices = @transform_10, window_bounds = array<i64: 1, 128, 128>}, {transform_indices = @transform_11, window_bounds = array<i64: 1, 128, 128>}, {transform_indices = @transform_12, window_bounds = array<i64: 1, 128, 256>}, {transform_indices = @transform_13, window_bounds = array<i64: 1, 1, 256>}, {transform_indices = @transform_14, window_bounds = array<i64: 1, 256, 128>}, {transform_indices = @transform_15, window_bounds = array<i64: 1, 1, 128>}, {transform_indices = @transform_16, window_bounds = array<i64: 1, 128, 256>}, {transform_indices = @transform_17, window_bounds = array<i64: 1, 1, 256>}, {transform_indices = @transform_18, window_bounds = array<i64: 1, 256, 128>}, {transform_indices = @transform_19, window_bounds = array<i64: 1, 1, 128>}, {pipeline_mode = #tpu.pipeline_mode<synchronous>, transform_indices = @transform_20, window_bounds = array<i64: 128, 16>}, {pipeline_mode = #tpu.pipeline_mode<synchronous>, transform_indices = @transform_21, window_bounds = array<i64: 1, 16>}, {pipeline_mode = #tpu.pipeline_mode<synchronous>, transform_indices = @transform_22, window_bounds = array<i64: 128, 16>}, {pipeline_mode = #tpu.pipeline_mode<synchronous>, transform_indices = @transform_23, window_bounds = array<i64: 1, 16>}, {transform_indices = @transform_24, window_bounds = array<i64: 1, 8, 16>}, {transform_indices = @transform_25, window_bounds = array<i64: 1, 8, 8, 16>}]} {
    %c0_i32 = arith.constant 0 : i32
    %0 = arith.cmpi eq, %arg1, %c0_i32 : i32
    %1 = arith.extui %0 : i1 to i32
    %c0_i32_0 = arith.constant 0 : i32
    %2 = arith.cmpi ne, %1, %c0_i32_0 : i32
    scf.if %2 {
      %c0_106 = arith.constant 0 : index
      %c0_107 = arith.constant 0 : index
      %c0_108 = arith.constant 0 : index
      %201 = vector.load %arg2[%c0_106, %c0_107, %c0_108] : memref<1x8x16xf32, #tpu.memory_space<vmem>>, vector<1x8x16xf32>
      %202 = vector.shape_cast %201 : vector<1x8x16xf32> to vector<8x16xf32>
      %c0_109 = arith.constant 0 : index
      %c0_110 = arith.constant 0 : index
      %203 = vector.load %arg4[%c0_109, %c0_110] : memref<16x128xf32, #tpu.memory_space<vmem>>, vector<16x128xf32>
      %cst_111 = arith.constant dense<0.000000e+00> : vector<8x128xf32>
      %204 = tpu.matmul %202, %203, %cst_111 {dimension_numbers = #tpu.dot_dimension_numbers<[1], [0], [0], [1], [0, 0, 1, 1], [], []>} : vector<8x16xf32>, vector<16x128xf32>, vector<8x128xf32> -> vector<8x128xf32>
      %c0_112 = arith.constant 0 : index
      %c0_113 = arith.constant 0 : index
      %205 = vector.load %arg5[%c0_112, %c0_113] : memref<1x128xf32, #tpu.memory_space<vmem>>, vector<1x128xf32>
      %206 = vector.broadcast %205 : vector<1x128xf32> to vector<8x128xf32>
      %207 = arith.addf %204, %206 : vector<8x128xf32>
      %c0_114 = arith.constant 0 : index
      %c0_115 = arith.constant 0 : index
      %208 = vector.load %arg28[%c0_114, %c0_115] : memref<8x128xf32, #tpu.memory_space<vmem>>, vector<8x128xf32>
      tpu.vector_store %arg28[%c0_114, %c0_115], %207 {strides = array<i32>} : memref<8x128xf32, #tpu.memory_space<vmem>>, vector<8x128xf32>,
      %c0_116 = arith.constant 0 : index
      %c0_117 = arith.constant 0 : index
      %c0_118 = arith.constant 0 : index
      %c0_119 = arith.constant 0 : index
      %209 = vector.load %arg3[%c0_116, %c0_117, %c0_118, %c0_119] : memref<1x8x8x16xf32, #tpu.memory_space<vmem>>, vector<1x8x8x16xf32>
      %210 = vector.shape_cast %209 : vector<1x8x8x16xf32> to vector<8x8x16xf32>
      %211 = vector.shape_cast %210 : vector<8x8x16xf32> to vector<64x16xf32>
      %c0_120 = arith.constant 0 : index
      %c0_121 = arith.constant 0 : index
      %212 = vector.load %arg6[%c0_120, %c0_121] : memref<16x128xf32, #tpu.memory_space<vmem>>, vector<16x128xf32>
      %cst_122 = arith.constant dense<0.000000e+00> : vector<64x128xf32>
      %213 = tpu.matmul %211, %212, %cst_122 {dimension_numbers = #tpu.dot_dimension_numbers<[1], [0], [0], [1], [0, 0, 1, 1], [], []>} : vector<64x16xf32>, vector<16x128xf32>, vector<64x128xf32> -> vector<64x128xf32>
      %c0_123 = arith.constant 0 : index
      %c0_124 = arith.constant 0 : index
      %214 = vector.load %arg7[%c0_123, %c0_124] : memref<1x128xf32, #tpu.memory_space<vmem>>, vector<1x128xf32>
      %215 = vector.broadcast %214 : vector<1x128xf32> to vector<64x128xf32>
      %216 = arith.addf %213, %215 : vector<64x128xf32>
      %c0_125 = arith.constant 0 : index
      %c0_126 = arith.constant 0 : index
      %217 = vector.load %arg29[%c0_125, %c0_126] : memref<64x128xf32, #tpu.memory_space<vmem>>, vector<64x128xf32>
      tpu.vector_store %arg29[%c0_125, %c0_126], %216 {strides = array<i32>} : memref<64x128xf32, #tpu.memory_space<vmem>>, vector<64x128xf32>,
    } else {
    }
    %c0 = arith.constant 0 : index
    %c0_1 = arith.constant 0 : index
    %3 = vector.load %arg28[%c0, %c0_1] : memref<8x128xf32, #tpu.memory_space<vmem>>, vector<8x128xf32>
    %c0_2 = arith.constant 0 : index
    %c0_3 = arith.constant 0 : index
    %4 = vector.load %arg29[%c0_2, %c0_3] : memref<64x128xf32, #tpu.memory_space<vmem>>, vector<64x128xf32>
    %c0_4 = arith.constant 0 : index
    %c0_5 = arith.constant 0 : index
    %c0_6 = arith.constant 0 : index
    %5 = vector.load %arg8[%c0_4, %c0_5, %c0_6] : memref<1x4x128xf32, #tpu.memory_space<vmem>>, vector<1x1x128xf32>
    %6 = vector.shape_cast %5 : vector<1x1x128xf32> to vector<1x128xf32>
    %c0_7 = arith.constant 0 : index
    %c1 = arith.constant 1 : index
    %c0_8 = arith.constant 0 : index
    %7 = vector.load %arg8[%c0_7, %c1, %c0_8] : memref<1x4x128xf32, #tpu.memory_space<vmem>>, vector<1x1x128xf32>
    %8 = vector.shape_cast %7 : vector<1x1x128xf32> to vector<1x128xf32>
    %cst = arith.constant dense<0.000000e+00> : vector<8xf32>
    %9 = vector.multi_reduction <add>, %3, %cst [1] : vector<8x128xf32> to vector<8xf32>
    %10 = vector.shape_cast %9 : vector<8xf32> to vector<8x1xf32>
    %cst_9 = arith.constant 1.280000e+02 : f32
    %11 = vector.broadcast %cst_9 : f32 to vector<8x1xf32>
    %12 = arith.divf %10, %11 : vector<8x1xf32>
    %13 = vector.broadcast %12 : vector<8x1xf32> to vector<8x128xf32>
    %14 = arith.subf %3, %13 : vector<8x128xf32>
    %15 = arith.mulf %14, %14 : vector<8x128xf32>
    %cst_10 = arith.constant dense<0.000000e+00> : vector<8xf32>
    %16 = vector.multi_reduction <add>, %15, %cst_10 [1] : vector<8x128xf32> to vector<8xf32>
    %17 = vector.shape_cast %16 : vector<8xf32> to vector<8x1xf32>
    %cst_11 = arith.constant 1.280000e+02 : f32
    %18 = vector.broadcast %cst_11 : f32 to vector<8x1xf32>
    %19 = arith.divf %17, %18 : vector<8x1xf32>
    %cst_12 = arith.constant 9.99999974E-6 : f32
    %20 = vector.broadcast %cst_12 : f32 to vector<8x1xf32>
    %21 = arith.addf %19, %20 : vector<8x1xf32>
    %22 = math.rsqrt %21 : vector<8x1xf32>
    %23 = vector.broadcast %22 : vector<8x1xf32> to vector<8x128xf32>
    %24 = arith.mulf %14, %23 : vector<8x128xf32>
    %25 = vector.broadcast %6 : vector<1x128xf32> to vector<8x128xf32>
    %26 = arith.mulf %24, %25 : vector<8x128xf32>
    %27 = vector.broadcast %8 : vector<1x128xf32> to vector<8x128xf32>
    %28 = arith.addf %26, %27 : vector<8x128xf32>
    %c0_13 = arith.constant 0 : index
    %c0_14 = arith.constant 0 : index
    %c0_15 = arith.constant 0 : index
    %29 = vector.load %arg9[%c0_13, %c0_14, %c0_15] : memref<1x4x128xf32, #tpu.memory_space<vmem>>, vector<1x1x128xf32>
    %30 = vector.shape_cast %29 : vector<1x1x128xf32> to vector<1x128xf32>
    %c0_16 = arith.constant 0 : index
    %c1_17 = arith.constant 1 : index
    %c0_18 = arith.constant 0 : index
    %31 = vector.load %arg9[%c0_16, %c1_17, %c0_18] : memref<1x4x128xf32, #tpu.memory_space<vmem>>, vector<1x1x128xf32>
    %32 = vector.shape_cast %31 : vector<1x1x128xf32> to vector<1x128xf32>
    %cst_19 = arith.constant dense<0.000000e+00> : vector<64xf32>
    %33 = vector.multi_reduction <add>, %4, %cst_19 [1] : vector<64x128xf32> to vector<64xf32>
    %34 = vector.shape_cast %33 : vector<64xf32> to vector<64x1xf32>
    %cst_20 = arith.constant 1.280000e+02 : f32
    %35 = vector.broadcast %cst_20 : f32 to vector<64x1xf32>
    %36 = arith.divf %34, %35 : vector<64x1xf32>
    %37 = vector.broadcast %36 : vector<64x1xf32> to vector<64x128xf32>
    %38 = arith.subf %4, %37 : vector<64x128xf32>
    %39 = arith.mulf %38, %38 : vector<64x128xf32>
    %cst_21 = arith.constant dense<0.000000e+00> : vector<64xf32>
    %40 = vector.multi_reduction <add>, %39, %cst_21 [1] : vector<64x128xf32> to vector<64xf32>
    %41 = vector.shape_cast %40 : vector<64xf32> to vector<64x1xf32>
    %cst_22 = arith.constant 1.280000e+02 : f32
    %42 = vector.broadcast %cst_22 : f32 to vector<64x1xf32>
    %43 = arith.divf %41, %42 : vector<64x1xf32>
    %cst_23 = arith.constant 9.99999974E-6 : f32
    %44 = vector.broadcast %cst_23 : f32 to vector<64x1xf32>
    %45 = arith.addf %43, %44 : vector<64x1xf32>
    %46 = math.rsqrt %45 : vector<64x1xf32>
    %47 = vector.broadcast %46 : vector<64x1xf32> to vector<64x128xf32>
    %48 = arith.mulf %38, %47 : vector<64x128xf32>
    %49 = vector.broadcast %30 : vector<1x128xf32> to vector<64x128xf32>
    %50 = arith.mulf %48, %49 : vector<64x128xf32>
    %51 = vector.broadcast %32 : vector<1x128xf32> to vector<64x128xf32>
    %52 = arith.addf %50, %51 : vector<64x128xf32>
    %c0_24 = arith.constant 0 : index
    %c0_25 = arith.constant 0 : index
    %c0_26 = arith.constant 0 : index
    %53 = vector.load %arg10[%c0_24, %c0_25, %c0_26] : memref<1x128x384xf32, #tpu.memory_space<vmem>>, vector<1x128x384xf32>
    %54 = vector.shape_cast %53 : vector<1x128x384xf32> to vector<128x384xf32>
    %cst_27 = arith.constant dense<0.000000e+00> : vector<8x384xf32>
    %55 = tpu.matmul %28, %54, %cst_27 {dimension_numbers = #tpu.dot_dimension_numbers<[1], [0], [0], [1], [0, 0, 1, 1], [], []>} : vector<8x128xf32>, vector<128x384xf32>, vector<8x384xf32> -> vector<8x384xf32>
    %56 = vector.extract_strided_slice %55 {offsets = [0, 0], sizes = [8, 128], strides = [1, 1]} : vector<8x384xf32> to vector<8x128xf32>
    %cst_28 = arith.constant 0.0883883461 : f32
    %57 = vector.broadcast %cst_28 : f32 to vector<8x128xf32>
    %58 = arith.mulf %56, %57 : vector<8x128xf32>
    %59 = vector.extract_strided_slice %55 {offsets = [0, 128], sizes = [8, 128], strides = [1, 1]} : vector<8x384xf32> to vector<8x128xf32>
    %60 = vector.extract_strided_slice %55 {offsets = [0, 256], sizes = [8, 128], strides = [1, 1]} : vector<8x384xf32> to vector<8x128xf32>
    %c0_29 = arith.constant 0 : index
    %c0_30 = arith.constant 0 : index
    %c0_31 = arith.constant 0 : index
    %61 = vector.load %arg11[%c0_29, %c0_30, %c0_31] : memref<1x128x128xf32, #tpu.memory_space<vmem>>, vector<1x128x128xf32>
    %62 = vector.shape_cast %61 : vector<1x128x128xf32> to vector<128x128xf32>
    %cst_32 = arith.constant dense<0.000000e+00> : vector<64x128xf32>
    %63 = tpu.matmul %52, %62, %cst_32 {dimension_numbers = #tpu.dot_dimension_numbers<[1], [0], [0], [1], [0, 0, 1, 1], [], []>} : vector<64x128xf32>, vector<128x128xf32>, vector<64x128xf32> -> vector<64x128xf32>
    %64 = vector.shape_cast %58 : vector<8x128xf32> to vector<8x1x128xf32>
    %65 = vector.shape_cast %59 : vector<8x128xf32> to vector<1x8x128xf32>
    %66 = vector.broadcast %64 : vector<8x1x128xf32> to vector<8x8x128xf32>
    %67 = vector.broadcast %65 : vector<1x8x128xf32> to vector<8x8x128xf32>
    %68 = arith.mulf %66, %67 : vector<8x8x128xf32>
    %69 = vector.shape_cast %63 : vector<64x128xf32> to vector<8x8x128xf32>
    %70 = arith.mulf %68, %69 : vector<8x8x128xf32>
    %cst_33 = arith.constant dense<0.000000e+00> : vector<8x8xf32>
    %71 = vector.multi_reduction <add>, %70, %cst_33 [2] : vector<8x8x128xf32> to vector<8x8xf32>
    %cst_34 = arith.constant dense<0xFF800000> : vector<8xf32>
    %72 = vector.multi_reduction <maximumf>, %71, %cst_34 [1] : vector<8x8xf32> to vector<8xf32>
    %73 = vector.shape_cast %72 : vector<8xf32> to vector<8x1xf32>
    %74 = vector.broadcast %73 : vector<8x1xf32> to vector<8x8xf32>
    %75 = arith.subf %71, %74 : vector<8x8xf32>
    %76 = math.exp %75 : vector<8x8xf32>
    %cst_35 = arith.constant dense<0.000000e+00> : vector<8xf32>
    %77 = vector.multi_reduction <add>, %76, %cst_35 [1] : vector<8x8xf32> to vector<8xf32>
    %78 = vector.shape_cast %77 : vector<8xf32> to vector<8x1xf32>
    %79 = tpu.reciprocal %78 {approx = true} : vector<8x1xf32> -> vector<8x1xf32>
    %80 = vector.broadcast %79 : vector<8x1xf32> to vector<8x8xf32>
    %81 = arith.mulf %76, %80 : vector<8x8xf32>
    %cst_36 = arith.constant dense<0.000000e+00> : vector<8x128xf32>
    %82 = tpu.matmul %81, %60, %cst_36 {dimension_numbers = #tpu.dot_dimension_numbers<[1], [0], [0], [1], [0, 0, 1, 1], [], []>} : vector<8x8xf32>, vector<8x128xf32>, vector<8x128xf32> -> vector<8x128xf32>
    %c0_37 = arith.constant 0 : index
    %c0_38 = arith.constant 0 : index
    %c0_39 = arith.constant 0 : index
    %83 = vector.load %arg12[%c0_37, %c0_38, %c0_39] : memref<1x128x128xf32, #tpu.memory_space<vmem>>, vector<1x128x128xf32>
    %84 = vector.shape_cast %83 : vector<1x128x128xf32> to vector<128x128xf32>
    %cst_40 = arith.constant dense<0.000000e+00> : vector<8x128xf32>
    %85 = tpu.matmul %82, %84, %cst_40 {dimension_numbers = #tpu.dot_dimension_numbers<[1], [0], [0], [1], [0, 0, 1, 1], [], []>} : vector<8x128xf32>, vector<128x128xf32>, vector<8x128xf32> -> vector<8x128xf32>
    %86 = arith.addf %3, %85 : vector<8x128xf32>
    %87 = vector.shape_cast %70 : vector<8x8x128xf32> to vector<64x128xf32>
    %c0_41 = arith.constant 0 : index
    %c0_42 = arith.constant 0 : index
    %c0_43 = arith.constant 0 : index
    %88 = vector.load %arg13[%c0_41, %c0_42, %c0_43] : memref<1x128x128xf32, #tpu.memory_space<vmem>>, vector<1x128x128xf32>
    %89 = vector.shape_cast %88 : vector<1x128x128xf32> to vector<128x128xf32>
    %cst_44 = arith.constant dense<0.000000e+00> : vector<64x128xf32>
    %90 = tpu.matmul %87, %89, %cst_44 {dimension_numbers = #tpu.dot_dimension_numbers<[1], [0], [0], [1], [0, 0, 1, 1], [], []>} : vector<64x128xf32>, vector<128x128xf32>, vector<64x128xf32> -> vector<64x128xf32>
    %91 = arith.addf %4, %90 : vector<64x128xf32>
    %c0_45 = arith.constant 0 : index
    %c2 = arith.constant 2 : index
    %c0_46 = arith.constant 0 : index
    %92 = vector.load %arg8[%c0_45, %c2, %c0_46] : memref<1x4x128xf32, #tpu.memory_space<vmem>>, vector<1x1x128xf32>
    %93 = vector.shape_cast %92 : vector<1x1x128xf32> to vector<1x128xf32>
    %c0_47 = arith.constant 0 : index
    %c3 = arith.constant 3 : index
    %c0_48 = arith.constant 0 : index
    %94 = vector.load %arg8[%c0_47, %c3, %c0_48] : memref<1x4x128xf32, #tpu.memory_space<vmem>>, vector<1x1x128xf32>
    %95 = vector.shape_cast %94 : vector<1x1x128xf32> to vector<1x128xf32>
    %cst_49 = arith.constant dense<0.000000e+00> : vector<8xf32>
    %96 = vector.multi_reduction <add>, %86, %cst_49 [1] : vector<8x128xf32> to vector<8xf32>
    %97 = vector.shape_cast %96 : vector<8xf32> to vector<8x1xf32>
    %cst_50 = arith.constant 1.280000e+02 : f32
    %98 = vector.broadcast %cst_50 : f32 to vector<8x1xf32>
    %99 = arith.divf %97, %98 : vector<8x1xf32>
    %100 = vector.broadcast %99 : vector<8x1xf32> to vector<8x128xf32>
    %101 = arith.subf %86, %100 : vector<8x128xf32>
    %102 = arith.mulf %101, %101 : vector<8x128xf32>
    %cst_51 = arith.constant dense<0.000000e+00> : vector<8xf32>
    %103 = vector.multi_reduction <add>, %102, %cst_51 [1] : vector<8x128xf32> to vector<8xf32>
    %104 = vector.shape_cast %103 : vector<8xf32> to vector<8x1xf32>
    %cst_52 = arith.constant 1.280000e+02 : f32
    %105 = vector.broadcast %cst_52 : f32 to vector<8x1xf32>
    %106 = arith.divf %104, %105 : vector<8x1xf32>
    %cst_53 = arith.constant 9.99999974E-6 : f32
    %107 = vector.broadcast %cst_53 : f32 to vector<8x1xf32>
    %108 = arith.addf %106, %107 : vector<8x1xf32>
    %109 = math.rsqrt %108 : vector<8x1xf32>
    %110 = vector.broadcast %109 : vector<8x1xf32> to vector<8x128xf32>
    %111 = arith.mulf %101, %110 : vector<8x128xf32>
    %112 = vector.broadcast %93 : vector<1x128xf32> to vector<8x128xf32>
    %113 = arith.mulf %111, %112 : vector<8x128xf32>
    %114 = vector.broadcast %95 : vector<1x128xf32> to vector<8x128xf32>
    %115 = arith.addf %113, %114 : vector<8x128xf32>
    %c0_54 = arith.constant 0 : index
    %c0_55 = arith.constant 0 : index
    %c0_56 = arith.constant 0 : index
    %116 = vector.load %arg14[%c0_54, %c0_55, %c0_56] : memref<1x128x256xf32, #tpu.memory_space<vmem>>, vector<1x128x256xf32>
    %117 = vector.shape_cast %116 : vector<1x128x256xf32> to vector<128x256xf32>
    %cst_57 = arith.constant dense<0.000000e+00> : vector<8x256xf32>
    %118 = tpu.matmul %115, %117, %cst_57 {dimension_numbers = #tpu.dot_dimension_numbers<[1], [0], [0], [1], [0, 0, 1, 1], [], []>} : vector<8x128xf32>, vector<128x256xf32>, vector<8x256xf32> -> vector<8x256xf32>
    %c0_58 = arith.constant 0 : index
    %c0_59 = arith.constant 0 : index
    %c0_60 = arith.constant 0 : index
    %119 = vector.load %arg15[%c0_58, %c0_59, %c0_60] : memref<1x1x256xf32, #tpu.memory_space<vmem>>, vector<1x1x256xf32>
    %120 = vector.shape_cast %119 : vector<1x1x256xf32> to vector<1x256xf32>
    %121 = vector.broadcast %120 : vector<1x256xf32> to vector<8x256xf32>
    %122 = arith.addf %118, %121 : vector<8x256xf32>
    %cst_61 = arith.constant 5.000000e-01 : f32
    %123 = vector.broadcast %cst_61 : f32 to vector<8x256xf32>
    %124 = arith.mulf %123, %122 : vector<8x256xf32>
    %cst_62 = arith.constant 4.471500e-02 : f32
    %125 = vector.broadcast %cst_62 : f32 to vector<8x256xf32>
    %126 = arith.mulf %125, %122 : vector<8x256xf32>
    %127 = arith.mulf %126, %122 : vector<8x256xf32>
    %128 = arith.mulf %127, %122 : vector<8x256xf32>
    %129 = arith.addf %122, %128 : vector<8x256xf32>
    %cst_63 = arith.constant 0.797884583 : f32
    %130 = vector.broadcast %cst_63 : f32 to vector<8x256xf32>
    %131 = arith.mulf %130, %129 : vector<8x256xf32>
    %132 = math.tanh %131 : vector<8x256xf32>
    %cst_64 = arith.constant 1.000000e+00 : f32
    %133 = vector.broadcast %cst_64 : f32 to vector<8x256xf32>
    %134 = arith.addf %133, %132 : vector<8x256xf32>
    %135 = arith.mulf %124, %134 : vector<8x256xf32>
    %c0_65 = arith.constant 0 : index
    %c0_66 = arith.constant 0 : index
    %c0_67 = arith.constant 0 : index
    %136 = vector.load %arg16[%c0_65, %c0_66, %c0_67] : memref<1x256x128xf32, #tpu.memory_space<vmem>>, vector<1x256x128xf32>
    %137 = vector.shape_cast %136 : vector<1x256x128xf32> to vector<256x128xf32>
    %cst_68 = arith.constant dense<0.000000e+00> : vector<8x128xf32>
    %138 = tpu.matmul %135, %137, %cst_68 {dimension_numbers = #tpu.dot_dimension_numbers<[1], [0], [0], [1], [0, 0, 1, 1], [], []>} : vector<8x256xf32>, vector<256x128xf32>, vector<8x128xf32> -> vector<8x128xf32>
    %139 = arith.addf %86, %138 : vector<8x128xf32>
    %c0_69 = arith.constant 0 : index
    %c0_70 = arith.constant 0 : index
    %c0_71 = arith.constant 0 : index
    %140 = vector.load %arg17[%c0_69, %c0_70, %c0_71] : memref<1x1x128xf32, #tpu.memory_space<vmem>>, vector<1x1x128xf32>
    %141 = vector.shape_cast %140 : vector<1x1x128xf32> to vector<1x128xf32>
    %142 = vector.broadcast %141 : vector<1x128xf32> to vector<8x128xf32>
    %143 = arith.addf %139, %142 : vector<8x128xf32>
    %c0_72 = arith.constant 0 : index
    %c2_73 = arith.constant 2 : index
    %c0_74 = arith.constant 0 : index
    %144 = vector.load %arg9[%c0_72, %c2_73, %c0_74] : memref<1x4x128xf32, #tpu.memory_space<vmem>>, vector<1x1x128xf32>
    %145 = vector.shape_cast %144 : vector<1x1x128xf32> to vector<1x128xf32>
    %c0_75 = arith.constant 0 : index
    %c3_76 = arith.constant 3 : index
    %c0_77 = arith.constant 0 : index
    %146 = vector.load %arg9[%c0_75, %c3_76, %c0_77] : memref<1x4x128xf32, #tpu.memory_space<vmem>>, vector<1x1x128xf32>
    %147 = vector.shape_cast %146 : vector<1x1x128xf32> to vector<1x128xf32>
    %cst_78 = arith.constant dense<0.000000e+00> : vector<64xf32>
    %148 = vector.multi_reduction <add>, %91, %cst_78 [1] : vector<64x128xf32> to vector<64xf32>
    %149 = vector.shape_cast %148 : vector<64xf32> to vector<64x1xf32>
    %cst_79 = arith.constant 1.280000e+02 : f32
    %150 = vector.broadcast %cst_79 : f32 to vector<64x1xf32>
    %151 = arith.divf %149, %150 : vector<64x1xf32>
    %152 = vector.broadcast %151 : vector<64x1xf32> to vector<64x128xf32>
    %153 = arith.subf %91, %152 : vector<64x128xf32>
    %154 = arith.mulf %153, %153 : vector<64x128xf32>
    %cst_80 = arith.constant dense<0.000000e+00> : vector<64xf32>
    %155 = vector.multi_reduction <add>, %154, %cst_80 [1] : vector<64x128xf32> to vector<64xf32>
    %156 = vector.shape_cast %155 : vector<64xf32> to vector<64x1xf32>
    %cst_81 = arith.constant 1.280000e+02 : f32
    %157 = vector.broadcast %cst_81 : f32 to vector<64x1xf32>
    %158 = arith.divf %156, %157 : vector<64x1xf32>
    %cst_82 = arith.constant 9.99999974E-6 : f32
    %159 = vector.broadcast %cst_82 : f32 to vector<64x1xf32>
    %160 = arith.addf %158, %159 : vector<64x1xf32>
    %161 = math.rsqrt %160 : vector<64x1xf32>
    %162 = vector.broadcast %161 : vector<64x1xf32> to vector<64x128xf32>
    %163 = arith.mulf %153, %162 : vector<64x128xf32>
    %164 = vector.broadcast %145 : vector<1x128xf32> to vector<64x128xf32>
    %165 = arith.mulf %163, %164 : vector<64x128xf32>
    %166 = vector.broadcast %147 : vector<1x128xf32> to vector<64x128xf32>
    %167 = arith.addf %165, %166 : vector<64x128xf32>
    %c0_83 = arith.constant 0 : index
    %c0_84 = arith.constant 0 : index
    %c0_85 = arith.constant 0 : index
    %168 = vector.load %arg18[%c0_83, %c0_84, %c0_85] : memref<1x128x256xf32, #tpu.memory_space<vmem>>, vector<1x128x256xf32>
    %169 = vector.shape_cast %168 : vector<1x128x256xf32> to vector<128x256xf32>
    %cst_86 = arith.constant dense<0.000000e+00> : vector<64x256xf32>
    %170 = tpu.matmul %167, %169, %cst_86 {dimension_numbers = #tpu.dot_dimension_numbers<[1], [0], [0], [1], [0, 0, 1, 1], [], []>} : vector<64x128xf32>, vector<128x256xf32>, vector<64x256xf32> -> vector<64x256xf32>
    %c0_87 = arith.constant 0 : index
    %c0_88 = arith.constant 0 : index
    %c0_89 = arith.constant 0 : index
    %171 = vector.load %arg19[%c0_87, %c0_88, %c0_89] : memref<1x1x256xf32, #tpu.memory_space<vmem>>, vector<1x1x256xf32>
    %172 = vector.shape_cast %171 : vector<1x1x256xf32> to vector<1x256xf32>
    %173 = vector.broadcast %172 : vector<1x256xf32> to vector<64x256xf32>
    %174 = arith.addf %170, %173 : vector<64x256xf32>
    %cst_90 = arith.constant 5.000000e-01 : f32
    %175 = vector.broadcast %cst_90 : f32 to vector<64x256xf32>
    %176 = arith.mulf %175, %174 : vector<64x256xf32>
    %cst_91 = arith.constant 4.471500e-02 : f32
    %177 = vector.broadcast %cst_91 : f32 to vector<64x256xf32>
    %178 = arith.mulf %177, %174 : vector<64x256xf32>
    %179 = arith.mulf %178, %174 : vector<64x256xf32>
    %180 = arith.mulf %179, %174 : vector<64x256xf32>
    %181 = arith.addf %174, %180 : vector<64x256xf32>
    %cst_92 = arith.constant 0.797884583 : f32
    %182 = vector.broadcast %cst_92 : f32 to vector<64x256xf32>
    %183 = arith.mulf %182, %181 : vector<64x256xf32>
    %184 = math.tanh %183 : vector<64x256xf32>
    %cst_93 = arith.constant 1.000000e+00 : f32
    %185 = vector.broadcast %cst_93 : f32 to vector<64x256xf32>
    %186 = arith.addf %185, %184 : vector<64x256xf32>
    %187 = arith.mulf %176, %186 : vector<64x256xf32>
    %c0_94 = arith.constant 0 : index
    %c0_95 = arith.constant 0 : index
    %c0_96 = arith.constant 0 : index
    %188 = vector.load %arg20[%c0_94, %c0_95, %c0_96] : memref<1x256x128xf32, #tpu.memory_space<vmem>>, vector<1x256x128xf32>
    %189 = vector.shape_cast %188 : vector<1x256x128xf32> to vector<256x128xf32>
    %cst_97 = arith.constant dense<0.000000e+00> : vector<64x128xf32>
    %190 = tpu.matmul %187, %189, %cst_97 {dimension_numbers = #tpu.dot_dimension_numbers<[1], [0], [0], [1], [0, 0, 1, 1], [], []>} : vector<64x256xf32>, vector<256x128xf32>, vector<64x128xf32> -> vector<64x128xf32>
    %191 = arith.addf %91, %190 : vector<64x128xf32>
    %c0_98 = arith.constant 0 : index
    %c0_99 = arith.constant 0 : index
    %c0_100 = arith.constant 0 : index
    %192 = vector.load %arg21[%c0_98, %c0_99, %c0_100] : memref<1x1x128xf32, #tpu.memory_space<vmem>>, vector<1x1x128xf32>
    %193 = vector.shape_cast %192 : vector<1x1x128xf32> to vector<1x128xf32>
    %194 = vector.broadcast %193 : vector<1x128xf32> to vector<64x128xf32>
    %195 = arith.addf %191, %194 : vector<64x128xf32>
    %c0_101 = arith.constant 0 : index
    %c0_102 = arith.constant 0 : index
    %196 = vector.load %arg28[%c0_101, %c0_102] : memref<8x128xf32, #tpu.memory_space<vmem>>, vector<8x128xf32>
    tpu.vector_store %arg28[%c0_101, %c0_102], %143 {strides = array<i32>} : memref<8x128xf32, #tpu.memory_space<vmem>>, vector<8x128xf32>,
    %c0_103 = arith.constant 0 : index
    %c0_104 = arith.constant 0 : index
    %197 = vector.load %arg29[%c0_103, %c0_104] : memref<64x128xf32, #tpu.memory_space<vmem>>, vector<64x128xf32>
    tpu.vector_store %arg29[%c0_103, %c0_104], %195 {strides = array<i32>} : memref<64x128xf32, #tpu.memory_space<vmem>>, vector<64x128xf32>,
    %c1_i32 = arith.constant 1 : i32
    %198 = arith.cmpi eq, %arg1, %c1_i32 : i32
    %199 = arith.extui %198 : i1 to i32
    %c0_i32_105 = arith.constant 0 : i32
    %200 = arith.cmpi ne, %199, %c0_i32_105 : i32
    scf.if %200 {
      %c0_106 = arith.constant 0 : index
      %c0_107 = arith.constant 0 : index
      %201 = vector.load %arg22[%c0_106, %c0_107] : memref<128x16xf32, #tpu.memory_space<vmem>>, vector<128x16xf32>
      %cst_108 = arith.constant dense<0.000000e+00> : vector<8x16xf32>
      %202 = tpu.matmul %143, %201, %cst_108 {dimension_numbers = #tpu.dot_dimension_numbers<[1], [0], [0], [1], [0, 0, 1, 1], [], []>} : vector<8x128xf32>, vector<128x16xf32>, vector<8x16xf32> -> vector<8x16xf32>
      %c0_109 = arith.constant 0 : index
      %c0_110 = arith.constant 0 : index
      %203 = vector.load %arg23[%c0_109, %c0_110] : memref<1x16xf32, #tpu.memory_space<vmem>>, vector<1x16xf32>
      %204 = vector.broadcast %203 : vector<1x16xf32> to vector<8x16xf32>
      %205 = arith.addf %202, %204 : vector<8x16xf32>
      %c0_111 = arith.constant 0 : index
      %c0_112 = arith.constant 0 : index
      %c0_113 = arith.constant 0 : index
      %206 = vector.load %arg26[%c0_111, %c0_112, %c0_113] : memref<1x8x16xf32, #tpu.memory_space<vmem>>, vector<1x8x16xf32>
      %207 = vector.shape_cast %206 : vector<1x8x16xf32> to vector<8x16xf32>
      %208 = vector.shape_cast %205 : vector<8x16xf32> to vector<1x8x16xf32>
      tpu.vector_store %arg26[%c0_111, %c0_112, %c0_113], %208 {strides = array<i32>} : memref<1x8x16xf32, #tpu.memory_space<vmem>>, vector<1x8x16xf32>,
      %c0_114 = arith.constant 0 : index
      %c0_115 = arith.constant 0 : index
      %209 = vector.load %arg24[%c0_114, %c0_115] : memref<128x16xf32, #tpu.memory_space<vmem>>, vector<128x16xf32>
      %cst_116 = arith.constant dense<0.000000e+00> : vector<64x16xf32>
      %210 = tpu.matmul %195, %209, %cst_116 {dimension_numbers = #tpu.dot_dimension_numbers<[1], [0], [0], [1], [0, 0, 1, 1], [], []>} : vector<64x128xf32>, vector<128x16xf32>, vector<64x16xf32> -> vector<64x16xf32>
      %c0_117 = arith.constant 0 : index
      %c0_118 = arith.constant 0 : index
      %211 = vector.load %arg25[%c0_117, %c0_118] : memref<1x16xf32, #tpu.memory_space<vmem>>, vector<1x16xf32>
      %212 = vector.broadcast %211 : vector<1x16xf32> to vector<64x16xf32>
      %213 = arith.addf %210, %212 : vector<64x16xf32>
      %214 = vector.shape_cast %213 : vector<64x16xf32> to vector<8x8x16xf32>
      %c0_119 = arith.constant 0 : index
      %c0_120 = arith.constant 0 : index
      %c0_121 = arith.constant 0 : index
      %c0_122 = arith.constant 0 : index
      %215 = vector.load %arg27[%c0_119, %c0_120, %c0_121, %c0_122] : memref<1x8x8x16xf32, #tpu.memory_space<vmem>>, vector<1x8x8x16xf32>
      %216 = vector.shape_cast %215 : vector<1x8x8x16xf32> to vector<8x8x16xf32>
      %217 = vector.shape_cast %214 : vector<8x8x16xf32> to vector<1x8x8x16xf32>
      tpu.vector_store %arg27[%c0_119, %c0_120, %c0_121, %c0_122], %217 {strides = array<i32>} : memref<1x8x8x16xf32, #tpu.memory_space<vmem>>, vector<1x8x8x16xf32>,
    } else {
    }
    return
  }
  func.func @transform_0(%arg0: i32, %arg1: i32) -> (i32, i32, i32) {
    %c0_i32 = arith.constant 0 : i32
    %c0_i32_0 = arith.constant 0 : i32
    %c0_i32_1 = arith.constant 0 : i32
    return %arg0, %c0_i32, %c0_i32_0 : i32, i32, i32
  }
  func.func @transform_1(%arg0: i32, %arg1: i32) -> (i32, i32, i32, i32) {
    %c0_i32 = arith.constant 0 : i32
    %c0_i32_0 = arith.constant 0 : i32
    %c0_i32_1 = arith.constant 0 : i32
    %c0_i32_2 = arith.constant 0 : i32
    return %arg0, %c0_i32, %c0_i32_0, %c0_i32_1 : i32, i32, i32, i32
  }
  func.func @transform_2(%arg0: i32, %arg1: i32) -> (i32, i32) {
    %c0_i32 = arith.constant 0 : i32
    %c0_i32_0 = arith.constant 0 : i32
    %c0_i32_1 = arith.constant 0 : i32
    return %c0_i32, %c0_i32_0 : i32, i32
  }
  func.func @transform_3(%arg0: i32, %arg1: i32) -> (i32, i32) {
    %c0_i32 = arith.constant 0 : i32
    %c0_i32_0 = arith.constant 0 : i32
    %c0_i32_1 = arith.constant 0 : i32
    return %c0_i32, %c0_i32_0 : i32, i32
  }
  func.func @transform_4(%arg0: i32, %arg1: i32) -> (i32, i32) {
    %c0_i32 = arith.constant 0 : i32
    %c0_i32_0 = arith.constant 0 : i32
    %c0_i32_1 = arith.constant 0 : i32
    return %c0_i32, %c0_i32_0 : i32, i32
  }
  func.func @transform_5(%arg0: i32, %arg1: i32) -> (i32, i32) {
    %c0_i32 = arith.constant 0 : i32
    %c0_i32_0 = arith.constant 0 : i32
    %c0_i32_1 = arith.constant 0 : i32
    return %c0_i32, %c0_i32_0 : i32, i32
  }
  func.func @transform_6(%arg0: i32, %arg1: i32) -> (i32, i32, i32) {
    %c0_i32 = arith.constant 0 : i32
    %c0_i32_0 = arith.constant 0 : i32
    %c0_i32_1 = arith.constant 0 : i32
    return %arg1, %c0_i32, %c0_i32_0 : i32, i32, i32
  }
  func.func @transform_7(%arg0: i32, %arg1: i32) -> (i32, i32, i32) {
    %c0_i32 = arith.constant 0 : i32
    %c0_i32_0 = arith.constant 0 : i32
    %c0_i32_1 = arith.constant 0 : i32
    return %arg1, %c0_i32, %c0_i32_0 : i32, i32, i32
  }
  func.func @transform_8(%arg0: i32, %arg1: i32) -> (i32, i32, i32) {
    %c0_i32 = arith.constant 0 : i32
    %c0_i32_0 = arith.constant 0 : i32
    %c0_i32_1 = arith.constant 0 : i32
    return %arg1, %c0_i32, %c0_i32_0 : i32, i32, i32
  }
  func.func @transform_9(%arg0: i32, %arg1: i32) -> (i32, i32, i32) {
    %c0_i32 = arith.constant 0 : i32
    %c0_i32_0 = arith.constant 0 : i32
    %c0_i32_1 = arith.constant 0 : i32
    return %arg1, %c0_i32, %c0_i32_0 : i32, i32, i32
  }
  func.func @transform_10(%arg0: i32, %arg1: i32) -> (i32, i32, i32) {
    %c0_i32 = arith.constant 0 : i32
    %c0_i32_0 = arith.constant 0 : i32
    %c0_i32_1 = arith.constant 0 : i32
    return %arg1, %c0_i32, %c0_i32_0 : i32, i32, i32
  }
  func.func @transform_11(%arg0: i32, %arg1: i32) -> (i32, i32, i32) {
    %c0_i32 = arith.constant 0 : i32
    %c0_i32_0 = arith.constant 0 : i32
    %c0_i32_1 = arith.constant 0 : i32
    return %arg1, %c0_i32, %c0_i32_0 : i32, i32, i32
  }
  func.func @transform_12(%arg0: i32, %arg1: i32) -> (i32, i32, i32) {
    %c0_i32 = arith.constant 0 : i32
    %c0_i32_0 = arith.constant 0 : i32
    %c0_i32_1 = arith.constant 0 : i32
    return %arg1, %c0_i32, %c0_i32_0 : i32, i32, i32
  }
  func.func @transform_13(%arg0: i32, %arg1: i32) -> (i32, i32, i32) {
    %c0_i32 = arith.constant 0 : i32
    %c0_i32_0 = arith.constant 0 : i32
    %c0_i32_1 = arith.constant 0 : i32
    return %arg1, %c0_i32, %c0_i32_0 : i32, i32, i32
  }
  func.func @transform_14(%arg0: i32, %arg1: i32) -> (i32, i32, i32) {
    %c0_i32 = arith.constant 0 : i32
    %c0_i32_0 = arith.constant 0 : i32
    %c0_i32_1 = arith.constant 0 : i32
    return %arg1, %c0_i32, %c0_i32_0 : i32, i32, i32
  }
  func.func @transform_15(%arg0: i32, %arg1: i32) -> (i32, i32, i32) {
    %c0_i32 = arith.constant 0 : i32
    %c0_i32_0 = arith.constant 0 : i32
    %c0_i32_1 = arith.constant 0 : i32
    return %arg1, %c0_i32, %c0_i32_0 : i32, i32, i32
  }
  func.func @transform_16(%arg0: i32, %arg1: i32) -> (i32, i32, i32) {
    %c0_i32 = arith.constant 0 : i32
    %c0_i32_0 = arith.constant 0 : i32
    %c0_i32_1 = arith.constant 0 : i32
    return %arg1, %c0_i32, %c0_i32_0 : i32, i32, i32
  }
  func.func @transform_17(%arg0: i32, %arg1: i32) -> (i32, i32, i32) {
    %c0_i32 = arith.constant 0 : i32
    %c0_i32_0 = arith.constant 0 : i32
    %c0_i32_1 = arith.constant 0 : i32
    return %arg1, %c0_i32, %c0_i32_0 : i32, i32, i32
  }
  func.func @transform_18(%arg0: i32, %arg1: i32) -> (i32, i32, i32) {
    %c0_i32 = arith.constant 0 : i32
    %c0_i32_0 = arith.constant 0 : i32
    %c0_i32_1 = arith.constant 0 : i32
    return %arg1, %c0_i32, %c0_i32_0 : i32, i32, i32
  }
  func.func @transform_19(%arg0: i32, %arg1: i32) -> (i32, i32, i32) {
    %c0_i32 = arith.constant 0 : i32
    %c0_i32_0 = arith.constant 0 : i32
    %c0_i32_1 = arith.constant 0 : i32
    return %arg1, %c0_i32, %c0_i32_0 : i32, i32, i32
  }
  func.func @transform_20(%arg0: i32, %arg1: i32) -> (i32, i32) {
    %c0_i32 = arith.constant 0 : i32
    %c0_i32_0 = arith.constant 0 : i32
    %c0_i32_1 = arith.constant 0 : i32
    return %c0_i32, %c0_i32_0 : i32, i32
  }
  func.func @transform_21(%arg0: i32, %arg1: i32) -> (i32, i32) {
    %c0_i32 = arith.constant 0 : i32
    %c0_i32_0 = arith.constant 0 : i32
    %c0_i32_1 = arith.constant 0 : i32
    return %c0_i32, %c0_i32_0 : i32, i32
  }
  func.func @transform_22(%arg0: i32, %arg1: i32) -> (i32, i32) {
    %c0_i32 = arith.constant 0 : i32
    %c0_i32_0 = arith.constant 0 : i32
    %c0_i32_1 = arith.constant 0 : i32
    return %c0_i32, %c0_i32_0 : i32, i32
  }
  func.func @transform_23(%arg0: i32, %arg1: i32) -> (i32, i32) {
    %c0_i32 = arith.constant 0 : i32
    %c0_i32_0 = arith.constant 0 : i32
    %c0_i32_1 = arith.constant 0 : i32
    return %c0_i32, %c0_i32_0 : i32, i32
  }
  func.func @transform_24(%arg0: i32, %arg1: i32) -> (i32, i32, i32) {
    %c0_i32 = arith.constant 0 : i32
    %c0_i32_0 = arith.constant 0 : i32
    %c0_i32_1 = arith.constant 0 : i32
    return %arg0, %c0_i32, %c0_i32_0 : i32, i32, i32
  }
  func.func @transform_25(%arg0: i32, %arg1: i32) -> (i32, i32, i32, i32) {
    %c0_i32 = arith.constant 0 : i32
    %c0_i32_0 = arith.constant 0 : i32
    %c0_i32_1 = arith.constant 0 : i32
    %c0_i32_2 = arith.constant 0 : i32
    return %arg0, %c0_i32, %c0_i32_0, %c0_i32_1 : i32, i32, i32, i32
  }
}

</mosaic_0001>

<bundles_post_ra>
// kernel: tpu_custom_call.1
= control target key start
LH: loop header
LB: loop body
LE: loop exit
PB: predicated region body
PF: predicated region fallthrough
CT: control target
= control target key end

     0   :  { %s7569_s0 = inlined_call_operand.vmem [shape: f32[2,8,16], index: 0, kind: input, shape index: {}]   ;;  %s7570_s1 = inlined_call_operand.hbm [shape: f32[2,8,8,16], index: 1, kind: input, shape index: {}]   ;;  %s7571_s2 = inlined_call_operand.vmem [shape: f32[16,128], index: 2, kind: input, shape index: {}]   ;;  %s7572_s3 = inlined_call_operand.hbm [shape: f32[1,128], index: 3, kind: input, shape index: {}]   ;;  %s7573_s4 = inlined_call_operand.hbm [shape: f32[16,128], index: 4, kind: input, shape index: {}]   ;;  %s7574_s5 = inlined_call_operand.hbm [shape: f32[1,128], index: 5, kind: input, shape index: {}]   ;;  %s7575_s6 = inlined_call_operand.hbm [shape: f32[2,4,128], index: 6, kind: input, shape index: {}]   ;;  %s7576_s7 = inlined_call_operand.hbm [shape: f32[2,4,128], index: 7, kind: input, shape index: {}]   ;;  %s7577_s8 = inlined_call_operand.hbm [shape: f32[2,128,384], index: 8, kind: input, shape index: {}]   ;;  %s7578_s9 = inlined_call_operand.vmem [shape: f32[2,128,128], index: 9, kind: input, shape index: {}]   ;;  %s7579_s10 = inlined_call_operand.hbm [shape: f32[2,128,128], index: 10, kind: input, shape index: {}]   ;;  %s7580_s11 = inlined_call_operand.hbm [shape: f32[2,128,128], index: 11, kind: input, shape index: {}]   ;;  %s7581_s12 = inlined_call_operand.hbm [shape: f32[2,128,256], index: 12, kind: input, shape index: {}]   ;;  %s7582_s13 = inlined_call_operand.hbm [shape: f32[2,1,256], index: 13, kind: input, shape index: {}]   ;;  %s7583_s14 = inlined_call_operand.hbm [shape: f32[2,256,128], index: 14, kind: input, shape index: {}]   ;;  %s7584_s15 = inlined_call_operand.hbm [shape: f32[2,1,128], index: 15, kind: input, shape index: {}]   ;;  %s7585_s16 = inlined_call_operand.hbm [shape: f32[2,128,256], index: 16, kind: input, shape index: {}]   ;;  %s7586_s17 = inlined_call_operand.hbm [shape: f32[2,1,256], index: 17, kind: input, shape index: {}]   ;;  %s7587_s18 = inlined_call_operand.hbm [shape: f32[2,256,128], index: 18, kind: input, shape index: {}]   ;;  %s7588_s19 = inlined_call_operand.hbm [shape: f32[2,1,128], index: 19, kind: input, shape index: {}]   ;;  %s7589_s20 = inlined_call_operand.vmem [shape: f32[128,16], index: 20, kind: input, shape index: {}]   ;;  %s7590_s21 = inlined_call_operand.vmem [shape: f32[1,16], index: 21, kind: input, shape index: {}]   ;;  %s7591_s22 = inlined_call_operand.vmem [shape: f32[128,16], index: 22, kind: input, shape index: {}]   ;;  %s7592_s23 = inlined_call_operand.vmem [shape: f32[1,16], index: 23, kind: input, shape index: {}]   ;;  %s7593_s24 = inlined_call_operand.hbm [shape: f32[2,8,16], index: 24, kind: output, shape index: {0}]   ;;  %s7594_s25 = inlined_call_operand.hbm [shape: f32[2,8,8,16], index: 25, kind: output, shape index: {1}]  }
   0x1   :  { %7639 = sst [smem:[#allocation53_spill]] %s7569_s0 }
   0x2   :  { %7640 = sst [smem:[#allocation54_spill]] %s7570_s1 }
   0x3   :  { %7641 = sst [smem:[#allocation55_spill]] %s7571_s2 }
   0x4   :  { %7642 = sst [smem:[#allocation56_spill]] %s7572_s3 }
   0x5   :  { %7643 = sst [smem:[#allocation57_spill]] %s7573_s4 }
   0x6   :  { %7644 = sst [smem:[#allocation58_spill]] %s7574_s5 }
   0x7   :  { %7645 = sst [smem:[#allocation59_spill]] %s7575_s6 }
   0x8   :  { %7646 = sst [smem:[#allocation60_spill]] %s7576_s7 }
   0x9   :  { %7647 = sst [smem:[#allocation61_spill]] %s7577_s8 }
   0xa   :  { %7648 = sst [smem:[#allocation62_spill]] %s7578_s9 }
   0xb   :  { %7649 = sst [smem:[#allocation63_spill]] %s7579_s10 }
   0xc   :  { %7650 = sst [smem:[#allocation64_spill]] %s7580_s11 }
   0xd   :  { %7651 = sst [smem:[#allocation65_spill]] %s7581_s12 }
   0xe   :  { %7652 = sst [smem:[#allocation66_spill]] %s7582_s13 }
   0xf   :  { %7653 = sst [smem:[#allocation67_spill]] %s7583_s14 }
  0x10   :  { %7654 = sst [smem:[#allocation68_spill]] %s7584_s15 }
  0x11   :  { %7655 = sst [smem:[#allocation69_spill]] %s7588_s19 }
  0x12   :  { %7656 = sst [smem:[#allocation70_spill]] %s7589_s20 }
  0x13   :  { %7657 = sst [smem:[#allocation71_spill]] %s7590_s21 }
  0x14   :  { %7658 = sst [smem:[#allocation72_spill]] %s7591_s22 }
  0x15   :  { %7659 = sst [smem:[#allocation73_spill]] %s7592_s23 }
  0x16   :  { %7660 = sst [smem:[#allocation74_spill]] %s7593_s24 }
  0x17   :  { %7661 = sst [smem:[#allocation75_spill]] %s7594_s25 }
  0x18   :  { %31 = vsyncpa [#allocation5], 0 }
  0x19   :  { %33 = vsyncpa [#allocation5 + $0x1], 0 }
  0x1a   :  { %34 = vsyncpa [#allocation8], 0 }
  0x1b   :  { %35 = vsyncpa [#allocation11], 0 }
  0x1c   :  { %36 = vsyncpa [#allocation6], 0 }
  0x1d   :  { %38 = vsyncpa [#allocation6 + $0x1], 0 }
  0x1e   :  { %39 = vsyncpa [#allocation27], 0 }
  0x1f   :  { %41 = vsyncpa [#allocation27 + $0x1], 0  ;;  %s6005_s29 = smov 0   ;;  %s6007_s2 = smov 0  }
  0x20   :  { %s6009_s6 = smov 0   ;;  %s6011_s30 = smov 0  }
  0x21   :  { %s6013_s7 = smov 0   ;;  %s6015_s3 = smov 0  }
  0x22   :  { %s6017_s26 = smov 0   ;;  %s6019_s1 = smov 0  }
  0x23   :  { %s6021_s8 = smov 0   ;;  %s6023_s27 = smov 0  }
  0x24   :  { %s6025_s4 = smov 0  }
  0x25 LB: > { %7662 = sst [smem:[#allocation34_spill]] %s5800_s2  ;;  %s6061_s28 = sadd.s32 4294967295, %s5836_s4   ;;  %s5836_s4 = sphi %s6025_s4, %s47_s4   ;;  %s5832_s27 = sphi %s6023_s27, %s7756_s27   ;;  %s5828_s8 = sphi %s6021_s8, %s7758_s8   ;;  %s5824_s1 = sphi %s6019_s1, %s7754_s1   ;;  %s5820_s26 = sphi %s6017_s26, %s7757_s26   ;;  %s5816_s3 = sphi %s6015_s3, %s7753_s3   ;;  %s5812_s7 = sphi %s6013_s7, %s7752_s7   ;;  %s5808_s30 = sphi %s6011_s30, %s7751_s30   ;;  %s5804_s6 = sphi %s6009_s6, %s7750_s6   ;;  %s5800_s2 = sphi %s6007_s2, %s7749_s2   ;;  %s5796_s29 = sphi %s6005_s29, %s7748_s29  }
  0x26   : > { %7663 = sst [smem:[#allocation35_spill]] %s5804_s6  ;;  %s4317_s9 = sadd.s32 4294967294, %s5836_s4  }
  0x27   : > { %7664 = sst [smem:[#allocation36_spill]] %s5808_s30  ;;  %s56_s5 = sadd.s32 1, %s5828_s8 }
  0x28   : > { %7665 = sst [smem:[#allocation37_spill]] %s5812_s7  ;;  %s59_s0 = sadd.s32 1, %s5832_s27 }
  0x29   : > { %7666 = sst [smem:[#allocation38_spill]] %s5816_s3  ;;  %p57_p0 = scmp.ge.s32.totalorder %s56_s5, 2 }
  0x2a   : > { %7667 = sst [smem:[#allocation39_spill]] %s5820_s26  ;;  %s92_s25 = sadd.s32 1, %s5816_s3 }
  0x2b   : > { %7668 = sst [smem:[#allocation40_spill]] %s5824_s1  ;;  %p7605_p1 = scmp.ne.s32.totalorder %s5816_s3, %s5812_s7 }
  0x2c   : > { %7669 = sst [smem:[#allocation41_spill]] %s5832_s27  ;;  %p100_p2 = scmp.eq.s32.totalorder %s5836_s4, 0 }
  0x2d   : > { %7670 = sst [smem:[#allocation42_spill]] %s5836_s4  ;;  %s7760_s5 = smov (%p57_p0, %s56_s5), 0 }
  0x2e   : > { %7671 = sst [smem:[#allocation43_spill]] %s6061_s28  ;;  %s7762_s0 = smov (!%p57_p0, %s59_s0), %s5832_s27 }
  0x2f   : > { %7672 = sst [smem:[#allocation44_spill]] %s7760_s5  ;;  %p6078_p3 = por %p100_p2, %p7605_p1 }
  0x30   : > { %p7604_p4 = scmp.ne.s32.totalorder %s5812_s7, %s5808_s30  ;;  %p61_p5 = scmp.ge.s32.totalorder %s7762_s0, 2 }
  0x31   : > { %s7673_s24 = scalar_select %p6078_p3, 1, 0 }
  0x32   : > { %p7614_p6 = scmp.eq.s32.totalorder %s6061_s28, 0  ;;  %s199_s21 = ssub.s32 %s5828_s8, %s7760_s5 }
  0x33   : > { %s202_s23 = sadd.s32 1, %s5804_s6  ;;  %s7764_s0 = smov (%p61_p5, %s7762_s0), 0 }
  0x34   : > { %7674 = sst [smem:[#allocation45_spill]] %s7764_s0  ;;  %p6095_p7 = por %p7614_p6, %p7604_p4 }
  0x35   : > { %p200_p8 = scmp.eq.s32.totalorder %s199_s21, 0  ;;  %s89_s22 = ssub.s32 %s5832_s27, %s7764_s0 }
  0x36   : > { %s7675_s20 = scalar_select %p6095_p7, 1, 0 }
  0x37   : > { %p209_p9 = scmp.ne.s32.totalorder %s5804_s6, %s5800_s2  ;;  %p90_p10 = scmp.eq.s32.totalorder %s89_s22, 0 }
  0x38   : > { %7676 = sst [smem:[#allocation46_spill]] %s7675_s20  ;;  %p215_p11 = scmp.ne.s32.totalorder %s5800_s2, %s5796_s29 }
  0x39   : > { %s6106_s5 = scalar_select %p200_p8, %s5804_s6, %s202_s23  }
  0x3a   : > { %s6109_s26 = scalar_select %p90_p10, %s5816_s3, %s92_s25  }
  0x3b   : > { %7677 = sst [smem:[#allocation47_spill]] %s6106_s5  ;;  %p6113_p12 = por %p209_p9, %p100_p2 }
  0x3c   : > { %7678 = sst [smem:[#allocation48_spill]] %s6109_s26  ;;  %p6119_p13 = por %p215_p11, %p7614_p6 }
  0x3d   : > { %s7679_s1 = scalar_select %p6113_p12, 1, 0 }
  0x3e   : > { %s7680_s19 = scalar_select %p6119_p13, 1, 0 }
  0x3f   : > { %p661_p0 = scmp.eq.s32.totalorder %s6061_s28, 3  ;;  %p667_p5 = scmp.eq.s32.totalorder %s4317_s9, 3 }
  0x40   : > { %7681 = sst [smem:[#allocation49_spill]] %s7680_s19  ;;  %p4318_p4 = scmp.ge.s32.totalorder %s5836_s4, 1 }
  0x41   : > { %p700_p1 = scmp.lt.s32.totalorder %s5836_s4, 5  ;;  %p7682_p7 = scmp.ne.s32.totalorder %s5816_s3, %s5812_s7 }
  0x42   : > { %p7685_p10 = scmp.ne.s32.totalorder %s5812_s7, %s5808_s30  ;;  %s5838_s25 = smov [#allocation7]  }
  0x43   : > { %p6129_p8 = por %p661_p0, %p7682_p7  ;;  %p6140_p2 = pnand %p4318_p4, %p700_p1 }
  0x44   : > { %p6136_p3 = por %p667_p5, %p7685_p10  ;;  %s716_s29 = sshll.u32 %s5838_s25, 4  ;;  %s717_s29 = int_to_ptr.vmem [resolvable:$true] %s716_s29 }
  0x45   : > { %s7683_s21 = scalar_select %p6129_p8, 1, 0 }
  0x46   : > { %s7686_s22 = scalar_select %p6136_p3, 1, 0 }
  0x47   : > { %7684 = sst [smem:[#allocation50_spill]] %s7683_s21  ;;  %p4998_p9 = pneg %p6140_p2 }
  0x48   : > { %7687 = sst [smem:[#allocation51_spill]] %s7686_s22  ;;  %s5839_s9 = smov [#allocation9]  }
  0x49   : > { %s7688_s23 = scalar_select %p6140_p2, 1, 0 }
  0x4a   : > { %s726_s0 = sshll.u32 %s5839_s9, 4  ;;  %p6148_p7 = pnand %p4998_p9, %p7614_p6  ;;  %s727_s0 = int_to_ptr.vmem [resolvable:$true] %s726_s0 }
  0x4b   : > { %7689 = sst [smem:[#allocation52_spill]] %s7688_s23  ;;  %s5243_s5 = scalar_lea.vmem %s717_s29, 16 }
  0x4c   : > { %p5234_p1 = pneg %p6148_p7  ;;  %p5244_p4 = scmp.ne.s32.totalorder %s717_s29, %s5243_s5 }
  0x4d   : > { %s5250_s25 = scalar_lea.vmem %s717_s29, 32  ;;  %p5251_p5 = scmp.lt.s32.totalorder %s717_s29, %s717_s29 }
  0x4e   : > { %p5246_p11 = pnand %p5244_p4, %p5234_p1  ;;  %p5252_p10 = scmp.lt.s32.totalorder %s5250_s25, %s5243_s5 }
  0x50   : > { %p5247_p0 = pneg %p5246_p11  ;;  %p5253_p3 = por %p5252_p10, %p5251_p5 }
  0x52   : > { %p5254_p8 = pnand %p5253_p3, %p5247_p0 }
  0x54   : > { %5257 = shalt.err (!%p5254_p8)
}
  0x55   : > { %s7691_s30 = sld [smem:[#allocation56_spill]]  ;;  %s5269_s21 = scalar_lea.vmem %s727_s0, 256 }
  0x56   : > { %p5270_p9 = scmp.ne.s32.totalorder %s727_s0, %s5269_s21  ;;  %p5277_p11 = scmp.lt.s32.totalorder %s727_s0, %s727_s0 }
  0x57   : > { %p5278_p13 = scmp.lt.s32.totalorder %s5269_s21, %s5269_s21 }
  0x58   : > { %p5272_p6 = pnand %p5270_p9, %p5234_p1 }
  0x59   : > { %p5279_p2 = por %p5278_p13, %p5277_p11 }
  0x5a   : > { %p5273_p4 = pneg %p5272_p6 }
  0x5b   : > { %5001 = dma.hbm_to_vmem [thread:$0]  (!%p6148_p7), %s7691_s30, 16, %s717_s29, [#allocation8]  }
  0x5c   : > { %p5280_p12 = pnand %p5279_p2, %p5273_p4 }
  0x5e   : > { %5283 = shalt.err (!%p5280_p12)
}
  0x5f   : > { %s5840_s5 = smov 128   ;;  %s5841_s25 = smov 8  }
  0x60   : > { %s7692_s9 = sld [smem:[#allocation57_spill]]  ;;  %s5842_s30 = smov [#allocation10]  }
  0x61   : > { %s740_s29 = sshll.u32 %s5842_s30, 4  ;;  %s741_s29 = int_to_ptr.vmem [resolvable:$true] %s740_s29 }
  0x62   : > { %s5295_s2 = scalar_lea.vmem %s741_s29, 16  ;;  %s5302_s21 = scalar_lea.vmem %s741_s29, 32 }
  0x63   : > { %p5296_p3 = scmp.ne.s32.totalorder %s741_s29, %s5295_s2  ;;  %p5303_p12 = scmp.lt.s32.totalorder %s741_s29, %s741_s29 }
  0x64   : > { %p5304_p8 = scmp.lt.s32.totalorder %s5302_s21, %s5295_s2 }
  0x65   : > { %p5298_p6 = pnand %p5296_p3, %p5234_p1 }
  0x66   : > { %5004 = dma.hbm_to_vmem [thread:$0]  (!%p6148_p7), %s7692_s9, 256, %s727_s0, [#allocation8], %s5840_s5, %s5840_s5, %s5841_s25  }
  0x67   : > { %p5299_p13 = pneg %p5298_p6  ;;  %p5305_p2 = por %p5304_p8, %p5303_p12 }
  0x69   : > { %p5306_p0 = pnand %p5305_p2, %p5299_p13 }
  0x6b   : > { %5309 = shalt.err (!%p5306_p0)
}
  0x6c   : > { %s7693_s0 = sld [smem:[#allocation58_spill]]  ;;  %p4322_p5 = scmp.ge.s32.totalorder %s5836_s4, 4 }
  0x6d   : > { %s770_s5 = sand.u32 (!%p4322_p5), 1, %s5836_s4   ;;  %s772_s25 = sand.u32 (!%p4322_p5), 1, %s5816_s3  }
  0x6e   : > { %759 = sbr.rel (%p4322_p5) target bundleno = 312 (0x138), region = 48  ;;  %s4323_s2 = sshll.u32 (!%p4322_p5), %s772_s25, 6 }
  0x6f   : > { %s4410_s22 = sshll.u32 (!%p4322_p5), %s5832_s27, 10  ;;  %s7694_s21 = sld [smem:[#allocation54_spill]] (!%p4322_p5) }
  0x70   : > { %s774_s7 = scalar_lea.vmem (!%p4322_p5), [#allocation4], %s4323_s2  ;;  %s6186_s20 = sand.u32 (!%p4322_p5), 1, %s5804_s6  }
  0x71   : > { %s781_s28 = sshll.u32 (!%p4322_p5), %s774_s7, 4  ;;  %p7695_p1 = scmp.ne.s32.totalorder (!%p4322_p5), %s7673_s24, 0  ;;  %s782_s28 = int_to_ptr.vmem [resolvable:$true] %s781_s28 }
  0x72   : > { %5007 = dma.hbm_to_vmem [thread:$0]  (!%p6148_p7), %s7693_s0, 16, %s741_s29, [#allocation11]  }
  0x73   : > { %s6188_s29 = scalar_lea.sflag [#allocation5], %s770_s5  ;;  %s5322_s19 = scalar_lea.vmem %s782_s28, 1024 }
  0x74   : > { %p5323_p7 = scmp.ne.s32.totalorder %s782_s28, %s5322_s19  ;;  %s5843_s0 = smov [#allocation4]  }
  0x75   : > { %s780_s26 = scalar_lea.hbm %s7694_s21, %s4410_s22  ;;  %s5326_s3 = sshll.u32 %s5843_s0, 4  ;;  %s5327_s3 = int_to_ptr.vmem [resolvable:$false] %s5326_s3 }
  0x76   : > { %p5324_p10 = pnand %p5323_p7, %p7695_p1  ;;  %s5328_s25 = scalar_lea.vmem %s5327_s3, 2048 }
  0x77   : > { %p5329_p4 = scmp.lt.s32.totalorder %s782_s28, %s5327_s3  ;;  %p5330_p11 = scmp.lt.s32.totalorder %s5328_s25, %s5322_s19 }
  0x78   : > { %p5325_p9 = pneg %p5324_p10 }
  0x79   : > { %p5331_p3 = por %p5330_p11, %p5329_p4 }
  0x7b   : > { %p5332_p6 = pnand %p5331_p3, %p5325_p9 }
  0x7d   : > { %5335 = shalt.err (!%p5332_p6)
}
  0x7e   : > { %s7632_s7 = smov 128   ;;  %s7637_s5 = smov 8  }
  0x7f   : > { %4960 = dma.hbm_to_vmem [thread:$0]  (%p7695_p1), %s780_s26, 1024, %s782_s28, %s6188_s29, %s7632_s7, %s7632_s7, %s7637_s5  }
  0x80   : > { %s4326_s2 = sshll.u32 %s6186_s20, 2  ;;  %s4327_s22 = sshll.u32 %s5828_s8, 6 }
  0x81   : > { %s7696_s30 = sld [smem:[#allocation59_spill]]  ;;  %s795_s19 = scalar_lea.vmem [#allocation12], %s4326_s2 }
  0x82   : > { %s802_s0 = sshll.u32 %s795_s19, 4  ;;  %s7697_s6 = sld [smem:[#allocation60_spill]]  ;;  %s803_s0 = int_to_ptr.vmem [resolvable:$true] %s802_s0 }
  0x83   : > { %s5348_s23 = scalar_lea.vmem %s803_s0, 64  ;;  %p7698_p12 = scmp.ne.s32.totalorder %s7679_s1, 0 }
  0x84   : > { %p5349_p13 = scmp.ne.s32.totalorder %s803_s0, %s5348_s23  ;;  %s5846_s24 = smov [#allocation12]  }
  0x85   : > { %s5352_s28 = sshll.u32 %s5846_s24, 4  ;;  %s5353_s28 = int_to_ptr.vmem [resolvable:$false] %s5352_s28 }
  0x86   : > { %p5350_p8 = pnand %p5349_p13, %p7698_p12  ;;  %s5354_s26 = scalar_lea.vmem %s5353_s28, 128 }
  0x87   : > { %s800_s21 = scalar_lea.hbm %s7696_s30, %s4327_s22  ;;  %p5355_p0 = scmp.lt.s32.totalorder %s803_s0, %s5353_s28 }
  0x88   : > { %s6206_s4 = scalar_lea.hbm %s7697_s6, %s4327_s22  ;;  %p5351_p2 = pneg %p5350_p8 }
  0x89   : > { %p5356_p5 = scmp.lt.s32.totalorder %s5354_s26, %s5348_s23 }
  0x8b   : > { %p5357_p7 = por %p5356_p5, %p5355_p0 }
  0x8d   : > { %p5358_p1 = pnand %p5357_p7, %p5351_p2 }
  0x8f   : > { %5361 = shalt.err (!%p5358_p1)
}
  0x90   : > { %4961 = dma.hbm_to_vmem [thread:$0]  (%p7698_p12), %s800_s21, 64, %s803_s0, %s6188_s29  }
  0x91   : > { %s813_s6 = scalar_lea.vmem [#allocation13], %s4326_s2  ;;  %s4951_s22 = smul.u32 384, %s6186_s20 }
  0x92   : > { %s820_s27 = sshll.u32 %s813_s6, 4  ;;  %s4952_s9 = smul.u32 6144, %s5828_s8  ;;  %s821_s27 = int_to_ptr.vmem [resolvable:$true] %s820_s27 }
  0x93   : > { %s5374_s3 = scalar_lea.vmem %s821_s27, 64  ;;  %s5847_s23 = smov [#allocation13]  }
  0x94   : > { %p5375_p10 = scmp.ne.s32.totalorder %s821_s27, %s5374_s3  ;;  %s5378_s30 = sshll.u32 %s5847_s23, 4  ;;  %s5379_s30 = int_to_ptr.vmem [resolvable:$false] %s5378_s30 }
  0x95   : > { %s5380_s19 = scalar_lea.vmem %s5379_s30, 128  ;;  %p5381_p11 = scmp.lt.s32.totalorder %s821_s27, %s5379_s30 }
  0x96   : > { %p5376_p9 = pnand %p5375_p10, %p7698_p12  ;;  %p5382_p3 = scmp.lt.s32.totalorder %s5380_s19, %s5374_s3 }
  0x98   : > { %p5377_p4 = pneg %p5376_p9  ;;  %p5383_p6 = por %p5382_p3, %p5381_p11 }
  0x9a   : > { %p5384_p13 = pnand %p5383_p6, %p5377_p4 }
  0x9c   : > { %5387 = shalt.err (!%p5384_p13)
}
  0x9d   : > { %4962 = dma.hbm_to_vmem [thread:$0]  (%p7698_p12), %s6206_s4, 64, %s821_s27, %s6188_s29  }
  0x9e   : > { %s7699_s0 = sld [smem:[#allocation61_spill]]  ;;  %s831_s24 = scalar_lea.vmem [#allocation14], %s4951_s22 }
  0x9f   : > { %s838_s28 = sshll.u32 %s831_s24, 4  ;;  %s5848_s6 = smov [#allocation14]   ;;  %s839_s28 = int_to_ptr.vmem [resolvable:$true] %s838_s28 }
  0xa0   : > { %s5400_s26 = scalar_lea.vmem %s839_s28, 6144  ;;  %s5404_s3 = sshll.u32 %s5848_s6, 4  ;;  %s5405_s3 = int_to_ptr.vmem [resolvable:$false] %s5404_s3 }
  0xa1   : > { %p5401_p8 = scmp.ne.s32.totalorder %s839_s28, %s5400_s26  ;;  %s5406_s23 = scalar_lea.vmem %s5405_s3, 12288 }
  0xa2   : > { %p5407_p5 = scmp.lt.s32.totalorder %s839_s28, %s5405_s3  ;;  %p5408_p7 = scmp.lt.s32.totalorder %s5406_s23, %s5400_s26 }
  0xa3   : > { %p5402_p2 = pnand %p5401_p8, %p7698_p12 }
  0xa4   : > { %s837_s25 = scalar_lea.hbm %s7699_s0, %s4952_s9  ;;  %p5409_p1 = por %p5408_p7, %p5407_p5 }
  0xa5   : > { %p5403_p0 = pneg %p5402_p2 }
  0xa7   : > { %p5410_p10 = pnand %p5409_p1, %p5403_p0 }
  0xa9   : > { %5413 = shalt.err (!%p5410_p10)
}
  0xaa   : > { %s5849_s4 = smov 384   ;;  %s5850_s27 = smov 24  }
  0xab   : > { %4963 = dma.hbm_to_vmem [thread:$0]  (%p7698_p12), %s837_s25, 6144, %s839_s28, %s6188_s29, %s5849_s4, %s5849_s4, %s5850_s27  }
  0xac   : > { %s4331_s22 = sshll.u32 %s6186_s20, 7  ;;  %s4411_s9 = sshll.u32 %s5828_s8, 11 }
  0xad   : > { %s7700_s10 = sld [smem:[#allocation63_spill]]  ;;  %s860_s21 = scalar_lea.vmem [#allocation15], %s4331_s22 }
  0xae   : > { %s867_s0 = sshll.u32 %s860_s21, 4  ;;  %s7701_s11 = sld [smem:[#allocation64_spill]]  ;;  %s868_s0 = int_to_ptr.vmem [resolvable:$true] %s867_s0 }
  0xaf   : > { %s5426_s3 = scalar_lea.vmem %s868_s0, 2048  ;;  %s5851_s25 = smov [#allocation15]  }
  0xb0   : > { %p5427_p9 = scmp.ne.s32.totalorder %s868_s0, %s5426_s3  ;;  %s5430_s28 = sshll.u32 %s5851_s25, 4  ;;  %s5431_s28 = int_to_ptr.vmem [resolvable:$false] %s5430_s28 }
  0xb1   : > { %s5432_s23 = scalar_lea.vmem %s5431_s28, 4096  ;;  %p5433_p3 = scmp.lt.s32.totalorder %s868_s0, %s5431_s28 }
  0xb2   : > { %p5428_p4 = pnand %p5427_p9, %p7698_p12  ;;  %p5434_p6 = scmp.lt.s32.totalorder %s5432_s23, %s5426_s3 }
  0xb3   : > { %s866_s2 = scalar_lea.hbm %s7700_s10, %s4411_s9 }
  0xb4   : > { %s6237_s6 = scalar_lea.hbm %s7701_s11, %s4411_s9  ;;  %p5429_p11 = pneg %p5428_p4 }
  0xb5   : > { %p5435_p13 = por %p5434_p6, %p5433_p3 }
  0xb7   : > { %p5436_p8 = pnand %p5435_p13, %p5429_p11 }
  0xb9   : > { %5439 = shalt.err (!%p5436_p8)
}
  0xba   : > { %4964 = dma.hbm_to_vmem [thread:$0]  (%p7698_p12), %s866_s2, 2048, %s868_s0, %s6188_s29, %s7632_s7, %s7632_s7, %s7637_s5  }
  0xbb   : > { %s881_s4 = scalar_lea.vmem [#allocation16], %s4331_s22  ;;  %s6248_s9 = sshll.u32 %s6186_s20, 8 }
  0xbc   : > { %s888_s27 = sshll.u32 %s881_s4, 4  ;;  %s5852_s19 = smov [#allocation16]   ;;  %s889_s27 = int_to_ptr.vmem [resolvable:$true] %s888_s27 }
  0xbd   : > { %s5452_s30 = scalar_lea.vmem %s889_s27, 2048  ;;  %s5456_s21 = sshll.u32 %s5852_s19, 4  ;;  %s5457_s21 = int_to_ptr.vmem [resolvable:$false] %s5456_s21 }
  0xbe   : > { %p5453_p2 = scmp.ne.s32.totalorder %s889_s27, %s5452_s30  ;;  %s5458_s24 = scalar_lea.vmem %s5457_s21, 4096 }
  0xbf   : > { %p5459_p7 = scmp.lt.s32.totalorder %s889_s27, %s5457_s21  ;;  %p5460_p1 = scmp.lt.s32.totalorder %s5458_s24, %s5452_s30 }
  0xc0   : > { %p5454_p0 = pnand %p5453_p2, %p7698_p12 }
  0xc1   : > { %p5461_p10 = por %p5460_p1, %p5459_p7 }
  0xc2   : > { %p5455_p5 = pneg %p5454_p0 }
  0xc4   : > { %p5462_p9 = pnand %p5461_p10, %p5455_p5 }
  0xc6   : > { %5465 = shalt.err (!%p5462_p9)
}
  0xc7   : > { %4965 = dma.hbm_to_vmem [thread:$0]  (%p7698_p12), %s6237_s6, 2048, %s889_s27, %s6188_s29, %s7632_s7, %s7632_s7, %s7637_s5  }
  0xc8   : > { %s6260_s22 = sshll.u32 %s5828_s8, 12  ;;  %s902_s2 = scalar_lea.vmem [#allocation17], %s6248_s9 }
  0xc9   : > { %s909_s0 = sshll.u32 %s902_s2, 4  ;;  %s7702_s12 = sld [smem:[#allocation65_spill]]  ;;  %s910_s0 = int_to_ptr.vmem [resolvable:$true] %s909_s0 }
  0xca   : > { %s5478_s28 = scalar_lea.vmem %s910_s0, 4096  ;;  %s5853_s23 = smov [#allocation17]  }
  0xcb   : > { %p5479_p4 = scmp.ne.s32.totalorder %s910_s0, %s5478_s28  ;;  %s5482_s4 = sshll.u32 %s5853_s23, 4  ;;  %s5483_s4 = int_to_ptr.vmem [resolvable:$false] %s5482_s4 }
  0xcc   : > { %s5484_s30 = scalar_lea.vmem %s5483_s4, 8192  ;;  %p5485_p6 = scmp.lt.s32.totalorder %s910_s0, %s5483_s4 }
  0xcd   : > { %p5480_p11 = pnand %p5479_p4, %p7698_p12  ;;  %p5486_p13 = scmp.lt.s32.totalorder %s5484_s30, %s5478_s28 }
  0xcf   : > { %s908_s25 = scalar_lea.hbm %s7702_s12, %s6260_s22  ;;  %p5481_p3 = pneg %p5480_p11 }
  0xd0   : > { %p5487_p8 = por %p5486_p13, %p5485_p6 }
  0xd2   : > { %p5488_p2 = pnand %p5487_p8, %p5481_p3 }
  0xd4   : > { %5491 = shalt.err (!%p5488_p2)
}
  0xd5   : > { %s7634_s6 = smov 256   ;;  %s5855_s27 = smov 16  }
  0xd6   : > { %4966 = dma.hbm_to_vmem [thread:$0]  (%p7698_p12), %s908_s25, 4096, %s910_s0, %s6188_s29, %s7634_s6, %s7634_s6, %s5855_s27  }
  0xd7   : > { %s7635_s19 = sshll.u32 %s6186_s20, 1  ;;  %s4414_s21 = sshll.u32 %s5828_s8, 5 }
  0xd8   : > { %s7703_s13 = sld [smem:[#allocation66_spill]]  ;;  %s923_s3 = scalar_lea.vmem [#allocation18], %s7635_s19 }
  0xd9   : > { %s931_s28 = sshll.u32 %s923_s3, 4  ;;  %s7704_s14 = sld [smem:[#allocation67_spill]]  ;;  %s932_s28 = int_to_ptr.vmem [resolvable:$true] %s931_s28 }
  0xda   : > { %s5504_s7 = scalar_lea.vmem %s932_s28, 32  ;;  %s5856_s0 = smov [#allocation18]  }
  0xdb   : > { %p5505_p0 = scmp.ne.s32.totalorder %s932_s28, %s5504_s7  ;;  %s5508_s25 = sshll.u32 %s5856_s0, 4  ;;  %s5509_s25 = int_to_ptr.vmem [resolvable:$false] %s5508_s25 }
  0xdc   : > { %s5510_s6 = scalar_lea.vmem %s5509_s25, 64  ;;  %p5511_p1 = scmp.lt.s32.totalorder %s932_s28, %s5509_s25 }
  0xdd   : > { %p5506_p5 = pnand %p5505_p0, %p7698_p12  ;;  %p5512_p10 = scmp.lt.s32.totalorder %s5510_s6, %s5504_s7 }
  0xde   : > { %s929_s26 = scalar_lea.hbm %s7703_s13, %s4414_s21 }
  0xdf   : > { %s948_s30 = scalar_lea.hbm %s7704_s14, %s6260_s22  ;;  %p5507_p7 = pneg %p5506_p5 }
  0xe0   : > { %p5513_p9 = por %p5512_p10, %p5511_p1 }
  0xe2   : > { %p5514_p4 = pnand %p5513_p9, %p5507_p7 }
  0xe4   : > { %5517 = shalt.err (!%p5514_p4)
}
  0xe5   : > { %4967 = dma.hbm_to_vmem [thread:$0]  (%p7698_p12), %s929_s26, 32, %s932_s28, %s6188_s29  }
  0xe6   : > { %s942_s24 = scalar_lea.vmem [#allocation19], %s6248_s9  ;;  %s7636_s3 = sshll.u32 %s5828_s8, 4 }
  0xe7   : > { %s949_s2 = sshll.u32 %s942_s24, 4  ;;  %s5857_s7 = smov [#allocation19]   ;;  %s950_s2 = int_to_ptr.vmem [resolvable:$true] %s949_s2 }
  0xe8   : > { %s5530_s23 = scalar_lea.vmem %s950_s2, 4096  ;;  %s5534_s6 = sshll.u32 %s5857_s7, 4  ;;  %s5535_s6 = int_to_ptr.vmem [resolvable:$false] %s5534_s6 }
  0xe9   : > { %p5531_p11 = scmp.ne.s32.totalorder %s950_s2, %s5530_s23  ;;  %s5536_s4 = scalar_lea.vmem %s5535_s6, 8192 }
  0xea   : > { %p5537_p13 = scmp.lt.s32.totalorder %s950_s2, %s5535_s6  ;;  %p5538_p8 = scmp.lt.s32.totalorder %s5536_s4, %s5530_s23 }
  0xeb   : > { %p5532_p3 = pnand %p5531_p11, %p7698_p12 }
  0xec   : > { %p5539_p2 = por %p5538_p8, %p5537_p13 }
  0xed   : > { %p5533_p6 = pneg %p5532_p3 }
  0xef   : > { %p5540_p0 = pnand %p5539_p2, %p5533_p6 }
  0xf1   : > { %5543 = shalt.err (!%p5540_p0)
}
  0xf2   : > { %s7705_s26 = smov 128   ;;  %s7706_s15 = sld [smem:[#allocation68_spill]] }
  0xf3   : > { %4968 = dma.hbm_to_vmem [thread:$0]  (%p7698_p12), %s948_s30, 4096, %s950_s2, %s6188_s29, %s7705_s26, %s7705_s26, %s7637_s5  }
  0xf4   : > { %s962_s7 = scalar_lea.vmem [#allocation20], %s6186_s20  ;;  %s5858_s28 = smov [#allocation20]  }
  0xf5   : > { %s969_s6 = sshll.u32 %s962_s7, 4  ;;  %s5560_s0 = sshll.u32 %s5858_s28, 4  ;;  %s970_s6 = int_to_ptr.vmem [resolvable:$true] %s969_s6  ;;  %s5561_s0 = int_to_ptr.vmem [resolvable:$false] %s5560_s0 }
  0xf6   : > { %s5556_s4 = scalar_lea.vmem %s970_s6, 16  ;;  %s5562_s19 = scalar_lea.vmem %s5561_s0, 32 }
  0xf7   : > { %p5557_p5 = scmp.ne.s32.totalorder %s970_s6, %s5556_s4  ;;  %p5563_p10 = scmp.lt.s32.totalorder %s970_s6, %s5561_s0 }
  0xf8   : > { %s967_s23 = scalar_lea.hbm %s7706_s15, %s7636_s3  ;;  %p5564_p9 = scmp.lt.s32.totalorder %s5562_s19, %s5556_s4 }
  0xf9   : > { %p5558_p7 = pnand %p5557_p5, %p7698_p12 }
  0xfa   : > { %p5565_p4 = por %p5564_p9, %p5563_p10 }
  0xfb   : > { %p5559_p1 = pneg %p5558_p7 }
  0xfd   : > { %p5566_p11 = pnand %p5565_p4, %p5559_p1 }
  0xff   : > { %5569 = shalt.err (!%p5566_p11)
}
 0x100   : > { %4969 = dma.hbm_to_vmem [thread:$0]  (%p7698_p12), %s967_s23, 16, %s970_s6, %s6188_s29  }
 0x101   : > { %s986_s25 = scalar_lea.hbm %s7585_s16, %s6260_s22  ;;  %s980_s24 = scalar_lea.vmem [#allocation21], %s6248_s9 }
 0x102   : > { %s987_s7 = sshll.u32 %s980_s24, 4  ;;  %s5859_s19 = smov [#allocation21]   ;;  %s988_s7 = int_to_ptr.vmem [resolvable:$true] %s987_s7 }
 0x103   : > { %s5582_s28 = scalar_lea.vmem %s988_s7, 4096  ;;  %s5586_s4 = sshll.u32 %s5859_s19, 4  ;;  %s5587_s4 = int_to_ptr.vmem [resolvable:$false] %s5586_s4 }
 0x104   : > { %p5583_p3 = scmp.ne.s32.totalorder %s988_s7, %s5582_s28  ;;  %s5588_s0 = scalar_lea.vmem %s5587_s4, 8192 }
 0x105   : > { %p5589_p8 = scmp.lt.s32.totalorder %s988_s7, %s5587_s4  ;;  %p5590_p2 = scmp.lt.s32.totalorder %s5588_s0, %s5582_s28 }
 0x106   : > { %p5584_p6 = pnand %p5583_p3, %p7698_p12 }
 0x107   : > { %p5591_p0 = por %p5590_p2, %p5589_p8 }
 0x108   : > { %p5585_p13 = pneg %p5584_p6 }
 0x10a   : > { %p5592_p5 = pnand %p5591_p0, %p5585_p13 }
 0x10c   : > { %5595 = shalt.err (!%p5592_p5)
}
 0x10d   : > { %s7707_s23 = smov 256   ;;  %s1007_s2 = scalar_lea.hbm %s7586_s17, %s4414_s21 }
 0x10e   : > { %4970 = dma.hbm_to_vmem [thread:$0]  (%p7698_p12), %s986_s25, 4096, %s988_s7, %s6188_s29, %s7707_s23, %s7707_s23, %s5855_s27  }
 0x10f   : > { %s7708_s24 = sshll.u32 %s6186_s20, 1  ;;  %s5860_s0 = smov [#allocation22]  }
 0x110   : > { %s1001_s28 = scalar_lea.vmem [#allocation22], %s7708_s24  ;;  %s5612_s3 = sshll.u32 %s5860_s0, 4  ;;  %s5613_s3 = int_to_ptr.vmem [resolvable:$false] %s5612_s3 }
 0x111   : > { %s1009_s19 = sshll.u32 %s1001_s28, 4  ;;  %s5614_s5 = scalar_lea.vmem %s5613_s3, 64  ;;  %s1010_s19 = int_to_ptr.vmem [resolvable:$true] %s1009_s19 }
 0x112   : > { %s5608_s4 = scalar_lea.vmem %s1010_s19, 32  ;;  %p5615_p9 = scmp.lt.s32.totalorder %s1010_s19, %s5613_s3 }
 0x113   : > { %p5609_p7 = scmp.ne.s32.totalorder %s1010_s19, %s5608_s4  ;;  %p5616_p4 = scmp.lt.s32.totalorder %s5614_s5, %s5608_s4 }
 0x115   : > { %p5610_p1 = pnand %p5609_p7, %p7698_p12  ;;  %p5617_p11 = por %p5616_p4, %p5615_p9 }
 0x117   : > { %p5611_p10 = pneg %p5610_p1 }
 0x119   : > { %p5618_p3 = pnand %p5617_p11, %p5611_p10 }
 0x11b   : > { %5621 = shalt.err (!%p5618_p3)
}
 0x11c   : > { %4971 = dma.hbm_to_vmem [thread:$0]  (%p7698_p12), %s1007_s2, 32, %s1010_s19, %s6188_s29  }
 0x11d   : > { %s1026_s25 = scalar_lea.hbm %s7587_s18, %s6260_s22  ;;  %s1020_s7 = scalar_lea.vmem [#allocation23], %s6248_s9 }
 0x11e   : > { %s1027_s23 = sshll.u32 %s1020_s7, 4  ;;  %s5861_s5 = smov [#allocation23]   ;;  %s1028_s23 = int_to_ptr.vmem [resolvable:$true] %s1027_s23 }
 0x11f   : > { %s5634_s6 = scalar_lea.vmem %s1028_s23, 4096  ;;  %s5638_s3 = sshll.u32 %s5861_s5, 4  ;;  %s5639_s3 = int_to_ptr.vmem [resolvable:$false] %s5638_s3 }
 0x120   : > { %p5635_p6 = scmp.ne.s32.totalorder %s1028_s23, %s5634_s6  ;;  %s5640_s30 = scalar_lea.vmem %s5639_s3, 8192 }
 0x121   : > { %p5641_p2 = scmp.lt.s32.totalorder %s1028_s23, %s5639_s3  ;;  %p5642_p0 = scmp.lt.s32.totalorder %s5640_s30, %s5634_s6 }
 0x122   : > { %p5636_p13 = pnand %p5635_p6, %p7698_p12 }
 0x123   : > { %p5643_p5 = por %p5642_p0, %p5641_p2 }
 0x124   : > { %p5637_p8 = pneg %p5636_p13 }
 0x126   : > { %p5644_p7 = pnand %p5643_p5, %p5637_p8 }
 0x128   : > { %5647 = shalt.err (!%p5644_p7)
}
 0x129   : > { %s7709_s22 = smov 8   ;;  %s7710_s9 = sshll.u32 %s5828_s8, 4 }
 0x12a   : > { %4972 = dma.hbm_to_vmem [thread:$0]  (%p7698_p12), %s1026_s25, 4096, %s1028_s23, %s6188_s29, %s7705_s26, %s7705_s26, %s7709_s22  }
 0x12b   : > { %s7711_s28 = sld [smem:[#allocation69_spill]]  ;;  %s1040_s4 = scalar_lea.vmem [#allocation24], %s6186_s20 }
 0x12c   : > { %s1047_s0 = sshll.u32 %s1040_s4, 4  ;;  %s5862_s21 = smov [#allocation24]   ;;  %s1048_s0 = int_to_ptr.vmem [resolvable:$true] %s1047_s0 }
 0x12d   : > { %s5660_s27 = scalar_lea.vmem %s1048_s0, 16  ;;  %s5664_s7 = sshll.u32 %s5862_s21, 4  ;;  %s5665_s7 = int_to_ptr.vmem [resolvable:$false] %s5664_s7 }
 0x12e   : > { %p5661_p1 = scmp.ne.s32.totalorder %s1048_s0, %s5660_s27  ;;  %s5666_s6 = scalar_lea.vmem %s5665_s7, 32 }
 0x12f   : > { %p5667_p4 = scmp.lt.s32.totalorder %s1048_s0, %s5665_s7  ;;  %p5668_p11 = scmp.lt.s32.totalorder %s5666_s6, %s5660_s27 }
 0x130   : > { %p5662_p10 = pnand %p5661_p1, %p7698_p12 }
 0x131   : > { %s1045_s19 = scalar_lea.hbm %s7711_s28, %s7710_s9  ;;  %p5669_p3 = por %p5668_p11, %p5667_p4 }
 0x132   : > { %p5663_p9 = pneg %p5662_p10 }
 0x134   : > { %p5670_p6 = pnand %p5669_p3, %p5663_p9 }
 0x136   : > { %5673 = shalt.err (!%p5670_p6)
}
 0x137   : > { %4973 = dma.hbm_to_vmem [thread:$0]  (%p7698_p12), %s1045_s19, 16, %s1048_s0, %s6188_s29  }
 0x138 PF: > { %s7712_s20 = sld [smem:[#allocation52_spill]] }
 0x13e   : > { %p7713_p13 = scmp.ne.s32.totalorder %s7712_s20, 0 }
 0x13f   : > { %s7714_s26 = sld [smem:[#allocation43_spill]] (!%p7713_p13) }
 0x140   : > { %1056 = sbr.rel (%p7713_p13) target bundleno = 3372 (0xd2c), region = 116  ;;  %s7715_s25 = sld [smem:[#allocation37_spill]] (!%p7713_p13) }
 0x141   : > { %s7716_s23 = sld [smem:[#allocation46_spill]] (!%p7713_p13) }
 0x145   : > { %s1058_s5 = sand.u32 1, %s7714_s26  }
 0x146   : > { %s6372_s3 = sand.u32 1, %s7715_s25   ;;  %s1059_s22 = scalar_lea.sflag [#allocation5], %s1058_s5 }
 0x147   : > { %s7638_s30 = sshll.u32 %s6372_s3, 6  ;;  %p7717_p8 = scmp.ne.s32.totalorder %s7716_s23, 0 }
 0x148   : > { %s6377_s9 = scalar_lea.vmem [#allocation4], %s7638_s30 }
 0x149   : > { %5771 = dma.done.wait (%p7717_p8), %s1059_s22, 1024  }
 0x14a   : > { %5773 = vsyncadd (%p7717_p8), %s1059_s22, 4294966272  ;;  %p7718_p12 = scmp.eq.s32.totalorder %s7714_s26, 0 }
 0x14c   : > { %5775 = dma.done.wait (%p7718_p12), [#allocation8], 272   ;;  %p7719_p2 = pmov %p7718_p12 }
 0x14e   : > { %5777 = vsyncadd (%p7719_p2), [#allocation8], 4294967024  ;;  %p7720_p0 = pmov %p7719_p2 }
 0x150   : > { %5779 = dma.done.wait (%p7720_p0), [#allocation11], 16   ;;  %p7721_p5 = pmov %p7720_p0 }
 0x151   : > { %s7722_s1 = sld [smem:[#allocation34_spill]] }
 0x152   : > { %5781 = vsyncadd (%p7721_p5), [#allocation11], 4294967280  ;;  %s7723_s29 = sld [smem:[#allocation49_spill]] }
 0x157   : > { %s6392_s2 = sand.u32 1, %s7722_s1  }
 0x158   : > { %s4362_s24 = sshll.u32 %s6392_s2, 2  ;;  %p7724_p7 = scmp.ne.s32.totalorder %s7723_s29, 0 }
 0x159   : > { %s6395_s28 = scalar_lea.vmem [#allocation12], %s4362_s24 }
 0x15a   : > { %5783 = dma.done.wait (%p7724_p7), %s1059_s22, 26848  }
 0x15b   : > { %5785 = vsyncadd (%p7724_p7), %s1059_s22, 4294940448  ;;  %s7725_s19 = sld [smem:[#allocation40_spill]]  ;;  %s4953_s0 = smul.u32 384, %s6392_s2 }
 0x15c   : > { %s7726_s4 = sld [smem:[#allocation39_spill]]  ;;  %s4364_s27 = sshll.u32 %s6392_s2, 7 }
 0x15d   : > { %s4366_s21 = sshll.u32 %s6392_s2, 8  ;;  %s4367_s7 = sshll.u32 %s6392_s2, 1 }
 0x15e   : > { %s4372_s6 = sshll.u32 %s6372_s3, 3  ;;  %s7727_s5 = sld [smem:[#allocation53_spill]] }
 0x15f   : > { %s7728_s10 = sld [smem:[#allocation62_spill]]  ;;  %s6420_s12 = scalar_lea.vmem [#allocation13], %s4362_s24 }
 0x160   : > { %s6422_s13 = scalar_lea.vmem [#allocation14], %s4953_s0  ;;  %s6424_s14 = scalar_lea.vmem [#allocation15], %s4364_s27 }
 0x161   : > { %p1333_p1 = scmp.lt.s32.totalorder %s7725_s19, 1  ;;  %s6426_s15 = scalar_lea.vmem [#allocation16], %s4364_s27 }
 0x162   : > { %p1337_p10 = scmp.lt.s32.totalorder %s7726_s4, 1  ;;  %s6430_s25 = scalar_lea.vmem [#allocation18], %s4367_s7 }
 0x163   : > { %s7766_s19 = smov (!%p1333_p1, %s7725_s19), 1  ;;  %s6435_s23 = scalar_lea.vmem [#allocation21], %s4366_s21 }
 0x164   : > { %s1338_s20 = scalar_select %p1337_p10, %s7726_s4, 1 }
 0x165   : > { %s4374_s26 = sshll.u32 %s7766_s19, 3  ;;  %s6428_s19 = scalar_lea.vmem [#allocation17], %s4366_s21 }
 0x166   : > { %s6413_s22 = scalar_lea.vmem %s7727_s5, %s4374_s26  ;;  %s4419_s1 = sshll.u32 %s1338_s20, 7 }
 0x167   : > { %s6418_s11 = scalar_lea.vmem %s7728_s10, %s4419_s1  ;;  %s6432_s26 = scalar_lea.vmem [#allocation19], %s4366_s21 }
 0x168   : > { %s6437_s30 = scalar_lea.vmem [#allocation22], %s4367_s7  ;;  %s6439_s10 = scalar_lea.vmem [#allocation23], %s4366_s21 }
 0x169   : > { %s1189_s24 = scalar_lea.vmem [#allocation24], %s6392_s2  ;;  %s6442_s0 = scalar_lea.vmem [#allocation25], %s4372_s6 }
 0x16a   : > { %s7729_s5 = sshll.u32 %s6372_s3, 6  ;;  %p4377_p9 = scmp.ne.s32.totalorder %s7726_s4, 0 }
 0x16b   : > { %s6446_s1 = scalar_lea.vmem [#allocation26], %s7729_s5  ;;  %s7730_s7 = sld [smem:[#allocation55_spill]] (!%p4377_p9) }
 0x16c   : > { %1345 = sbr.rel (%p4377_p9) target bundleno = 580 (0x244), region = 188 }
 0x171   : > { %v1440_v0 = vld [vmem:[#allocation9 + $0x8] sm:$0xff]  ;;  %v1439_v1 = vld [vmem:[#allocation9] sm:$0xff]  ;;  %s7731_s20 = smov %s7730_s7  ;;  %vm1356_vm0 = vcmask 130048   ;;  %v5863_v3 = vmov 0.0   ;;  %v1434_v5 = vld [vmem:[%s6377_s9 + $0x18] sm:$0xff]  ;;  %vm5864_vm1 = vmmov 0  }
 0x172   : > { %v1348_v2 = vld [vmem:[%s7730_s7 + $0x8] sm:$0xff]  ;;  %4915 = vmatprep.subr.mxu1 %v1440_v0  ;;  %4650 = vmatprep.subr.mxu0 %v5863_v3  ;;  %v1433_v4 = vld [vmem:[%s6377_s9 + $0x10] sm:$0xff]  ;;  %v1347_v6 = vld [vmem:[%s7731_s20] sm:$0xff] }
 0x173   : > { %4917 = vmatpush3.msra.mxu1 %v1440_v0  ;;  %4651 = vmatpush3.msra.mxu0 %v1348_v2  ;;  %v1346_v7 = vld [vmem:[%s6413_s22] sm:$0xff]  ;;  %v1435_v8 = vld [vmem:[%s6377_s9 + $0x20] sm:$0xff]  ;;  %v1436_v10 = vld [vmem:[%s6377_s9 + $0x28] sm:$0xff] }
 0x174   : > { %4916 = vmatprep.subr.mxu1 %v1439_v1  ;;  %4664 = vmatprep.mubr.msk.f32.mxu1 %vm1356_vm0, %v1433_v4  ;;  %v1431_v9 = vld [vmem:[%s6377_s9] sm:$0xff]  ;;  %v1437_v11 = vld [vmem:[%s6377_s9 + $0x30] sm:$0xff]  ;;  %v1432_v12 = vld [vmem:[%s6377_s9 + $0x8] sm:$0xff] }
 0x175   : > { %4918 = vmatpush3.msra.mxu1 %v1439_v1  ;;  %4652 = vmatprep.subr.mxu0 %v5863_v3  ;;  %v1438_v13 = vld [vmem:[%s6377_s9 + $0x38] sm:$0xff]  ;;  %v4380_v14 = vld [vmem:[#allocation10] ss:$0 sm:$0xff]  ;;  %v4378_v16 = vld [vmem:[#allocation7] ss:$0 sm:$0xff] }
 0x176   : > { %4665 = vmatmul.mubr.msk.f32.vlgmr.msra.gmra.mxu1 %vm1356_vm0, %v1434_v5  ;;  %4653 = vmatpush3.msra.mxu0 %v1347_v6 }
 0x177   : > { %4654 = vmatprep.mubr.msk.f32.mxu0 %vm5864_vm1, %v5863_v3  ;;  %4657 = vmatprep.subr.mxu0 %v1440_v0 }
 0x178   : > { %4655 = vmatmul.mubr.msk.f32.vlgmr.msra.gmra.mxu0 %vm1356_vm0, %v1346_v7  ;;  %4667 = vmatprep.mubr.msk.f32.mxu1 %vm1356_vm0, %v1435_v8 }
 0x179   : > { %4658 = vmatpush3.msra.mxu0 %v1440_v0  ;;  %4661 = vmatprep.mubr.msk.f32.mxu0 %vm1356_vm0, %v1431_v9 }
 0x17a   : > { %4659 = vmatprep.subr.mxu0 %v1439_v1  ;;  %4668 = vmatmul.mubr.msk.f32.gmra.mxu1 %vm1356_vm0, %v1436_v10 }
 0x17b   : > { %4660 = vmatpush3.msra.mxu0 %v1439_v1  ;;  %4670 = vmatprep.mubr.msk.f32.mxu1 %vm1356_vm0, %v1437_v11 }
 0x17c   : > { %4662 = vmatmul.mubr.msk.f32.vlgmr.msra.gmra.mxu0 %vm1356_vm0, %v1432_v12 }
 0x17e   : > { %4671 = vmatmul.mubr.msk.f32.gmra.mxu1 %vm1356_vm0, %v1438_v13 }
 0x236   : > { %v4666_v15 = vpop.f32.mrf.mxu1 }
 0x237   : > { %v1554_v17 = vadd.f32 %v4666_v15, %v4380_v14 }
 0x238   : > { %v1426_v18 = vpop.f32.mrf.mxu0  ;;  %v1548_v19 = vpop.f32.mrf.mxu1 }
 0x239   : > { %1580 = vst [vmem:[#allocation3 + $0x10] sm:$0xff] %v1554_v17  ;;  %v1427_v20 = vadd.f32 %v4378_v16, %v1426_v18  ;;  %v1549_v21 = vadd.f32 %v4380_v14, %v1548_v19 }
 0x23a   : > { %v4656_v22 = vpop.f32.mrf.mxu0  ;;  %v4669_v23 = vpop.f32.mrf.mxu1 }
 0x23b   : > { %1430 = vst [vmem:[#allocation2] sm:$0xff] %v1427_v20  ;;  %1579 = vst [vmem:[#allocation3 + $0x18] sm:$0xff] %v1549_v21  ;;  %v1564_v24 = vadd.f32 %v4669_v23, %v4380_v14 }
 0x23c   : > { %v4663_v25 = vpop.f32.mrf.mxu0  ;;  %v1558_v26 = vpop.f32.mrf.mxu1 }
 0x23d   : > { %1582 = vst [vmem:[#allocation3 + $0x20] sm:$0xff] %v1564_v24  ;;  %v1544_v27 = vadd.f32 %v4663_v25, %v4380_v14  ;;  %v1559_v28 = vadd.f32 %v4380_v14, %v1558_v26 }
 0x23e   : > { %v1538_v29 = vpop.f32.mrf.mxu0  ;;  %v4672_v30 = vpop.f32.mrf.mxu1 }
 0x23f   : > { %1578 = vst [vmem:[#allocation3] sm:$0xff] %v1544_v27  ;;  %1581 = vst [vmem:[#allocation3 + $0x8] sm:$0xff] %v1559_v28  ;;  %v1539_v31 = vadd.f32 %v4380_v14, %v1538_v29  ;;  %v1574_v32 = vadd.f32 %v4672_v30, %v4380_v14 }
 0x240   : > { %v1568_v33 = vpop.f32.mrf.mxu1 }
 0x241   : > { %1577 = vst [vmem:[#allocation3 + $0x30] sm:$0xff] %v1539_v31  ;;  %1584 = vst [vmem:[#allocation3 + $0x38] sm:$0xff] %v1574_v32  ;;  %v1569_v34 = vadd.f32 %v4380_v14, %v1568_v33 }
 0x243   : > { %1583 = vst [vmem:[#allocation3 + $0x28] sm:$0xff] %v1569_v34 }
 0x244 PF: > { %v1585_v35 = vld [vmem:[#allocation2] sm:$0xff]  ;;  %v6473_v39 = vld [vmem:[#allocation3 + $0x10] sm:$0xff]  ;;  %v6479_v41 = vld [vmem:[#allocation3 + $0x20] sm:$0xff]  ;;  %v5865_v47 = vmov 0.0   ;;  %vm5866_vm2 = vmmov 0   ;;  %vm2207_vm3 = vcmask 1041409  }
 0x245   : > { %1596 = vadd.xlane.f32.xlu0 %v1585_v35  ;;  %v1588_v38 = vld [vmem:[#allocation3 + $0x18] sm:$0xff]  ;;  %v1777_v45 = vld [vmem:[%s6422_s13 + $0x168] sm:$0xff]  ;;  %4673 = vmatprep.subr.mxu1 %v5865_v47  ;;  %v1772_v50 = vld [vmem:[%s6422_s13 + $0x140] sm:$0xff]  ;;  %vm2209_vm4 = vcmask 1042434   ;;  %vm2211_vm5 = vcmask 1043459   ;;  %vm2213_vm6 = vcmask 1044484  }
 0x246   : > { %v1587_v36 = vld [vmem:[#allocation3] sm:$0xff]  ;;  %v6475_v40 = vld [vmem:[#allocation3 + $0x8] sm:$0xff]  ;;  %v1778_v44 = vld [vmem:[%s6422_s13 + $0x170] sm:$0xff]  ;;  %1844 = vmatprep.mubr.f32.mxu0 %v5865_v47  ;;  %4705 = vmatprep.mubr.msk.f32.mxu1 %vm5866_vm2, %v5865_v47  ;;  %vm2215_vm7 = vcmask 1045509   ;;  %vm2217_vm8 = vcmask 1046534   ;;  %vm2219_vm9 = vcmask 1047559  }
 0x247   : > { %1622 = vadd.xlane.f32.xlu1 %v1587_v36  ;;  %v1775_v46 = vld [vmem:[%s6422_s13 + $0x158] sm:$0xff]  ;;  %1780 = vmatprep.subr.mxu0 %v1778_v44  ;;  %v1774_v49 = vld [vmem:[%s6422_s13 + $0x150] sm:$0xff]  ;;  %v1776_v51 = vld [vmem:[%s6422_s13 + $0x160] sm:$0xff]  ;;  %vm2222_vm10 = vcmask 64512  }
 0x248   : > { %v1586_v37 = vld [vmem:[#allocation3 + $0x30] sm:$0xff]  ;;  %v6485_v43 = vld [vmem:[#allocation3 + $0x38] sm:$0xff]  ;;  %1781 = vmatpush1.msra.mxu0 %v1777_v45  ;;  %v1768_v55 = vld [vmem:[%s6422_s13 + $0x120] sm:$0xff] }
 0x249   : > { %1620 = vadd.xlane.f32.xlu0 %v1586_v37  ;;  %v1779_v48 = vld [vmem:[%s6422_s13 + $0x178] sm:$0xff]  ;;  %1782 = vmatprep.subr.mxu0 %v1775_v46  ;;  %v1773_v53 = vld [vmem:[%s6422_s13 + $0x148] sm:$0xff]  ;;  %v1770_v56 = vld [vmem:[%s6422_s13 + $0x130] sm:$0xff] }
 0x24a   : > { %v6481_v42 = vld [vmem:[#allocation3 + $0x28] sm:$0xff]  ;;  %4674 = vmatpush3.msra.mxu1 %v1779_v48  ;;  %v1771_v52 = vld [vmem:[%s6422_s13 + $0x138] sm:$0xff]  ;;  %1783 = vmatpush1.msra.mxu0 %v1774_v49  ;;  %v1766_v57 = vld [vmem:[%s6422_s13 + $0x110] sm:$0xff] }
 0x24b   : > { %1624 = vadd.xlane.f32.xlu1 %v1588_v38  ;;  %4675 = vmatprep.subr.mxu1 %v5865_v47  ;;  %v1769_v54 = vld [vmem:[%s6422_s13 + $0x128] sm:$0xff]  ;;  %v1763_v28 = vld [vmem:[%s6422_s13 + $0xf8] sm:$0xff]  ;;  %v1762_v30 = vld [vmem:[%s6422_s13 + $0xf0] sm:$0xff] }
 0x24c   : > { %4676 = vmatpush3.msra.mxu1 %v1776_v51  ;;  %1784 = vmatprep.subr.mxu0 %v1772_v50  ;;  %v1765_v25 = vld [vmem:[%s6422_s13 + $0x108] sm:$0xff]  ;;  %v1767_v29 = vld [vmem:[%s6422_s13 + $0x118] sm:$0xff]  ;;  %v1760_v33 = vld [vmem:[%s6422_s13 + $0xe0] sm:$0xff] }
 0x24d   : > { %1626 = vadd.xlane.f32.xlu0 %v6473_v39  ;;  %4677 = vmatprep.subr.mxu1 %v5865_v47  ;;  %v1764_v34 = vld [vmem:[%s6422_s13 + $0x100] sm:$0xff]  ;;  %v1755_v44 = vld [vmem:[%s6422_s13 + $0xb8] sm:$0xff]  ;;  %v1750_v45 = vld [vmem:[%s6422_s13 + $0x90] sm:$0xff] }
 0x24e   : > { %1785 = vmatpush1.msra.mxu0 %v1771_v52  ;;  %4678 = vmatpush3.msra.mxu1 %v1773_v53  ;;  %v1748_v46 = vld [vmem:[%s6422_s13 + $0x80] sm:$0xff]  ;;  %v1747_v49 = vld [vmem:[%s6422_s13 + $0x78] sm:$0xff]  ;;  %v1745_v50 = vld [vmem:[%s6422_s13 + $0x68] sm:$0xff] }
 0x24f   : > { %1628 = vadd.xlane.f32.xlu1 %v6475_v40  ;;  %1786 = vmatprep.subr.mxu0 %v1769_v54  ;;  %v1752_v48 = vld [vmem:[%s6422_s13 + $0xa0] sm:$0xff]  ;;  %v1749_v51 = vld [vmem:[%s6422_s13 + $0x88] sm:$0xff]  ;;  %v1742_v53 = vld [vmem:[%s6422_s13 + $0x50] sm:$0xff] }
 0x250   : > { %4679 = vmatprep.subr.mxu1 %v5865_v47  ;;  %1787 = vmatpush1.msra.mxu0 %v1768_v55  ;;  %v1744_v52 = vld [vmem:[%s6422_s13 + $0x60] sm:$0xff]  ;;  %v1746_v54 = vld [vmem:[%s6422_s13 + $0x70] sm:$0xff]  ;;  %v1741_v55 = vld [vmem:[%s6422_s13 + $0x48] sm:$0xff] }
 0x251   : > { %1630 = vadd.xlane.f32.xlu0 %v6479_v41  ;;  %4680 = vmatpush3.msra.mxu1 %v1770_v56  ;;  %v1739_v56 = vld [vmem:[%s6422_s13 + $0x38] sm:$0xff] }
 0x252   : > { %1788 = vmatprep.subr.mxu0 %v1766_v57  ;;  %4681 = vmatprep.subr.mxu1 %v5865_v47  ;;  %v1743_v57 = vld [vmem:[%s6422_s13 + $0x58] sm:$0xff] }
 0x253   : > { %1632 = vadd.xlane.f32.xlu1 %v6481_v42  ;;  %1789 = vmatpush1.msra.mxu0 %v1765_v25 }
 0x254   : > { %1790 = vmatprep.subr.mxu0 %v1763_v28  ;;  %4682 = vmatpush3.msra.mxu1 %v1767_v29  ;;  %v6602_v29 = vld [vmem:[%s6420_s12] ss:$0 sm:$0xff] }
 0x255   : > { %1634 = vadd.xlane.f32.xlu0 %v6485_v43  ;;  %1791 = vmatpush1.msra.mxu0 %v1762_v30 }
 0x256   : > { %4683 = vmatprep.subr.mxu1 %v5865_v47  ;;  %1792 = vmatprep.subr.mxu0 %v1760_v33 }
 0x257   : > { %4684 = vmatpush3.msra.mxu1 %v1764_v34  ;;  %v6607_v34 = vld [vmem:[%s6420_s12 + $0x1] ss:$0 sm:$0xff] }
 0x258   : > { %4685 = vmatprep.subr.mxu1 %v5865_v47 }
 0x2ce   : > { %v1597_v58 = vpop.xlane.xlu0 %1596 }
 0x2cf   : > { %v1599_v60 = vmul.f32 0.0078125, %v1597_v58  ;;  %v1738_v58 = vld [vmem:[%s6422_s13 + $0x30] sm:$0xff] }
 0x2d0   : > { %v1623_v59 = vpop.xlane.xlu1 %1622 }
 0x2d1   : > { %v1637_v61 = vmul.f32 0.0078125, %v1623_v59  ;;  %v6507_v62 = vsub.f32 %v1585_v35, %v1599_v60  ;;  %v1736_v59 = vld [vmem:[%s6422_s13 + $0x20] sm:$0xff] }
 0x2d2   : > { %v1621_v0 = vpop.xlane.xlu0 %1620  ;;  %v1740_v60 = vld [vmem:[%s6422_s13 + $0x40] sm:$0xff] }
 0x2d3   : > { %v6509_v63 = vsub.f32 %v1587_v36, %v1637_v61  ;;  %v1636_v2 = vmul.f32 0.0078125, %v1621_v0  ;;  %v1601_v3 = vmul.f32 %v6507_v62, %v6507_v62  ;;  %v1759_v36 = vld [vmem:[%s6422_s13 + $0xd8] sm:$0xff]  ;;  %v1733_v0 = vld [vmem:[%s6422_s13 + $0x8] sm:$0xff] }
 0x2d4   : > { %v1625_v1 = vpop.xlane.xlu1 %1624  ;;  %1793 = vmatpush1.msra.mxu0 %v1759_v36  ;;  %v1735_v61 = vld [vmem:[%s6422_s13 + $0x18] sm:$0xff] }
 0x2d5   : > { %v1638_v4 = vmul.f32 0.0078125, %v1625_v1  ;;  %v6513_v5 = vsub.f32 %v1586_v37, %v1636_v2  ;;  %1602 = vadd.xlane.f32.xlu1 %v1601_v3  ;;  %v1653_v7 = vmul.f32 %v6509_v63, %v6509_v63  ;;  %v1757_v37 = vld [vmem:[%s6422_s13 + $0xc8] sm:$0xff]  ;;  %v1732_v2 = vld [vmem:[%s6422_s13] sm:$0xff]  ;;  %v1734_v3 = vld [vmem:[%s6422_s13 + $0x10] sm:$0xff] }
 0x2d6   : > { %v1627_v8 = vpop.xlane.xlu0 %1626  ;;  %1794 = vmatprep.subr.mxu0 %v1757_v37  ;;  %v1737_v1 = vld [vmem:[%s6422_s13 + $0x28] sm:$0xff] }
 0x2d7   : > { %v6515_v6 = vsub.f32 %v1588_v38, %v1638_v4  ;;  %v1639_v10 = vmul.f32 0.0078125, %v1627_v8  ;;  %v1652_v11 = vmul.f32 %v6513_v5, %v6513_v5  ;;  %v1761_v38 = vld [vmem:[%s6422_s13 + $0xe8] sm:$0xff] }
 0x2d8   : > { %v1629_v9 = vpop.xlane.xlu1 %1628  ;;  %4686 = vmatpush3.msra.mxu1 %v1761_v38  ;;  %v1937_v4 = vld [vmem:[%s6418_s11 + $0x78] sm:$0xff] }
 0x2d9   : > { %v1640_v12 = vmul.f32 0.0078125, %v1629_v9  ;;  %v6522_v13 = vsub.f32 %v6473_v39, %v1639_v10  ;;  %1662 = vadd.xlane.f32.xlu1 %v1653_v7  ;;  %1660 = vadd.xlane.f32.xlu0 %v1652_v11  ;;  %v1654_v15 = vmul.f32 %v6515_v6, %v6515_v6  ;;  %v1756_v39 = vld [vmem:[%s6422_s13 + $0xc0] sm:$0xff] }
 0x2da   : > { %v1631_v16 = vpop.xlane.xlu0 %1630  ;;  %1795 = vmatpush1.msra.mxu0 %v1756_v39  ;;  %4687 = vmatprep.subr.mxu1 %v5865_v47 }
 0x2db   : > { %v6525_v14 = vsub.f32 %v6475_v40, %v1640_v12  ;;  %v1641_v18 = vmul.f32 0.0078125, %v1631_v16  ;;  %v1655_v19 = vmul.f32 %v6522_v13, %v6522_v13  ;;  %v1754_v40 = vld [vmem:[%s6422_s13 + $0xb0] sm:$0xff] }
 0x2dc   : > { %v1633_v17 = vpop.xlane.xlu1 %1632  ;;  %1796 = vmatprep.subr.mxu0 %v1754_v40 }
 0x2dd   : > { %v1642_v20 = vmul.f32 0.0078125, %v1633_v17  ;;  %v6532_v21 = vsub.f32 %v6479_v41, %v1641_v18  ;;  %1664 = vadd.xlane.f32.xlu0 %v1654_v15  ;;  %1666 = vadd.xlane.f32.xlu1 %v1655_v19  ;;  %v1656_v23 = vmul.f32 %v6525_v14, %v6525_v14  ;;  %v1758_v41 = vld [vmem:[%s6422_s13 + $0xd0] sm:$0xff] }
 0x2de   : > { %v1635_v24 = vpop.xlane.xlu0 %1634  ;;  %4688 = vmatpush3.msra.mxu1 %v1758_v41  ;;  %v4389_v18 = vld [vmem:[%s6395_s28] ss:$0 sm:$0xff] }
 0x2df   : > { %v6535_v22 = vsub.f32 %v6481_v42, %v1642_v20  ;;  %v1643_v26 = vmul.f32 0.0078125, %v1635_v24  ;;  %v1657_v27 = vmul.f32 %v6532_v21, %v6532_v21  ;;  %v1753_v42 = vld [vmem:[%s6422_s13 + $0xa8] sm:$0xff]  ;;  %4689 = vmatprep.subr.mxu1 %v5865_v47  ;;  %v1934_v41 = vld [vmem:[%s6418_s11 + $0x60] sm:$0xff] }
 0x2e0   : > { %1797 = vmatpush1.msra.mxu0 %v1753_v42  ;;  %4690 = vmatpush3.msra.mxu1 %v1755_v44 }
 0x2e1   : > { %v6546_v31 = vsub.f32 %v6485_v43, %v1643_v26  ;;  %1668 = vadd.xlane.f32.xlu0 %v1656_v23  ;;  %1670 = vadd.xlane.f32.xlu1 %v1657_v27  ;;  %v1658_v32 = vmul.f32 %v6535_v22, %v6535_v22  ;;  %v1751_v43 = vld [vmem:[%s6422_s13 + $0x98] sm:$0xff]  ;;  %v4390_v23 = vld [vmem:[%s6395_s28 + $0x1] ss:$0 sm:$0xff] }
 0x2e2   : > { %1798 = vmatprep.subr.mxu0 %v1751_v43  ;;  %4691 = vmatprep.subr.mxu1 %v5865_v47  ;;  %v1933_v43 = vld [vmem:[%s6418_s11 + $0x58] sm:$0xff] }
 0x2e3   : > { %v1659_v35 = vmul.f32 %v6546_v31, %v6546_v31  ;;  %1799 = vmatpush1.msra.mxu0 %v1750_v45  ;;  %4692 = vmatpush3.msra.mxu1 %v1752_v48 }
 0x2e4   : > { %1800 = vmatprep.subr.mxu0 %v1748_v46  ;;  %4693 = vmatprep.subr.mxu1 %v5865_v47 }
 0x2e5   : > { %1672 = vadd.xlane.f32.xlu0 %v1658_v32  ;;  %1674 = vadd.xlane.f32.xlu1 %v1659_v35  ;;  %v1936_v32 = vld [vmem:[%s6418_s11 + $0x70] sm:$0xff]  ;;  %v1935_v35 = vld [vmem:[%s6418_s11 + $0x68] sm:$0xff] }
 0x2e6   : > { %1801 = vmatpush1.msra.mxu0 %v1747_v49  ;;  %4694 = vmatpush3.msra.mxu1 %v1749_v51  ;;  %v1931_v51 = vld [vmem:[%s6418_s11 + $0x48] sm:$0xff] }
 0x2e7   : > { %1802 = vmatprep.subr.mxu0 %v1745_v50  ;;  %4695 = vmatprep.subr.mxu1 %v5865_v47  ;;  %v1932_v50 = vld [vmem:[%s6418_s11 + $0x50] sm:$0xff] }
 0x2e8   : > { %1803 = vmatpush1.msra.mxu0 %v1744_v52  ;;  %4696 = vmatpush3.msra.mxu1 %v1746_v54 }
 0x2e9   : > { %1804 = vmatprep.subr.mxu0 %v1742_v53  ;;  %4697 = vmatprep.subr.mxu1 %v5865_v47 }
 0x2ea   : > { %1805 = vmatpush1.msra.mxu0 %v1741_v55  ;;  %4698 = vmatpush3.msra.mxu1 %v1743_v57  ;;  %v1930_v55 = vld [vmem:[%s6418_s11 + $0x40] sm:$0xff] }
 0x2eb   : > { %1806 = vmatprep.subr.mxu0 %v1739_v56  ;;  %4699 = vmatprep.subr.mxu1 %v5865_v47  ;;  %v1929_v56 = vld [vmem:[%s6418_s11 + $0x38] sm:$0xff] }
 0x2ec   : > { %1807 = vmatpush1.msra.mxu0 %v1738_v58  ;;  %4700 = vmatpush3.msra.mxu1 %v1740_v60  ;;  %v1928_v58 = vld [vmem:[%s6418_s11 + $0x30] sm:$0xff] }
 0x2ed   : > { %1808 = vmatprep.subr.mxu0 %v1736_v59  ;;  %4701 = vmatprep.subr.mxu1 %v5865_v47  ;;  %v1927_v59 = vld [vmem:[%s6418_s11 + $0x28] sm:$0xff] }
 0x2ee   : > { %1809 = vmatpush1.msra.mxu0 %v1735_v61  ;;  %4702 = vmatpush3.msra.mxu1 %v1737_v1  ;;  %v1926_v61 = vld [vmem:[%s6418_s11 + $0x20] sm:$0xff]  ;;  %v1925_v1 = vld [vmem:[%s6418_s11 + $0x18] sm:$0xff] }
 0x2ef   : > { %1810 = vmatprep.subr.mxu0 %v1733_v0  ;;  %4703 = vmatprep.subr.mxu1 %v5865_v47 }
 0x2f0   : > { %1811 = vmatpush1.msra.mxu0 %v1732_v2  ;;  %4704 = vmatpush3.msra.mxu1 %v1734_v3 }
 0x2f1   : > { %4708 = vmatprep.subr.mxu0 %v1937_v4  ;;  %4752 = vmatprep.subr.mxu1 %v5865_v47 }
 0x35e   : > { %v1603_v7 = vpop.xlane.xlu1 %1602 }
 0x35f   : > { %v1604_v8 = vmul.f32 0.0078125, %v1603_v7 }
 0x361   : > { %v1605_v9 = vadd.f32 1e-05, %v1604_v8 }
 0x362   : > { %v1661_v10 = vpop.xlane.xlu0 %1660  ;;  %v1663_v15 = vpop.xlane.xlu1 %1662 }
 0x363   : > { %5133 = vrsqrt.f32 %v1605_v9  ;;  %v1676_v11 = vmul.f32 0.0078125, %v1661_v10  ;;  %v1677_v26 = vmul.f32 0.0078125, %v1663_v15  ;;  %v1923_v9 = vld [vmem:[%s6418_s11 + $0x8] sm:$0xff]  ;;  %v1922_v15 = vld [vmem:[%s6418_s11] sm:$0xff] }
 0x365   : > { %v1684_v12 = vadd.f32 1e-05, %v1676_v11  ;;  %v1685_v37 = vadd.f32 1e-05, %v1677_v26 }
 0x366   : > { %v1665_v16 = vpop.xlane.xlu0 %1664  ;;  %v1667_v20 = vpop.xlane.xlu1 %1666 }
 0x367   : > { %5135 = vrsqrt.f32 %v1684_v12  ;;  %v1678_v30 = vmul.f32 0.0078125, %v1665_v16  ;;  %v1679_v38 = vmul.f32 0.0078125, %v1667_v20 }
 0x368   : > { %5137 = vrsqrt.f32 %v1685_v37  ;;  %v2654_v37 = vld [vmem:[%s6426_s15 + $0x40] sm:$0xff] }
 0x369   : > { %v1686_v39 = vadd.f32 1e-05, %v1678_v30  ;;  %v1687_v44 = vadd.f32 1e-05, %v1679_v38  ;;  %v2653_v38 = vld [vmem:[%s6426_s15 + $0x38] sm:$0xff] }
 0x36a   : > { %v1669_v27 = vpop.xlane.xlu0 %1668 }
 0x36b   : > { %v1680_v40 = vmul.f32 0.0078125, %v1669_v27  ;;  %5139 = vrsqrt.f32 %v1686_v39  ;;  %v2652_v39 = vld [vmem:[%s6426_s15 + $0x30] sm:$0xff] }
 0x36c   : > { %5141 = vrsqrt.f32 %v1687_v44  ;;  %v2646_v44 = vld [vmem:[%s6426_s15] sm:$0xff] }
 0x36d   : > { %v1688_v46 = vadd.f32 1e-05, %v1680_v40  ;;  %v2651_v40 = vld [vmem:[%s6426_s15 + $0x28] sm:$0xff] }
 0x36e   : > { %v1673_v42 = vpop.xlane.xlu0 %1672 }
 0x36f   : > { %v1682_v49 = vmul.f32 0.0078125, %v1673_v42  ;;  %5143 = vrsqrt.f32 %v1688_v46  ;;  %v2648_v42 = vld [vmem:[%s6426_s15 + $0x10] sm:$0xff] }
 0x370   : > { %v5134_v17 = vpop.eup %5133 }
 0x371   : > { %v1607_v19 = vmul.f32 %v5134_v17, %v6507_v62  ;;  %v1671_v62 = vpop.xlane.xlu1 %1670  ;;  %v1690_v54 = vadd.f32 1e-05, %v1682_v49 }
 0x372   : > { %v1681_v45 = vmul.f32 0.0078125, %v1671_v62  ;;  %v2659_v62 = vld [vmem:[%s6426_s15 + $0x68] sm:$0xff] }
 0x373   : > { %v1612_v24 = vmul.f32 %v4389_v18, %v1607_v19 }
 0x374   : > { %v5136_v25 = vpop.eup %5135  ;;  %v1689_v52 = vadd.f32 1e-05, %v1681_v45 }
 0x375   : > { %v1617_v28 = vadd.f32 %v4390_v23, %v1612_v24  ;;  %v1700_v33 = vmul.f32 %v5136_v25, %v6513_v5  ;;  %v1675_v48 = vpop.xlane.xlu1 %1674  ;;  %v5138_v60 = vpop.eup %5137 }
 0x376   : > { %v1683_v53 = vmul.f32 0.0078125, %v1675_v48  ;;  %5145 = vrsqrt.f32 %v1689_v52  ;;  %v1701_v2 = vmul.f32 %v5138_v60, %v6509_v63  ;;  %v5867_v48 = vmov 1966171168  }
 0x377   : > { %1845 = vmatmul.mubr.f32.vlgmr.msra.gmra.mxu0 %v1617_v28  ;;  %4706 = vmatmul.mubr.f32.vlgmr.msra.gmra.mxu1 %v1617_v28  ;;  %v1712_v36 = vmul.f32 %v6602_v29, %v1700_v33  ;;  %5147 = vrsqrt.f32 %v1690_v54  ;;  %v2660_v33 = vld [vmem:[%s6426_s15 + $0x70] sm:$0xff]  ;;  %v2046_v49 = vunpack.c.l.s4 %v5867_v48 }
 0x378   : > { %4709 = vmatpush3.msra.mxu0 %v1937_v4  ;;  %4754 = vmatprep.mubr.msk.f32.mxu1 %vm5866_vm2, %v5865_v47  ;;  %v1691_v57 = vadd.f32 1e-05, %v1683_v53  ;;  %v5140_v0 = vpop.eup %5139  ;;  %v1924_v4 = vld [vmem:[%s6418_s11 + $0x10] sm:$0xff]  ;;  %v1713_v10 = vmul.f32 %v6602_v29, %v1701_v2  ;;  %s7732_s11 = scalar_lea.vmem [#allocation20], %s6392_s2 }
 0x379   : > { %4710 = vmatprep.subr.mxu0 %v1936_v32  ;;  %v1724_v5 = vadd.f32 %v6607_v34, %v1712_v36  ;;  %v5142_v3 = vpop.eup %5141  ;;  %v1702_v7 = vmul.f32 %v5140_v0, %v6515_v6  ;;  %v2655_v36 = vld [vmem:[%s6426_s15 + $0x48] sm:$0xff] }
 0x37a   : > { %4711 = vmatpush3.msra.mxu0 %v1936_v32  ;;  %5149 = vrsqrt.f32 %v1691_v57  ;;  %v1703_v11 = vmul.f32 %v5142_v3, %v6522_v13  ;;  %v1725_v6 = vadd.f32 %v6607_v34, %v1713_v10  ;;  %v2661_v32 = vld [vmem:[%s6426_s15 + $0x78] sm:$0xff] }
 0x37b   : > { %4712 = vmatprep.subr.mxu0 %v1935_v35  ;;  %4740 = vmatprep.mubr.f32.mxu0 %v1724_v5  ;;  %v1714_v16 = vmul.f32 %v6602_v29, %v1702_v7  ;;  %v2650_v5 = vld [vmem:[%s6426_s15 + $0x20] sm:$0xff] }
 0x37c   : > { %4713 = vmatpush3.msra.mxu0 %v1935_v35  ;;  %v5144_v8 = vpop.eup %5143  ;;  %v1715_v18 = vmul.f32 %v6602_v29, %v1703_v11  ;;  %v2657_v35 = vld [vmem:[%s6426_s15 + $0x58] sm:$0xff] }
 0x37d   : > { %4714 = vmatprep.subr.mxu0 %v1934_v41  ;;  %v1704_v63 = vmul.f32 %v5144_v8, %v6525_v14  ;;  %v1726_v13 = vadd.f32 %v6607_v34, %v1714_v16 }
 0x37e   : > { %4715 = vmatpush3.msra.mxu0 %v1934_v41  ;;  %v1727_v14 = vadd.f32 %v6607_v34, %v1715_v18  ;;  %v2649_v41 = vld [vmem:[%s6426_s15 + $0x18] sm:$0xff] }
 0x37f   : > { %4716 = vmatprep.subr.mxu0 %v1933_v43  ;;  %v1716_v23 = vmul.f32 %v6602_v29, %v1704_v63 }
 0x380   : > { %4717 = vmatpush3.msra.mxu0 %v1933_v43  ;;  %v2647_v43 = vld [vmem:[%s6426_s15 + $0x8] sm:$0xff] }
 0x381   : > { %4718 = vmatprep.subr.mxu0 %v1932_v50 }
 0x382   : > { %4719 = vmatpush3.msra.mxu0 %v1932_v50  ;;  %v2048_v50 = vlaneseq }
 0x383   : > { %4720 = vmatprep.subr.mxu0 %v1931_v51  ;;  %v5146_v12 = vpop.eup %5145 }
 0x384   : > { %4721 = vmatpush3.msra.mxu0 %v1931_v51  ;;  %v5148_v17 = vpop.eup %5147  ;;  %v1705_v19 = vmul.f32 %v5146_v12, %v6532_v21  ;;  %v1728_v21 = vadd.f32 %v6607_v34, %v1716_v23  ;;  %v2047_v51 = vunpack.c.0.s8 %v2046_v49  ;;  %v6666_v52 = vshrl.u32 %v2048_v50, 7 }
 0x385   : > { %4722 = vmatprep.subr.mxu0 %v1930_v55  ;;  %v1706_v24 = vmul.f32 %v5148_v17, %v6535_v22 }
 0x386   : > { %4723 = vmatpush3.msra.mxu0 %v1930_v55  ;;  %v1717_v25 = vmul.f32 %v6602_v29, %v1705_v19  ;;  %v2050_v55 = vsub.s32 %v2047_v51, %v6666_v52  ;;  %v6670_v0 = vsub.s32 0, %v6666_v52 }
 0x387   : > { %4724 = vmatprep.subr.mxu0 %v1929_v56  ;;  %v5150_v20 = vpop.eup %5149  ;;  %v1718_v27 = vmul.f32 %v6602_v29, %v1706_v24 }
 0x388   : > { %4725 = vmatpush3.msra.mxu0 %v1929_v56  ;;  %v1707_v26 = vmul.f32 %v5150_v20, %v6546_v31  ;;  %v1729_v22 = vadd.f32 %v6607_v34, %v1717_v25 }
 0x389   : > { %4726 = vmatprep.subr.mxu0 %v1928_v58  ;;  %v1730_v30 = vadd.f32 %v6607_v34, %v1718_v27 }
 0x38a   : > { %4727 = vmatpush3.msra.mxu0 %v1928_v58  ;;  %v1719_v28 = vmul.f32 %v6602_v29, %v1707_v26  ;;  %v2658_v29 = vld [vmem:[%s6426_s15 + $0x60] sm:$0xff] }
 0x38b   : > { %4728 = vmatprep.subr.mxu0 %v1927_v59 }
 0x38c   : > { %4729 = vmatpush3.msra.mxu0 %v1927_v59  ;;  %v1731_v31 = vadd.f32 %v6607_v34, %v1719_v28  ;;  %v2656_v34 = vld [vmem:[%s6426_s15 + $0x50] sm:$0xff] }
 0x38d   : > { %4730 = vmatprep.subr.mxu0 %v1926_v61 }
 0x38e   : > { %4731 = vmatpush3.msra.mxu0 %v1926_v61 }
 0x38f   : > { %4732 = vmatprep.subr.mxu0 %v1925_v1 }
 0x390   : > { %4733 = vmatpush3.msra.mxu0 %v1925_v1 }
 0x391   : > { %4734 = vmatprep.subr.mxu0 %v1924_v4 }
 0x392   : > { %4735 = vmatpush3.msra.mxu0 %v1924_v4 }
 0x393   : > { %4736 = vmatprep.subr.mxu0 %v1923_v9 }
 0x394   : > { %4737 = vmatpush3.msra.mxu0 %v1923_v9 }
 0x395   : > { %4738 = vmatprep.subr.mxu0 %v1922_v15 }
 0x396   : > { %4739 = vmatpush3.msra.mxu0 %v1922_v15 }
 0x397   : > { %4741 = vmatmul.mubr.f32.vlgmr.msra.gmra.mxu0 %v1725_v6  ;;  %4792 = vmatprep.subr.mxu0 %v2661_v32 }
 0x398   : > { %4743 = vmatprep.mubr.f32.mxu0 %v1726_v13  ;;  %4793 = vmatpush3.msra.mxu0 %v2661_v32 }
 0x399   : > { %4794 = vmatprep.subr.mxu0 %v2660_v33 }
 0x39a   : > { %4795 = vmatpush3.msra.mxu0 %v2660_v33 }
 0x39b   : > { %4744 = vmatmul.mubr.f32.gmra.mxu0 %v1727_v14  ;;  %4796 = vmatprep.subr.mxu0 %v2659_v62 }
 0x39c   : > { %4746 = vmatprep.mubr.f32.mxu0 %v1728_v21  ;;  %4797 = vmatpush3.msra.mxu0 %v2659_v62 }
 0x39d   : > { %4798 = vmatprep.subr.mxu0 %v2658_v29 }
 0x39e   : > { %4799 = vmatpush3.msra.mxu0 %v2658_v29 }
 0x39f   : > { %4747 = vmatmul.mubr.f32.gmra.mxu0 %v1729_v22  ;;  %4800 = vmatprep.subr.mxu0 %v2657_v35 }
 0x3a0   : > { %4749 = vmatprep.mubr.f32.mxu0 %v1730_v30  ;;  %4801 = vmatpush3.msra.mxu0 %v2657_v35 }
 0x3a1   : > { %4802 = vmatprep.subr.mxu0 %v2656_v34 }
 0x3a2   : > { %4803 = vmatpush3.msra.mxu0 %v2656_v34 }
 0x3a3   : > { %4750 = vmatmul.mubr.f32.gmra.mxu0 %v1731_v31  ;;  %4804 = vmatprep.subr.mxu0 %v2655_v36 }
 0x3a4   : > { %4805 = vmatpush3.msra.mxu0 %v2655_v36 }
 0x3a5   : > { %4806 = vmatprep.subr.mxu0 %v2654_v37 }
 0x3a6   : > { %4807 = vmatpush3.msra.mxu0 %v2654_v37 }
 0x3a7   : > { %4808 = vmatprep.subr.mxu0 %v2653_v38 }
 0x3a8   : > { %4809 = vmatpush3.msra.mxu0 %v2653_v38 }
 0x3a9   : > { %4810 = vmatprep.subr.mxu0 %v2652_v39 }
 0x3aa   : > { %4811 = vmatpush3.msra.mxu0 %v2652_v39 }
 0x3ab   : > { %4812 = vmatprep.subr.mxu0 %v2651_v40 }
 0x3ac   : > { %4813 = vmatpush3.msra.mxu0 %v2651_v40  ;;  %v2174_v40 = vand.u32 127, %v2048_v50 }
 0x3ad   : > { %4814 = vmatprep.subr.mxu0 %v2650_v5 }
 0x3ae   : > { %4815 = vmatpush3.msra.mxu0 %v2650_v5 }
 0x3af   : > { %4816 = vmatprep.subr.mxu0 %v2649_v41 }
 0x3b0   : > { %4817 = vmatpush3.msra.mxu0 %v2649_v41  ;;  %v6682_v41 = vsub.s32 %v2174_v40, %v6666_v52 }
 0x3b1   : > { %4818 = vmatprep.subr.mxu0 %v2648_v42 }
 0x3b2   : > { %4819 = vmatpush3.msra.mxu0 %v2648_v42 }
 0x3b3   : > { %4820 = vmatprep.subr.mxu0 %v2647_v43 }
 0x3b4   : > { %4821 = vmatpush3.msra.mxu0 %v2647_v43 }
 0x3b5   : > { %4822 = vmatprep.subr.mxu0 %v2646_v44 }
 0x3b6   : > { %4823 = vmatpush3.msra.mxu0 %v2646_v44 }
 0x437   : > { %v1917_v45 = vpop.f32.mrf.mxu1  ;;  %v1846_v53 = vpop.f32.mrf.mxu0 }
 0x438   : > { %4753 = vmatpush3.msra.mxu1 %v1917_v45  ;;  %v1921_v54 = vmul.f32 0.088388346, %v1846_v53 }
 0x439   : > { %v4707_v46 = vpop.f32.mrf.mxu1  ;;  %4757 = vmatprep.subr.mxu1 %v5865_v47  ;;  %v1848_v8 = vpop.f32.mrf.mxu0 }
 0x43a   : > { %v2051_v56 = vrot.slane %v1921_v54, %v2050_v55  ;;  %v2044_v57 = vcombine.high %v1921_v54, %v1921_v54 }
 0x43c   : > { %v2059_v58 = vcombine.high %v2051_v56, %v2051_v56  ;;  %v2058_v59 = vrot.slane %v2044_v57, %v2050_v55  ;;  %v2067_v61 = vrot.slane %v2051_v56, %v2050_v55 }
 0x43e   : > { %v2081_v60 = vrot.slane %v2059_v58, %v2050_v55  ;;  %v2060_v1 = vcombine.high %v2058_v59, %v2058_v59  ;;  %v2096_v4 = vrot.slane %v2067_v61, %v6670_v0  ;;  %v2089_v7 = vcombine.high %v2067_v61, %v2067_v61 }
 0x43f   : > { %v2074_v15 = vrot.slane %v2058_v59, %v2050_v55 }
 0x440   : > { %v2100_v2 = vrot.slane %v2081_v60, %v6670_v0  ;;  %v2091_v3 = vcombine.high %v2081_v60, %v2081_v60  ;;  %v2088_v11 = vrot.slane %v2060_v1, %v2050_v55  ;;  %v2133_v63 = vmul.f32 %v2096_v4, %v1848_v8 }
 0x441   : > { %v2104_v17 = vrot.slane %v2089_v7, %v6670_v0  ;;  %v2112_v24 = vrot.slane %v2074_v15, %v6670_v0  ;;  %v2090_v26 = vcombine.high %v2074_v15, %v2074_v15 }
 0x442   : > { %v2134_v9 = vmul.f32 %v2100_v2, %v1848_v8  ;;  %v2108_v10 = vrot.slane %v2091_v3, %v6670_v0  ;;  %v2116_v20 = vrot.slane %v2088_v11, %v6670_v0  ;;  %v2092_v13 = vcombine.high %v2088_v11, %v2088_v11 }
 0x443   : > { %v2135_v25 = vmul.f32 %v2104_v17, %v1848_v8  ;;  %v2137_v32 = vmul.f32 %v2112_v24, %v1848_v8  ;;  %v2120_v33 = vrot.slane %v2090_v26, %v6670_v0  ;;  %v2241_v11 = vsub.s32 3, %v6666_v52 }
 0x444   : > { %v2136_v19 = vmul.f32 %v2108_v10, %v1848_v8  ;;  %v2138_v22 = vmul.f32 %v2116_v20, %v1848_v8  ;;  %v2124_v28 = vrot.slane %v2092_v13, %v6670_v0  ;;  %v2237_v10 = vsub.s32 2, %v6666_v52 }
 0x445   : > { %v2139_v37 = vmul.f32 %v2120_v33, %v1848_v8  ;;  %v2245_v17 = vsub.s32 4, %v6666_v52  ;;  %v2249_v24 = vsub.s32 5, %v6666_v52 }
 0x446   : > { %v2140_v35 = vmul.f32 %v2124_v28, %v1848_v8  ;;  %v5868_v8 = vmov 0  }
 0x447   : > { %5132 = vset.pattern.permute.xlu0 %v5868_v8  ;;  %5131 = vset.pattern.permute.xlu1 %v5868_v8 }
 0x457   : > { %v4742_v12 = vpop.f32.mrf.mxu0 }
 0x458   : > { %v2142_v16 = vmul.f32 %v4742_v12, %v2134_v9  ;;  %v6701_v9 = vsub.s32 1, %v6666_v52 }
 0x459   : > { %v2004_v6 = vpop.f32.mrf.mxu0 }
 0x45a   : > { %v2141_v18 = vmul.f32 %v2133_v63, %v2004_v6  ;;  %2151 = vadd.xlane.f32.xlu1 %v2142_v16 }
 0x45b   : > { %v4745_v23 = vpop.f32.mrf.mxu0 }
 0x45c   : > { %v2144_v14 = vmul.f32 %v4745_v23, %v2136_v19  ;;  %2149 = vadd.xlane.f32.xlu0 %v2141_v18  ;;  %4824 = vmatprep.mubr.f32.mxu0 %v2141_v18 }
 0x45d   : > { %v2014_v21 = vpop.f32.mrf.mxu0  ;;  %4825 = vmatmul.mubr.f32.vlgmr.msra.gmra.mxu0 %v2142_v16 }
 0x45e   : > { %v2143_v27 = vmul.f32 %v2135_v25, %v2014_v21  ;;  %2155 = vadd.xlane.f32.xlu1 %v2144_v14  ;;  %v2253_v21 = vsub.s32 6, %v6666_v52 }
 0x45f   : > { %v4748_v30 = vpop.f32.mrf.mxu0 }
 0x460   : > { %v2146_v31 = vmul.f32 %v4748_v30, %v2138_v22  ;;  %2153 = vadd.xlane.f32.xlu0 %v2143_v27  ;;  %4827 = vmatprep.mubr.f32.mxu0 %v2143_v27  ;;  %v2257_v30 = vsub.s32 7, %v6666_v52 }
 0x461   : > { %v2024_v62 = vpop.f32.mrf.mxu0  ;;  %4828 = vmatmul.mubr.f32.gmra.mxu0 %v2144_v14 }
 0x462   : > { %v2145_v29 = vmul.f32 %v2137_v32, %v2024_v62  ;;  %2159 = vadd.xlane.f32.xlu1 %v2146_v31 }
 0x463   : > { %v4751_v34 = vpop.f32.mrf.mxu0 }
 0x464   : > { %v2148_v36 = vmul.f32 %v4751_v34, %v2140_v35  ;;  %2157 = vadd.xlane.f32.xlu0 %v2145_v29  ;;  %4830 = vmatprep.mubr.f32.mxu0 %v2145_v29 }
 0x465   : > { %v2034_v38 = vpop.f32.mrf.mxu0  ;;  %4831 = vmatmul.mubr.f32.gmra.mxu0 %v2146_v31 }
 0x466   : > { %v2147_v39 = vmul.f32 %v2139_v37, %v2034_v38  ;;  %2163 = vadd.xlane.f32.xlu1 %v2148_v36 }
 0x468   : > { %2161 = vadd.xlane.f32.xlu0 %v2147_v39  ;;  %4833 = vmatprep.mubr.f32.mxu0 %v2147_v39 }
 0x469   : > { %4834 = vmatmul.mubr.f32.gmra.mxu0 %v2148_v36 }
 0x4e3   : > { %v2152_v5 = vpop.xlane.xlu1 %2151 }
 0x4e4   : > { %v2182_v45 = vrot.slane %v2152_v5, %v6682_v41 }
 0x4e5   : > { %v2150_v42 = vpop.xlane.xlu0 %2149 }
 0x4e6   : > { %v2178_v43 = vrot.slane %v2150_v42, %v6682_v41 }
 0x4e7   : > { %v2156_v44 = vpop.xlane.xlu1 %2155 }
 0x4e8   : > { %v2208_v49 = vsel %vm2207_vm3, %v2182_v45, %v2178_v43  ;;  %v2190_v53 = vrot.slane %v2156_v44, %v6682_v41 }
 0x4e9   : > { %v2154_v46 = vpop.xlane.xlu0 %2153 }
 0x4ea   : > { %v2186_v48 = vrot.slane %v2154_v46, %v6682_v41 }
 0x4eb   : > { %v2160_v51 = vpop.xlane.xlu1 %2159 }
 0x4ec   : > { %v2210_v50 = vsel %vm2209_vm4, %v2186_v48, %v2208_v49  ;;  %v2198_v59 = vrot.slane %v2160_v51, %v6682_v41 }
 0x4ed   : > { %v2158_v54 = vpop.xlane.xlu0 %2157  ;;  %v2212_v56 = vsel %vm2211_vm5, %v2190_v53, %v2210_v50 }
 0x4ee   : > { %v2194_v55 = vrot.slane %v2158_v54, %v6682_v41 }
 0x4ef   : > { %v2164_v58 = vpop.xlane.xlu1 %2163 }
 0x4f0   : > { %v2214_v57 = vsel %vm2213_vm6, %v2194_v55, %v2212_v56  ;;  %v2206_v1 = vrot.slane %v2164_v58, %v6682_v41 }
 0x4f1   : > { %v2162_v60 = vpop.xlane.xlu0 %2161  ;;  %v2216_v2 = vsel %vm2215_vm7, %v2198_v59, %v2214_v57 }
 0x4f2   : > { %v2202_v61 = vrot.slane %v2162_v60, %v6682_v41 }
 0x4f4   : > { %v2218_v3 = vsel %vm2217_vm8, %v2202_v61, %v2216_v2 }
 0x4f5   : > { %v2220_v4 = vsel %vm2219_vm9, %v2206_v1, %v2218_v3 }
 0x4f6   : > { %v2223_v7 = vsel %vm2222_vm10, %v2220_v4, -inf }
 0x4f7   : > { %2224 = vmax.xlane.f32.xlu0 %v2223_v7 }
 0x580   : > { %v2225_v12 = vpop.xlane.xlu0 %2224 }
 0x581   : > { %v2230_v15 = vrot.slane %v2225_v12, %v6670_v0  ;;  %v2234_v16 = vrot.slane %v2225_v12, %v6701_v9  ;;  %v2238_v63 = vrot.slane %v2225_v12, %v2237_v10  ;;  %v2242_v6 = vrot.slane %v2225_v12, %v2241_v11 }
 0x582   : > { %v2246_v14 = vrot.slane %v2225_v12, %v2245_v17  ;;  %v2250_v27 = vrot.slane %v2225_v12, %v2249_v24  ;;  %v2254_v31 = vrot.slane %v2225_v12, %v2253_v21  ;;  %v2258_v62 = vrot.slane %v2225_v12, %v2257_v30 }
 0x583   : > { %v2267_v18 = vsub.f32 %v2150_v42, %v2230_v15  ;;  %v2268_v19 = vsub.f32 %v2152_v5, %v2234_v16  ;;  %v2269_v20 = vsub.f32 %v2154_v46, %v2238_v63  ;;  %v2270_v25 = vsub.f32 %v2156_v44, %v2242_v6 }
 0x584   : > { %v2271_v22 = vsub.f32 %v2158_v54, %v2246_v14  ;;  %v2272_v32 = vsub.f32 %v2160_v51, %v2250_v27  ;;  %v2273_v29 = vsub.f32 %v2162_v60, %v2254_v31  ;;  %v2274_v37 = vsub.f32 %v2164_v58, %v2258_v62 }
 0x585   : > { %v2275_v13 = vmul.f32 1.442695, %v2267_v18  ;;  %v2277_v23 = vmul.f32 1.442695, %v2268_v19  ;;  %v2279_v26 = vmul.f32 1.442695, %v2269_v20 }
 0x586   : > { %v2281_v28 = vmul.f32 1.442695, %v2270_v25  ;;  %v2283_v33 = vmul.f32 1.442695, %v2271_v22  ;;  %v2285_v35 = vmul.f32 1.442695, %v2272_v32 }
 0x587   : > { %5151 = vpow2.f32 %v2275_v13  ;;  %v2287_v38 = vmul.f32 1.442695, %v2273_v29  ;;  %v2289_v40 = vmul.f32 1.442695, %v2274_v37  ;;  %v6753_v29 = vpop.f32.mrf.mxu0 }
 0x588   : > { %5153 = vpow2.f32 %v2277_v23 }
 0x589   : > { %5155 = vpow2.f32 %v2279_v26 }
 0x58a   : > { %5157 = vpow2.f32 %v2281_v28 }
 0x58b   : > { %5159 = vpow2.f32 %v2283_v33 }
 0x58c   : > { %5161 = vpow2.f32 %v2285_v35  ;;  %v5223_v35 = vld [vmem:[#allocation3 + $0x30] sm:$0xff] }
 0x58d   : > { %5163 = vpow2.f32 %v2287_v38 }
 0x58e   : > { %5165 = vpow2.f32 %v2289_v40 }
 0x594   : > { %v5152_v34 = vpop.eup %5151 }
 0x595   : > { %v5154_v36 = vpop.eup %5153  ;;  %2300 = vperm.xlu1 %5131, %v5152_v34  }
 0x596   : > { %2303 = vperm.xlu0 %5132, %v5154_v36   ;;  %v5156_v39 = vpop.eup %5155 }
 0x597   : > { %v5158_v5 = vpop.eup %5157 }
 0x598   : > { %v5160_v42 = vpop.eup %5159 }
 0x599   : > { %2306 = vperm.xlu1 %5131, %v5156_v39   ;;  %v5162_v43 = vpop.eup %5161 }
 0x59a   : > { %v5164_v44 = vpop.eup %5163 }
 0x59b   : > { %v5166_v45 = vpop.eup %5165 }
 0x59d   : > { %2309 = vperm.xlu1 %5131, %v5158_v5  }
 0x5a1   : > { %2312 = vperm.xlu1 %5131, %v5160_v42  }
 0x5a5   : > { %2315 = vperm.xlu1 %5131, %v5162_v43  }
 0x5a9   : > { %2318 = vperm.xlu1 %5131, %v5164_v44  }
 0x5ad   : > { %2321 = vperm.xlu1 %5131, %v5166_v45  }
 0x610   : > { %v2301_v46 = vpop.permute.xlu1 %2300 }
 0x611   : > { %v2304_v50 = vpop.permute.xlu0 %2303  ;;  %v2326_v55 = vrot.slane %v2301_v46, %v6682_v41 }
 0x612   : > { %v2330_v54 = vrot.slane %v2304_v50, %v6682_v41 }
 0x614   : > { %v2307_v48 = vpop.permute.xlu1 %2306  ;;  %v2355_v60 = vsel %vm2207_vm3, %v2330_v54, %v2326_v55 }
 0x615   : > { %v2334_v56 = vrot.slane %v2307_v48, %v6682_v41 }
 0x617   : > { %v2356_v1 = vsel %vm2209_vm4, %v2334_v56, %v2355_v60  ;;  %v2574_v56 = vld [vmem:[%s6424_s14 + $0x78] sm:$0xff] }
 0x618   : > { %v2310_v49 = vpop.permute.xlu1 %2309  ;;  %v2570_v60 = vld [vmem:[%s6424_s14 + $0x58] sm:$0xff] }
 0x619   : > { %v2338_v57 = vrot.slane %v2310_v49, %v6682_v41 }
 0x61b   : > { %v2357_v3 = vsel %vm2211_vm5, %v2338_v57, %v2356_v1  ;;  %v2568_v1 = vld [vmem:[%s6424_s14 + $0x48] sm:$0xff] }
 0x61c   : > { %v2313_v51 = vpop.permute.xlu1 %2312 }
 0x61d   : > { %v2342_v58 = vrot.slane %v2313_v51, %v6682_v41 }
 0x61f   : > { %v2358_v4 = vsel %vm2213_vm6, %v2342_v58, %v2357_v3  ;;  %v2573_v58 = vld [vmem:[%s6424_s14 + $0x70] sm:$0xff]  ;;  %v2566_v3 = vld [vmem:[%s6424_s14 + $0x38] sm:$0xff] }
 0x620   : > { %v2316_v53 = vpop.permute.xlu1 %2315 }
 0x621   : > { %v2346_v61 = vrot.slane %v2316_v53, %v6682_v41 }
 0x623   : > { %v2359_v8 = vsel %vm2215_vm7, %v2346_v61, %v2358_v4  ;;  %v2569_v61 = vld [vmem:[%s6424_s14 + $0x50] sm:$0xff] }
 0x624   : > { %v2319_v59 = vpop.permute.xlu1 %2318  ;;  %v2565_v4 = vld [vmem:[%s6424_s14 + $0x30] sm:$0xff] }
 0x625   : > { %v2350_v2 = vrot.slane %v2319_v59, %v6682_v41  ;;  %v2572_v59 = vld [vmem:[%s6424_s14 + $0x68] sm:$0xff] }
 0x627   : > { %v2360_v15 = vsel %vm2217_vm8, %v2350_v2, %v2359_v8  ;;  %v2567_v2 = vld [vmem:[%s6424_s14 + $0x40] sm:$0xff] }
 0x628   : > { %v2322_v7 = vpop.permute.xlu1 %2321  ;;  %v2563_v8 = vld [vmem:[%s6424_s14 + $0x20] sm:$0xff] }
 0x629   : > { %v2354_v12 = vrot.slane %v2322_v7, %v6682_v41  ;;  %v2564_v7 = vld [vmem:[%s6424_s14 + $0x28] sm:$0xff] }
 0x62b   : > { %v2361_v16 = vsel %vm2219_vm9, %v2354_v12, %v2360_v15 }
 0x62c   : > { %v2363_v63 = vsel %vm2222_vm10, %v2361_v16, 0.0 }
 0x62d   : > { %2364 = vadd.xlane.f32.xlu1 %v2363_v63 }
 0x6b6   : > { %v2365_v6 = vpop.xlane.xlu1 %2364 }
 0x6b7   : > { %5167 = vrcp.f32 %v2365_v6  ;;  %v2562_v6 = vld [vmem:[%s6424_s14 + $0x18] sm:$0xff] }
 0x6c4   : > { %v5168_v18 = vpop.eup %5167 }
 0x6c5   : > { %v2371_v19 = vrot.slane %v5168_v18, %v6670_v0  ;;  %v2375_v13 = vrot.slane %v5168_v18, %v6701_v9  ;;  %v2379_v14 = vrot.slane %v5168_v18, %v2237_v10  ;;  %v2383_v26 = vrot.slane %v5168_v18, %v2241_v11 }
 0x6c6   : > { %v2387_v22 = vrot.slane %v5168_v18, %v2245_v17  ;;  %v2391_v31 = vrot.slane %v5168_v18, %v2249_v24  ;;  %v2395_v10 = vrot.slane %v5168_v18, %v2253_v21  ;;  %v2399_v11 = vrot.slane %v5168_v18, %v2257_v30  ;;  %v2728_v17 = vpop.f32.mrf.mxu0  ;;  %v2561_v18 = vld [vmem:[%s6424_s14 + $0x10] sm:$0xff] }
 0x6c7   : > { %v2408_v20 = vmul.f32 %v5152_v34, %v2371_v19  ;;  %v2409_v23 = vmul.f32 %v5154_v36, %v2375_v13  ;;  %v2410_v25 = vmul.f32 %v5156_v39, %v2379_v14  ;;  %v2411_v27 = vmul.f32 %v5158_v5, %v2383_v26  ;;  %v2560_v19 = vld [vmem:[%s6424_s14 + $0x8] sm:$0xff] }
 0x6c8   : > { %v2412_v28 = vmul.f32 %v5160_v42, %v2387_v22  ;;  %v2413_v32 = vmul.f32 %v5162_v43, %v2391_v31  ;;  %v2414_v33 = vmul.f32 %v5164_v44, %v2395_v10  ;;  %v2415_v62 = vmul.f32 %v5166_v45, %v2399_v11  ;;  %v5226_v10 = vld [vmem:[#allocation3 + $0x18] sm:$0xff] }
 0x6c9   : > { %2425 = vperm.xlu0 %5132, %v2408_v20   ;;  %v6755_v34 = vadd.f32 %v5223_v35, %v2728_v17  ;;  %v2559_v20 = vld [vmem:[%s6424_s14] sm:$0xff] }
 0x6cd   : > { %2428 = vperm.xlu0 %5132, %v2409_v23  }
 0x6d1   : > { %2431 = vperm.xlu0 %5132, %v2410_v25   ;;  %v5224_v25 = vld [vmem:[#allocation2] sm:$0xff] }
 0x6d5   : > { %2434 = vperm.xlu0 %5132, %v2411_v27   ;;  %v4829_v27 = vpop.f32.mrf.mxu0 }
 0x6d9   : > { %2437 = vperm.xlu0 %5132, %v2412_v28   ;;  %v5225_v28 = vld [vmem:[#allocation3] sm:$0xff] }
 0x6da   : > { %v6817_v31 = vadd.f32 %v5225_v28, %v6753_v29  ;;  %v2816_v28 = vld [vmem:[%s6428_s19 + $0x90] sm:$0xff] }
 0x6dd   : > { %2440 = vperm.xlu0 %5132, %v2413_v32   ;;  %v2738_v32 = vpop.f32.mrf.mxu0 }
 0x6df   : > { %v4832_v11 = vpop.f32.mrf.mxu0 }
 0x6e1   : > { %2443 = vperm.xlu0 %5132, %v2414_v33   ;;  %v6820_v33 = vadd.f32 %v5226_v10, %v2738_v32  ;;  %v2748_v35 = vpop.f32.mrf.mxu0  ;;  %v2815_v32 = vld [vmem:[%s6428_s19 + $0x88] sm:$0xff]  ;;  %v2814_v10 = vld [vmem:[%s6428_s19 + $0x80] sm:$0xff] }
 0x6e5   : > { %2446 = vperm.xlu0 %5132, %v2415_v62   ;;  %v5227_v62 = vld [vmem:[#allocation3 + $0x10] sm:$0xff] }
 0x6e6   : > { %v6823_v17 = vadd.f32 %v5227_v62, %v4829_v27 }
 0x704   : > { %3044 = vadd.xlane.f32.xlu0 %v6755_v34 }
 0x744   : > { %v2426_v24 = vpop.permute.xlu0 %2425 }
 0x745   : > { %v2451_v40 = vrot.slane %v2426_v24, %v6682_v41  ;;  %v5228_v24 = vld [vmem:[#allocation3 + $0x8] sm:$0xff] }
 0x746   : > { %v6826_v29 = vadd.f32 %v5228_v24, %v2748_v35 }
 0x748   : > { %v2429_v36 = vpop.permute.xlu0 %2428 }
 0x749   : > { %v2455_v52 = vrot.slane %v2429_v36, %v6682_v41  ;;  %v4835_v36 = vpop.f32.mrf.mxu0 }
 0x74b   : > { %v2480_v44 = vsel %vm2207_vm3, %v2455_v52, %v2451_v40 }
 0x74c   : > { %v2432_v37 = vpop.permute.xlu0 %2431 }
 0x74d   : > { %v2459_v30 = vrot.slane %v2432_v37, %v6682_v41  ;;  %v5229_v37 = vld [vmem:[#allocation3 + $0x20] sm:$0xff] }
 0x74f   : > { %v2481_v46 = vsel %vm2209_vm4, %v2459_v30, %v2480_v44  ;;  %v5231_v30 = vld [vmem:[#allocation3 + $0x38] sm:$0xff]  ;;  %v2826_v44 = vld [vmem:[%s6428_s19 + $0xe0] sm:$0xff] }
 0x750   : > { %v2435_v21 = vpop.permute.xlu0 %2434  ;;  %v6835_v40 = vadd.f32 %v5231_v30, %v4835_v36  ;;  %v2809_v30 = vld [vmem:[%s6428_s19 + $0x58] sm:$0xff] }
 0x751   : > { %v2463_v5 = vrot.slane %v2435_v21, %v6682_v41  ;;  %v6829_v21 = vadd.f32 %v5229_v37, %v4832_v11  ;;  %v2813_v11 = vld [vmem:[%s6428_s19 + $0x78] sm:$0xff]  ;;  %v2812_v37 = vld [vmem:[%s6428_s19 + $0x70] sm:$0xff] }
 0x753   : > { %v2482_v49 = vsel %vm2211_vm5, %v2463_v5, %v2481_v46  ;;  %v2829_v5 = vld [vmem:[%s6428_s19 + $0xf8] sm:$0xff]  ;;  %v2824_v46 = vld [vmem:[%s6428_s19 + $0xd0] sm:$0xff] }
 0x754   : > { %v2438_v38 = vpop.permute.xlu0 %2437 }
 0x755   : > { %v2467_v42 = vrot.slane %v2438_v38, %v6682_v41  ;;  %v2758_v38 = vpop.f32.mrf.mxu0 }
 0x757   : > { %v2483_v51 = vsel %vm2213_vm6, %v2467_v42, %v2482_v49  ;;  %v2828_v42 = vld [vmem:[%s6428_s19 + $0xf0] sm:$0xff]  ;;  %v2822_v49 = vld [vmem:[%s6428_s19 + $0xc0] sm:$0xff] }
 0x758   : > { %v2441_v39 = vpop.permute.xlu0 %2440 }
 0x759   : > { %v2471_v45 = vrot.slane %v2441_v39, %v6682_v41  ;;  %v5230_v39 = vld [vmem:[#allocation3 + $0x28] sm:$0xff] }
 0x75a   : > { %v6832_v52 = vadd.f32 %v5230_v39, %v2758_v38  ;;  %v2811_v38 = vld [vmem:[%s6428_s19 + $0x68] sm:$0xff]  ;;  %v2810_v39 = vld [vmem:[%s6428_s19 + $0x60] sm:$0xff] }
 0x75b   : > { %v2484_v53 = vsel %vm2215_vm7, %v2471_v45, %v2483_v51  ;;  %v2825_v45 = vld [vmem:[%s6428_s19 + $0xd8] sm:$0xff] }
 0x75c   : > { %v2444_v43 = vpop.permute.xlu0 %2443  ;;  %v2821_v51 = vld [vmem:[%s6428_s19 + $0xb8] sm:$0xff] }
 0x75d   : > { %v2475_v48 = vrot.slane %v2444_v43, %v6682_v41  ;;  %v2827_v43 = vld [vmem:[%s6428_s19 + $0xe8] sm:$0xff] }
 0x75f   : > { %v2485_v55 = vsel %vm2217_vm8, %v2475_v48, %v2484_v53  ;;  %v2823_v48 = vld [vmem:[%s6428_s19 + $0xc8] sm:$0xff] }
 0x760   : > { %v2447_v50 = vpop.permute.xlu0 %2446 }
 0x761   : > { %v2479_v54 = vrot.slane %v2447_v50, %v6682_v41  ;;  %v2571_v41 = vld [vmem:[%s6424_s14 + $0x60] sm:$0xff] }
 0x763   : > { %v2486_v57 = vsel %vm2219_vm9, %v2479_v54, %v2485_v55 }
 0x764   : > { %4755 = vmatmul.mubr.msk.f32.vlgmr.msra.gmra.mxu1 %vm2222_vm10, %v2486_v57 }
 0x765   : > { %4758 = vmatpush3.msra.mxu1 %v2574_v56  ;;  %4789 = vmatprep.mubr.msk.f32.mxu1 %vm5866_vm2, %v5865_v47 }
 0x766   : > { %4759 = vmatprep.subr.mxu1 %v5865_v47 }
 0x767   : > { %4760 = vmatpush3.msra.mxu1 %v2573_v58 }
 0x768   : > { %4761 = vmatprep.subr.mxu1 %v5865_v47 }
 0x769   : > { %4762 = vmatpush3.msra.mxu1 %v2572_v59 }
 0x76a   : > { %4763 = vmatprep.subr.mxu1 %v5865_v47 }
 0x76b   : > { %4764 = vmatpush3.msra.mxu1 %v2571_v41 }
 0x76c   : > { %4765 = vmatprep.subr.mxu1 %v5865_v47 }
 0x76d   : > { %4766 = vmatpush3.msra.mxu1 %v2570_v60 }
 0x76e   : > { %4767 = vmatprep.subr.mxu1 %v5865_v47 }
 0x76f   : > { %4768 = vmatpush3.msra.mxu1 %v2569_v61 }
 0x770   : > { %4769 = vmatprep.subr.mxu1 %v5865_v47 }
 0x771   : > { %4770 = vmatpush3.msra.mxu1 %v2568_v1 }
 0x772   : > { %4771 = vmatprep.subr.mxu1 %v5865_v47 }
 0x773   : > { %4772 = vmatpush3.msra.mxu1 %v2567_v2 }
 0x774   : > { %4773 = vmatprep.subr.mxu1 %v5865_v47 }
 0x775   : > { %4774 = vmatpush3.msra.mxu1 %v2566_v3 }
 0x776   : > { %4775 = vmatprep.subr.mxu1 %v5865_v47 }
 0x777   : > { %4776 = vmatpush3.msra.mxu1 %v2565_v4 }
 0x778   : > { %4777 = vmatprep.subr.mxu1 %v5865_v47 }
 0x779   : > { %4778 = vmatpush3.msra.mxu1 %v2564_v7 }
 0x77a   : > { %4779 = vmatprep.subr.mxu1 %v5865_v47 }
 0x77b   : > { %4780 = vmatpush3.msra.mxu1 %v2563_v8 }
 0x77c   : > { %4781 = vmatprep.subr.mxu1 %v5865_v47 }
 0x77d   : > { %4782 = vmatpush3.msra.mxu1 %v2562_v6 }
 0x77e   : > { %4783 = vmatprep.subr.mxu1 %v5865_v47 }
 0x77f   : > { %4784 = vmatpush3.msra.mxu1 %v2561_v18 }
 0x780   : > { %4785 = vmatprep.subr.mxu1 %v5865_v47 }
 0x781   : > { %4786 = vmatpush3.msra.mxu1 %v2560_v19  ;;  %v2820_v19 = vld [vmem:[%s6428_s19 + $0xb0] sm:$0xff] }
 0x782   : > { %4787 = vmatprep.subr.mxu1 %v5865_v47 }
 0x783   : > { %4788 = vmatpush3.msra.mxu1 %v2559_v20  ;;  %v2819_v20 = vld [vmem:[%s6428_s19 + $0xa8] sm:$0xff] }
 0x784   : > { %2842 = vmatprep.subr.mxu1 %v2829_v5 }
 0x78d   : > { %v3045_v12 = vpop.xlane.xlu0 %3044 }
 0x78e   : > { %v3060_v15 = vmul.f32 0.0078125, %v3045_v12 }
 0x790   : > { %v6801_v16 = vsub.f32 %v6755_v34, %v3060_v15 }
 0x792   : > { %v3076_v63 = vmul.f32 %v6801_v16, %v6801_v16 }
 0x794   : > { %3084 = vadd.xlane.f32.xlu0 %v3076_v63 }
 0x824   : > { %v2555_v13 = vpop.f32.mrf.mxu1 }
 0x825   : > { %4790 = vmatmul.mubr.f32.vlgmr.msra.gmra.mxu1 %v2555_v13  ;;  %v2818_v13 = vld [vmem:[%s6428_s19 + $0xa0] sm:$0xff] }
 0x826   : > { %v4756_v23 = vpop.f32.mrf.mxu1  ;;  %2906 = vmatprep.mubr.f32.mxu1 %v5865_v47  ;;  %2843 = vmatpush1.msra.mxu1 %v2828_v42 }
 0x827   : > { %2844 = vmatprep.subr.mxu1 %v2827_v43  ;;  %v2817_v23 = vld [vmem:[%s6428_s19 + $0x98] sm:$0xff]  ;;  %v2808_v43 = vld [vmem:[%s6428_s19 + $0x50] sm:$0xff] }
 0x828   : > { %2845 = vmatpush1.msra.mxu1 %v2826_v44  ;;  %v2807_v44 = vld [vmem:[%s6428_s19 + $0x48] sm:$0xff] }
 0x829   : > { %2846 = vmatprep.subr.mxu1 %v2825_v45  ;;  %v2806_v45 = vld [vmem:[%s6428_s19 + $0x40] sm:$0xff] }
 0x82a   : > { %2847 = vmatpush1.msra.mxu1 %v2824_v46  ;;  %v2805_v46 = vld [vmem:[%s6428_s19 + $0x38] sm:$0xff] }
 0x82b   : > { %2848 = vmatprep.subr.mxu1 %v2823_v48  ;;  %v2804_v48 = vld [vmem:[%s6428_s19 + $0x30] sm:$0xff] }
 0x82c   : > { %2849 = vmatpush1.msra.mxu1 %v2822_v49  ;;  %v2803_v49 = vld [vmem:[%s6428_s19 + $0x28] sm:$0xff] }
 0x82d   : > { %2850 = vmatprep.subr.mxu1 %v2821_v51  ;;  %v2802_v51 = vld [vmem:[%s6428_s19 + $0x20] sm:$0xff] }
 0x82e   : > { %2851 = vmatpush1.msra.mxu1 %v2820_v19 }
 0x82f   : > { %2852 = vmatprep.subr.mxu1 %v2819_v20  ;;  %v3185_v20 = vld [vmem:[%s6435_s23 + $0xe8] sm:$0xff] }
 0x830   : > { %2853 = vmatpush1.msra.mxu1 %v2818_v13  ;;  %v3184_v13 = vld [vmem:[%s6435_s23 + $0xe0] sm:$0xff] }
 0x831   : > { %2854 = vmatprep.subr.mxu1 %v2817_v23 }
 0x832   : > { %2855 = vmatpush1.msra.mxu1 %v2816_v28  ;;  %v3181_v28 = vld [vmem:[%s6435_s23 + $0xc8] sm:$0xff] }
 0x833   : > { %2856 = vmatprep.subr.mxu1 %v2815_v32  ;;  %v3180_v32 = vld [vmem:[%s6435_s23 + $0xc0] sm:$0xff] }
 0x834   : > { %2857 = vmatpush1.msra.mxu1 %v2814_v10  ;;  %v3179_v10 = vld [vmem:[%s6435_s23 + $0xb8] sm:$0xff] }
 0x835   : > { %2858 = vmatprep.subr.mxu1 %v2813_v11 }
 0x836   : > { %2859 = vmatpush1.msra.mxu1 %v2812_v37  ;;  %v3177_v37 = vld [vmem:[%s6435_s23 + $0xa8] sm:$0xff] }
 0x837   : > { %2860 = vmatprep.subr.mxu1 %v2811_v38  ;;  %v3176_v38 = vld [vmem:[%s6435_s23 + $0xa0] sm:$0xff] }
 0x838   : > { %2861 = vmatpush1.msra.mxu1 %v2810_v39  ;;  %v3175_v39 = vld [vmem:[%s6435_s23 + $0x98] sm:$0xff] }
 0x839   : > { %2862 = vmatprep.subr.mxu1 %v2809_v30 }
 0x83a   : > { %2863 = vmatpush1.msra.mxu1 %v2808_v43  ;;  %v3174_v43 = vld [vmem:[%s6435_s23 + $0x90] sm:$0xff] }
 0x83b   : > { %2864 = vmatprep.subr.mxu1 %v2807_v44 }
 0x83c   : > { %2865 = vmatpush1.msra.mxu1 %v2806_v45  ;;  %v3173_v45 = vld [vmem:[%s6435_s23 + $0x88] sm:$0xff] }
 0x83d   : > { %2866 = vmatprep.subr.mxu1 %v2805_v46  ;;  %v3172_v46 = vld [vmem:[%s6435_s23 + $0x80] sm:$0xff] }
 0x83e   : > { %2867 = vmatpush1.msra.mxu1 %v2804_v48  ;;  %v3171_v48 = vld [vmem:[%s6435_s23 + $0x78] sm:$0xff] }
 0x83f   : > { %2868 = vmatprep.subr.mxu1 %v2803_v49 }
 0x840   : > { %2869 = vmatpush1.msra.mxu1 %v2802_v51 }
 0x8e5   : > { %v2641_v14 = vpop.f32.mrf.mxu1 }
 0x8e6   : > { %v6813_v26 = vadd.f32 %v5224_v25, %v2641_v14 }
 0x8e7   : > { %v4791_v22 = vpop.f32.mrf.mxu1 }
 0x8e8   : > { %2777 = vadd.xlane.f32.xlu1 %v6813_v26 }
 0x8ec   : > { %3046 = vadd.xlane.f32.xlu1 %v6817_v31 }
 0x8f0   : > { %3048 = vadd.xlane.f32.xlu1 %v6820_v33 }
 0x8f4   : > { %3050 = vadd.xlane.f32.xlu1 %v6823_v17 }
 0x8f8   : > { %3052 = vadd.xlane.f32.xlu1 %v6826_v29 }
 0x8fc   : > { %3054 = vadd.xlane.f32.xlu1 %v6829_v21 }
 0x900   : > { %3056 = vadd.xlane.f32.xlu1 %v6832_v52 }
 0x904   : > { %3058 = vadd.xlane.f32.xlu1 %v6835_v40 }
 0x971   : > { %v2778_v50 = vpop.xlane.xlu1 %2777 }
 0x972   : > { %v2779_v53 = vmul.f32 0.0078125, %v2778_v50  ;;  %v2801_v50 = vld [vmem:[%s6428_s19 + $0x18] sm:$0xff] }
 0x973   : > { %2870 = vmatprep.subr.mxu1 %v2801_v50  ;;  %v3170_v50 = vld [vmem:[%s6435_s23 + $0x70] sm:$0xff] }
 0x974   : > { %v6848_v54 = vsub.f32 %v6813_v26, %v2779_v53  ;;  %v2800_v53 = vld [vmem:[%s6428_s19 + $0x10] sm:$0xff] }
 0x975   : > { %v3047_v55 = vpop.xlane.xlu1 %3046  ;;  %2871 = vmatpush1.msra.mxu1 %v2800_v53 }
 0x976   : > { %v3061_v56 = vmul.f32 0.0078125, %v3047_v55  ;;  %v2781_v57 = vmul.f32 %v6848_v54, %v6848_v54  ;;  %v2799_v55 = vld [vmem:[%s6428_s19 + $0x8] sm:$0xff] }
 0x977   : > { %2872 = vmatprep.subr.mxu1 %v2799_v55  ;;  %v3169_v55 = vld [vmem:[%s6435_s23 + $0x68] sm:$0xff] }
 0x978   : > { %v6853_v58 = vsub.f32 %v6817_v31, %v3061_v56  ;;  %2782 = vadd.xlane.f32.xlu1 %v2781_v57  ;;  %v2798_v56 = vld [vmem:[%s6428_s19] sm:$0xff] }
 0x979   : > { %v3049_v59 = vpop.xlane.xlu1 %3048  ;;  %v3187_v57 = vld [vmem:[%s6435_s23 + $0xf8] sm:$0xff]  ;;  %2873 = vmatpush1.msra.mxu1 %v2798_v56  ;;  %v3168_v56 = vld [vmem:[%s6435_s23 + $0x60] sm:$0xff] }
 0x97a   : > { %v3062_v41 = vmul.f32 0.0078125, %v3049_v59  ;;  %v3077_v60 = vmul.f32 %v6853_v58, %v6853_v58  ;;  %3200 = vmatprep.subr.mxu1 %v3187_v57  ;;  %v3167_v57 = vld [vmem:[%s6435_s23 + $0x58] sm:$0xff] }
 0x97c   : > { %v6858_v61 = vsub.f32 %v6820_v33, %v3062_v41  ;;  %3086 = vadd.xlane.f32.xlu1 %v3077_v60 }
 0x97d   : > { %v3051_v1 = vpop.xlane.xlu1 %3050 }
 0x97e   : > { %v3063_v2 = vmul.f32 0.0078125, %v3051_v1  ;;  %v3078_v3 = vmul.f32 %v6858_v61, %v6858_v61 }
 0x980   : > { %v6863_v4 = vsub.f32 %v6823_v17, %v3063_v2  ;;  %3088 = vadd.xlane.f32.xlu0 %v3078_v3  ;;  %v4394_v2 = vld [vmem:[%s6395_s28 + $0x2] ss:$0 sm:$0xff]  ;;  %v3085_v3 = vpop.xlane.xlu0 %3084 }
 0x981   : > { %v3053_v7 = vpop.xlane.xlu1 %3052 }
 0x982   : > { %v3064_v8 = vmul.f32 0.0078125, %v3053_v7  ;;  %v3079_v12 = vmul.f32 %v6863_v4, %v6863_v4 }
 0x984   : > { %v6868_v15 = vsub.f32 %v6826_v29, %v3064_v8  ;;  %3090 = vadd.xlane.f32.xlu1 %v3079_v12  ;;  %v4395_v8 = vld [vmem:[%s6395_s28 + $0x3] ss:$0 sm:$0xff] }
 0x985   : > { %v3055_v63 = vpop.xlane.xlu1 %3054 }
 0x986   : > { %v3065_v6 = vmul.f32 0.0078125, %v3055_v63  ;;  %v3080_v18 = vmul.f32 %v6868_v15, %v6868_v15  ;;  %v3100_v63 = vmul.f32 0.0078125, %v3085_v3  ;;  %v3165_v3 = vld [vmem:[%s6435_s23 + $0x48] sm:$0xff] }
 0x988   : > { %v6877_v14 = vsub.f32 %v6829_v21, %v3065_v6  ;;  %3092 = vadd.xlane.f32.xlu0 %v3080_v18  ;;  %v3186_v18 = vld [vmem:[%s6435_s23 + $0xf0] sm:$0xff]  ;;  %v3108_v23 = vadd.f32 1e-05, %v3100_v63 }
 0x989   : > { %v3057_v25 = vpop.xlane.xlu1 %3056 }
 0x98a   : > { %v3066_v27 = vmul.f32 0.0078125, %v3057_v25  ;;  %v3081_v22 = vmul.f32 %v6877_v14, %v6877_v14  ;;  %v3183_v25 = vld [vmem:[%s6435_s23 + $0xd8] sm:$0xff] }
 0x98c   : > { %v6886_v62 = vsub.f32 %v6832_v52, %v3066_v27  ;;  %3094 = vadd.xlane.f32.xlu1 %v3081_v22  ;;  %v3182_v27 = vld [vmem:[%s6435_s23 + $0xd0] sm:$0xff] }
 0x98d   : > { %v3059_v35 = vpop.xlane.xlu1 %3058 }
 0x98e   : > { %v3067_v24 = vmul.f32 0.0078125, %v3059_v35  ;;  %v3082_v36 = vmul.f32 %v6886_v62, %v6886_v62 }
 0x990   : > { %v6895_v5 = vsub.f32 %v6835_v40, %v3067_v24  ;;  %3096 = vadd.xlane.f32.xlu0 %v3082_v36  ;;  %v3178_v24 = vld [vmem:[%s6435_s23 + $0xb0] sm:$0xff] }
 0x992   : > { %v3083_v42 = vmul.f32 %v6895_v5, %v6895_v5 }
 0x994   : > { %3098 = vadd.xlane.f32.xlu1 %v3083_v42 }
 0xa01   : > { %v2783_v59 = vpop.xlane.xlu1 %2782 }
 0xa02   : > { %v2784_v41 = vmul.f32 0.0078125, %v2783_v59 }
 0xa04   : > { %v2785_v60 = vadd.f32 1e-05, %v2784_v41 }
 0xa05   : > { %v3087_v19 = vpop.xlane.xlu1 %3086 }
 0xa06   : > { %5169 = vrsqrt.f32 %v2785_v60 }
 0xa07   : > { %5171 = vrsqrt.f32 %v3108_v23  ;;  %v3161_v23 = vld [vmem:[%s6435_s23 + $0x28] sm:$0xff] }
 0xa09   : > { %v3089_v22 = vpop.xlane.xlu0 %3088 }
 0xa0a   : > { %v3102_v35 = vmul.f32 0.0078125, %v3089_v22 }
 0xa0c   : > { %v3110_v30 = vadd.f32 1e-05, %v3102_v35  ;;  %v3157_v35 = vld [vmem:[%s6435_s23 + $0x8] sm:$0xff] }
 0xa0d   : > { %v3091_v36 = vpop.xlane.xlu1 %3090 }
 0xa0e   : > { %v3103_v42 = vmul.f32 0.0078125, %v3091_v36 }
 0xa10   : > { %v3111_v49 = vadd.f32 1e-05, %v3103_v42 }
 0xa11   : > { %v3093_v44 = vpop.xlane.xlu0 %3092 }
 0xa12   : > { %v3104_v51 = vmul.f32 0.0078125, %v3093_v44 }
 0xa13   : > { %v5170_v1 = vpop.eup %5169 }
 0xa14   : > { %v2787_v7 = vmul.f32 %v5170_v1, %v6848_v54  ;;  %v3101_v54 = vmul.f32 0.0078125, %v3087_v19  ;;  %v5172_v59 = vpop.eup %5171  ;;  %v3112_v41 = vadd.f32 1e-05, %v3104_v51  ;;  %v3166_v1 = vld [vmem:[%s6435_s23 + $0x50] sm:$0xff] }
 0xa15   : > { %v3095_v53 = vpop.xlane.xlu1 %3094  ;;  %v6942_v19 = vld [vmem:[%s6420_s12 + $0x2] ss:$0 sm:$0xff] }
 0xa16   : > { %v2792_v12 = vmul.f32 %v4394_v2, %v2787_v7  ;;  %v3109_v11 = vadd.f32 1e-05, %v3101_v54  ;;  %v3105_v60 = vmul.f32 0.0078125, %v3095_v53  ;;  %v3164_v7 = vld [vmem:[%s6435_s23 + $0x40] sm:$0xff]  ;;  %v3159_v54 = vld [vmem:[%s6435_s23 + $0x18] sm:$0xff] }
 0xa18   : > { %v2797_v6 = vadd.f32 %v4395_v8, %v2792_v12  ;;  %5173 = vrsqrt.f32 %v3109_v11  ;;  %v3163_v8 = vld [vmem:[%s6435_s23 + $0x38] sm:$0xff]  ;;  %v3124_v12 = vmul.f32 %v5172_v59, %v6801_v16  ;;  %v3113_v63 = vadd.f32 1e-05, %v3105_v60 }
 0xa19   : > { %5175 = vrsqrt.f32 %v3110_v30  ;;  %v3097_v2 = vpop.xlane.xlu0 %3096 }
 0xa1a   : > { %2907 = vmatmul.mubr.f32.vlgmr.msra.gmra.mxu1 %v2797_v6  ;;  %5177 = vrsqrt.f32 %v3111_v49  ;;  %v3106_v6 = vmul.f32 0.0078125, %v3097_v2  ;;  %v3136_v16 = vmul.f32 %v6942_v19, %v3124_v12  ;;  %v2961_v2 = vld [vmem:[%s6432_s26 + $0xf0] sm:$0xff]  ;;  %v2943_v12 = vld [vmem:[%s6432_s26 + $0x60] sm:$0xff] }
 0xa1b   : > { %3201 = vmatpush1.msra.mxu1 %v3186_v18  ;;  %3264 = vmatprep.mubr.f32.mxu1 %v5865_v47  ;;  %5179 = vrsqrt.f32 %v3112_v41  ;;  %v3162_v18 = vld [vmem:[%s6435_s23 + $0x30] sm:$0xff] }
 0xa1c   : > { %3202 = vmatprep.subr.mxu1 %v3185_v20  ;;  %5181 = vrsqrt.f32 %v3113_v63  ;;  %v2958_v63 = vld [vmem:[%s6432_s26 + $0xd8] sm:$0xff] }
 0xa1d   : > { %3203 = vmatpush1.msra.mxu1 %v3184_v13  ;;  %v3099_v13 = vpop.xlane.xlu1 %3098 }
 0xa1e   : > { %3204 = vmatprep.subr.mxu1 %v3183_v25  ;;  %v3160_v25 = vld [vmem:[%s6435_s23 + $0x20] sm:$0xff]  ;;  %v3107_v22 = vmul.f32 0.0078125, %v3099_v13 }
 0xa1f   : > { %3205 = vmatpush1.msra.mxu1 %v3182_v27  ;;  %v3114_v27 = vadd.f32 1e-05, %v3106_v6  ;;  %v2942_v6 = vld [vmem:[%s6432_s26 + $0x58] sm:$0xff]  ;;  %v2940_v13 = vld [vmem:[%s6432_s26 + $0x48] sm:$0xff] }
 0xa20   : > { %3206 = vmatprep.subr.mxu1 %v3181_v28  ;;  %v3158_v28 = vld [vmem:[%s6435_s23 + $0x10] sm:$0xff] }
 0xa21   : > { %3207 = vmatpush1.msra.mxu1 %v3180_v32  ;;  %v4398_v32 = vld [vmem:[%s6420_s12 + $0x3] ss:$0 sm:$0xff]  ;;  %5183 = vrsqrt.f32 %v3114_v27  ;;  %s7733_s12 = sld [smem:[#allocation39_spill]] }
 0xa22   : > { %3208 = vmatprep.subr.mxu1 %v3179_v10  ;;  %v3148_v36 = vadd.f32 %v4398_v32, %v3136_v16  ;;  %v2938_v16 = vld [vmem:[%s6432_s26 + $0x38] sm:$0xff]  ;;  %v2953_v27 = vld [vmem:[%s6432_s26 + $0xb0] sm:$0xff] }
 0xa23   : > { %3209 = vmatpush1.msra.mxu1 %v3178_v24  ;;  %v3156_v24 = vld [vmem:[%s6435_s23] sm:$0xff] }
 0xa24   : > { %3210 = vmatprep.subr.mxu1 %v3177_v37  ;;  %v3115_v37 = vadd.f32 1e-05, %v3107_v22  ;;  %v2937_v22 = vld [vmem:[%s6432_s26 + $0x30] sm:$0xff] }
 0xa25   : > { %3211 = vmatpush1.msra.mxu1 %v3176_v38  ;;  %v5174_v20 = vpop.eup %5173 }
 0xa26   : > { %3212 = vmatprep.subr.mxu1 %v3175_v39  ;;  %v3125_v10 = vmul.f32 %v5174_v20, %v6853_v58  ;;  %v5176_v11 = vpop.eup %5175  ;;  %5185 = vrsqrt.f32 %v3115_v37  ;;  %v2956_v20 = vld [vmem:[%s6432_s26 + $0xc8] sm:$0xff]  ;;  %v2933_v37 = vld [vmem:[%s6432_s26 + $0x10] sm:$0xff] }
 0xa27   : > { %3213 = vmatpush1.msra.mxu1 %v3174_v43  ;;  %v3126_v39 = vmul.f32 %v5176_v11, %v6858_v61  ;;  %v5178_v30 = vpop.eup %5177  ;;  %v2935_v11 = vld [vmem:[%s6432_s26 + $0x20] sm:$0xff]  ;;  %p4400_p4 = scmp.ne.s32.totalorder %s7733_s12, 1 }
 0xa28   : > { %3214 = vmatprep.subr.mxu1 %v3173_v45  ;;  %v3137_v38 = vmul.f32 %v6942_v19, %v3125_v10  ;;  %v3127_v43 = vmul.f32 %v5178_v30, %v6863_v4  ;;  %v5180_v44 = vpop.eup %5179  ;;  %v2951_v10 = vld [vmem:[%s6432_s26 + $0xa0] sm:$0xff]  ;;  %s7734_s15 = sld [smem:[#allocation72_spill]] (!%p4400_p4) }
 0xa29   : > { %3215 = vmatpush1.msra.mxu1 %v3172_v46  ;;  %v3138_v42 = vmul.f32 %v6942_v19, %v3126_v39  ;;  %v3128_v61 = vmul.f32 %v5180_v44, %v6868_v15  ;;  %v2932_v39 = vld [vmem:[%s6432_s26 + $0x8] sm:$0xff]  ;;  %v2947_v30 = vld [vmem:[%s6432_s26 + $0x80] sm:$0xff]  ;;  %v7010_v44 = vld [vmem:[%s6439_s10 + $0xf0] sm:$0xff]  ;;  %s7736_s2 = sld [smem:[#allocation73_spill]] (!%p4400_p4) }
 0xa2a   : > { %3216 = vmatprep.subr.mxu1 %v3171_v48  ;;  %v3149_v58 = vadd.f32 %v4398_v32, %v3137_v38  ;;  %v3139_v46 = vmul.f32 %v6942_v19, %v3127_v43  ;;  %v5182_v48 = vpop.eup %5181  ;;  %v2948_v38 = vld [vmem:[%s6432_s26 + $0x88] sm:$0xff]  ;;  %v7007_v43 = vld [vmem:[%s6439_s10 + $0x78] sm:$0xff]  ;;  %s7737_s22 = sld [smem:[#allocation71_spill]] (!%p4400_p4) }
 0xa2b   : > { %3217 = vmatpush1.msra.mxu1 %v3170_v50  ;;  %v3150_v45 = vadd.f32 %v4398_v32, %v3138_v42  ;;  %v3140_v51 = vmul.f32 %v6942_v19, %v3128_v61  ;;  %v3129_v50 = vmul.f32 %v5182_v48, %v6877_v14  ;;  %v3488_v42 = vld [vmem:[%s6439_s10 + $0xf8] sm:$0xff]  ;;  %v7022_v61 = vld [vmem:[%s6439_s10 + $0x68] sm:$0xff]  ;;  %v7026_v48 = vld [vmem:[%s6439_s10 + $0xe0] sm:$0xff] }
 0xa2c   : > { %3218 = vmatprep.subr.mxu1 %v3169_v55  ;;  %v3151_v49 = vadd.f32 %v4398_v32, %v3139_v46  ;;  %v7018_v46 = vld [vmem:[%s6439_s10 + $0xe8] sm:$0xff] }
 0xa2d   : > { %3219 = vmatpush1.msra.mxu1 %v3168_v56  ;;  %v3152_v4 = vadd.f32 %v4398_v32, %v3140_v51  ;;  %v3141_v55 = vmul.f32 %v6942_v19, %v3129_v50  ;;  %v7034_v51 = vld [vmem:[%s6439_s10 + $0xd8] sm:$0xff] }
 0xa2e   : > { %3220 = vmatprep.subr.mxu1 %v3167_v57  ;;  %v5184_v53 = vpop.eup %5183  ;;  %v7038_v50 = vld [vmem:[%s6439_s10 + $0x58] sm:$0xff] }
 0xa2f   : > { %3221 = vmatpush1.msra.mxu1 %v3166_v1  ;;  %v3130_v56 = vmul.f32 %v5184_v53, %v6886_v62  ;;  %v3153_v57 = vadd.f32 %v4398_v32, %v3141_v55  ;;  %v2962_v1 = vld [vmem:[%s6432_s26 + $0xf8] sm:$0xff]  ;;  %v7050_v55 = vld [vmem:[%s6439_s10 + $0xc8] sm:$0xff] }
 0xa30   : > { %3222 = vmatprep.subr.mxu1 %v3165_v3  ;;  %4518 = vmatprep.subr.mxu0 %v2962_v1  ;;  %v2945_v3 = vld [vmem:[%s6432_s26 + $0x70] sm:$0xff] }
 0xa31   : > { %3223 = vmatpush1.msra.mxu1 %v3164_v7  ;;  %v3142_v59 = vmul.f32 %v6942_v19, %v3130_v56  ;;  %v2960_v7 = vld [vmem:[%s6432_s26 + $0xe8] sm:$0xff]  ;;  %v7042_v53 = vld [vmem:[%s6439_s10 + $0xd0] sm:$0xff] }
 0xa32   : > { %3224 = vmatprep.subr.mxu1 %v3163_v8  ;;  %v2959_v8 = vld [vmem:[%s6432_s26 + $0xe0] sm:$0xff]  ;;  %v7054_v56 = vld [vmem:[%s6439_s10 + $0x48] sm:$0xff] }
 0xa33   : > { %3225 = vmatpush1.msra.mxu1 %v3162_v18  ;;  %v5186_v15 = vpop.eup %5185  ;;  %v3154_v41 = vadd.f32 %v4398_v32, %v3142_v59  ;;  %v2957_v18 = vld [vmem:[%s6432_s26 + $0xd0] sm:$0xff]  ;;  %v7066_v59 = vld [vmem:[%s6439_s10 + $0xb8] sm:$0xff] }
 0xa34   : > { %3226 = vmatprep.subr.mxu1 %v3161_v23  ;;  %v3131_v14 = vmul.f32 %v5186_v15, %v6895_v5  ;;  %v2946_v5 = vld [vmem:[%s6432_s26 + $0x78] sm:$0xff]  ;;  %v2955_v23 = vld [vmem:[%s6432_s26 + $0xc0] sm:$0xff]  ;;  %v7086_v1 = vld [vmem:[%s6439_s10 + $0x28] sm:$0xff] }
 0xa35   : > { %3227 = vmatpush1.msra.mxu1 %v3160_v25  ;;  %4519 = vmatpush3.msra.mxu0 %v2946_v5  ;;  %v2939_v25 = vld [vmem:[%s6432_s26 + $0x40] sm:$0xff] }
 0xa36   : > { %3228 = vmatprep.subr.mxu1 %v3159_v54  ;;  %v3143_v62 = vmul.f32 %v6942_v19, %v3131_v14  ;;  %4520 = vmatprep.subr.mxu0 %v2961_v2  ;;  %v2941_v19 = vld [vmem:[%s6432_s26 + $0x50] sm:$0xff]  ;;  %v2954_v54 = vld [vmem:[%s6432_s26 + $0xb8] sm:$0xff]  ;;  %v7058_v15 = vld [vmem:[%s6439_s10 + $0xc0] sm:$0xff] }
 0xa37   : > { %3229 = vmatpush1.msra.mxu1 %v3158_v28  ;;  %4521 = vmatpush3.msra.mxu0 %v2945_v3  ;;  %v2952_v28 = vld [vmem:[%s6432_s26 + $0xa8] sm:$0xff]  ;;  %v7070_v14 = vld [vmem:[%s6439_s10 + $0x38] sm:$0xff] }
 0xa38   : > { %3230 = vmatprep.subr.mxu1 %v3157_v35  ;;  %v3155_v60 = vadd.f32 %v4398_v32, %v3143_v62  ;;  %4522 = vmatprep.subr.mxu0 %v2960_v7  ;;  %v2936_v32 = vld [vmem:[%s6432_s26 + $0x28] sm:$0xff]  ;;  %v2950_v35 = vld [vmem:[%s6432_s26 + $0x98] sm:$0xff] }
 0xa39   : > { %3231 = vmatpush1.msra.mxu1 %v3156_v24  ;;  %v2934_v24 = vld [vmem:[%s6432_s26 + $0x18] sm:$0xff]  ;;  %v7090_v5 = vld [vmem:[%s6439_s10 + $0xa0] sm:$0xff] }
 0xa3a   : > { %3265 = vmatmul.mubr.f32.vlgmr.msra.gmra.mxu1 %v3148_v36  ;;  %v2949_v36 = vld [vmem:[%s6432_s26 + $0x90] sm:$0xff]  ;;  %4919 = vmatprep.subr.mxu1 %v3488_v42  ;;  %v7094_v2 = vld [vmem:[%s6439_s10 + $0x20] sm:$0xff]  ;;  %v7098_v3 = vld [vmem:[%s6439_s10 + $0x98] sm:$0xff] }
 0xa3b   : > { %3270 = vmatprep.mubr.f32.mxu1 %v5865_v47  ;;  %4935 = vmatpush3.msra.mxu1 %v7007_v43  ;;  %v7078_v62 = vld [vmem:[%s6439_s10 + $0x30] sm:$0xff]  ;;  %v7102_v7 = vld [vmem:[%s6439_s10 + $0x18] sm:$0xff] }
 0xa3c   : > { %4920 = vmatprep.subr.mxu1 %v7010_v44 }
 0xa3e   : > { %3271 = vmatmul.mubr.f32.gmra.mxu1 %v3149_v58  ;;  %v2931_v58 = vld [vmem:[%s6432_s26] sm:$0xff] }
 0xa3f   : > { %3276 = vmatprep.mubr.f32.mxu1 %v5865_v47 }
 0xa42   : > { %3277 = vmatmul.mubr.f32.gmra.mxu1 %v3150_v45  ;;  %v7014_v45 = vld [vmem:[%s6439_s10 + $0x70] sm:$0xff] }
 0xa43   : > { %3282 = vmatprep.mubr.f32.mxu1 %v5865_v47  ;;  %4936 = vmatpush3.msra.mxu1 %v7014_v45 }
 0xa44   : > { %4921 = vmatprep.subr.mxu1 %v7018_v46 }
 0xa45   : > { %4937 = vmatpush3.msra.mxu1 %v7022_v61 }
 0xa46   : > { %3283 = vmatmul.mubr.f32.gmra.mxu1 %v3151_v49  ;;  %v7030_v49 = vld [vmem:[%s6439_s10 + $0x60] sm:$0xff]  ;;  %4922 = vmatprep.subr.mxu1 %v7026_v48 }
 0xa47   : > { %3288 = vmatprep.mubr.f32.mxu1 %v5865_v47  ;;  %4938 = vmatpush3.msra.mxu1 %v7030_v49 }
 0xa48   : > { %4923 = vmatprep.subr.mxu1 %v7034_v51 }
 0xa49   : > { %4939 = vmatpush3.msra.mxu1 %v7038_v50 }
 0xa4a   : > { %3289 = vmatmul.mubr.f32.gmra.mxu1 %v3152_v4  ;;  %v7046_v4 = vld [vmem:[%s6439_s10 + $0x50] sm:$0xff]  ;;  %4924 = vmatprep.subr.mxu1 %v7042_v53 }
 0xa4b   : > { %3294 = vmatprep.mubr.f32.mxu1 %v5865_v47  ;;  %4940 = vmatpush3.msra.mxu1 %v7046_v4 }
 0xa4c   : > { %4925 = vmatprep.subr.mxu1 %v7050_v55 }
 0xa4d   : > { %4941 = vmatpush3.msra.mxu1 %v7054_v56 }
 0xa4e   : > { %3295 = vmatmul.mubr.f32.gmra.mxu1 %v3153_v57  ;;  %v7062_v57 = vld [vmem:[%s6439_s10 + $0x40] sm:$0xff]  ;;  %4926 = vmatprep.subr.mxu1 %v7058_v15 }
 0xa4f   : > { %3300 = vmatprep.mubr.f32.mxu1 %v5865_v47  ;;  %4942 = vmatpush3.msra.mxu1 %v7062_v57 }
 0xa50   : > { %4927 = vmatprep.subr.mxu1 %v7066_v59 }
 0xa51   : > { %4943 = vmatpush3.msra.mxu1 %v7070_v14 }
 0xa52   : > { %3301 = vmatmul.mubr.f32.gmra.mxu1 %v3154_v41  ;;  %v7074_v41 = vld [vmem:[%s6439_s10 + $0xb0] sm:$0xff] }
 0xa53   : > { %3306 = vmatprep.mubr.f32.mxu1 %v5865_v47  ;;  %v2944_v47 = vld [vmem:[%s6432_s26 + $0x68] sm:$0xff]  ;;  %4928 = vmatprep.subr.mxu1 %v7074_v41 }
 0xa54   : > { %4523 = vmatpush3.msra.mxu0 %v2944_v47  ;;  %4944 = vmatpush3.msra.mxu1 %v7078_v62  ;;  %v7106_v47 = vld [vmem:[%s6439_s10 + $0x90] sm:$0xff] }
 0xa55   : > { %4524 = vmatprep.subr.mxu0 %v2959_v8  ;;  %v7110_v8 = vld [vmem:[%s6439_s10 + $0x10] sm:$0xff] }
 0xa56   : > { %3307 = vmatmul.mubr.f32.gmra.mxu1 %v3155_v60  ;;  %4525 = vmatpush3.msra.mxu0 %v2943_v12  ;;  %v7082_v60 = vld [vmem:[%s6439_s10 + $0xa8] sm:$0xff] }
 0xa57   : > { %4526 = vmatprep.subr.mxu0 %v2958_v63  ;;  %4929 = vmatprep.subr.mxu1 %v7082_v60  ;;  %v7114_v12 = vld [vmem:[%s6439_s10 + $0x88] sm:$0xff] }
 0xa58   : > { %4527 = vmatpush3.msra.mxu0 %v2942_v6  ;;  %4945 = vmatpush3.msra.mxu1 %v7086_v1  ;;  %v7118_v63 = vld [vmem:[%s6439_s10 + $0x8] sm:$0xff]  ;;  %v7122_v6 = vld [vmem:[%s6439_s10 + $0x80] sm:$0xff] }
 0xa59   : > { %4528 = vmatprep.subr.mxu0 %v2957_v18  ;;  %4930 = vmatprep.subr.mxu1 %v7090_v5  ;;  %v7126_v18 = vld [vmem:[%s6439_s10] sm:$0xff] }
 0xa5a   : > { %4529 = vmatpush3.msra.mxu0 %v2941_v19  ;;  %4946 = vmatpush3.msra.mxu1 %v7094_v2  ;;  %v2830_v19 = vld [vmem:[%s6430_s25] sm:$0x3]  ;;  %s7735_s25 = sld [smem:[#allocation70_spill]] (!%p4400_p4) }
 0xa5b   : > { %4530 = vmatprep.subr.mxu0 %v2956_v20  ;;  %4931 = vmatprep.subr.mxu1 %v7098_v3  ;;  %v2835_v20 = vrot.slane %v2830_v19, %v6670_v0 }
 0xa5c   : > { %4531 = vmatpush3.msra.mxu0 %v2940_v13  ;;  %4947 = vmatpush3.msra.mxu1 %v7102_v7  ;;  %v2839_v13 = vrot.slane %v2830_v19, %v6701_v9 }
 0xa5d   : > { %4532 = vmatprep.subr.mxu0 %v2955_v23  ;;  %4932 = vmatprep.subr.mxu1 %v7106_v47 }
 0xa5e   : > { %4533 = vmatpush3.msra.mxu0 %v2939_v25  ;;  %4948 = vmatpush3.msra.mxu1 %v7110_v8 }
 0xa5f   : > { %4534 = vmatprep.subr.mxu0 %v2954_v54  ;;  %4933 = vmatprep.subr.mxu1 %v7114_v12 }
 0xa60   : > { %4535 = vmatpush3.msra.mxu0 %v2938_v16  ;;  %4949 = vmatpush3.msra.mxu1 %v7118_v63 }
 0xa61   : > { %4536 = vmatprep.subr.mxu0 %v2953_v27  ;;  %4934 = vmatprep.subr.mxu1 %v7122_v6 }
 0xa62   : > { %4537 = vmatpush3.msra.mxu0 %v2937_v22  ;;  %4950 = vmatpush3.msra.mxu1 %v7126_v18 }
 0xa63   : > { %4538 = vmatprep.subr.mxu0 %v2952_v28 }
 0xa64   : > { %4539 = vmatpush3.msra.mxu0 %v2936_v32 }
 0xa65   : > { %4540 = vmatprep.subr.mxu0 %v2951_v10 }
 0xa66   : > { %4541 = vmatpush3.msra.mxu0 %v2935_v11 }
 0xa67   : > { %4542 = vmatprep.subr.mxu0 %v2950_v35 }
 0xa68   : > { %4543 = vmatpush3.msra.mxu0 %v2934_v24 }
 0xa69   : > { %4544 = vmatprep.subr.mxu0 %v2949_v36 }
 0xa6a   : > { %4545 = vmatpush3.msra.mxu0 %v2933_v37 }
 0xa6b   : > { %4546 = vmatprep.subr.mxu0 %v2948_v38 }
 0xa6c   : > { %4547 = vmatpush3.msra.mxu0 %v2932_v39  ;;  %v3188_v39 = vld [vmem:[%s6437_s30] sm:$0x3] }
 0xa6d   : > { %4548 = vmatprep.subr.mxu0 %v2947_v30 }
 0xa6e   : > { %4549 = vmatpush3.msra.mxu0 %v2931_v58 }
 0xa6f   : > { %4553 = vmatprep.subr.mxu0 %v3488_v42  ;;  %v7135_v42 = vrot.slane %v3188_v39, %v6670_v0 }
 0xada   : > { %v2908_v23 = vpop.f32.mrf.mxu1 }
 0xadb   : > { %v2909_v25 = vadd.f32 %v2908_v23, %v2835_v20 }
 0xadc   : > { %v2910_v54 = vpop.f32.mrf.mxu1 }
 0xadd   : > { %v2915_v16 = vmul.f32 0.044715, %v2909_v25  ;;  %v2911_v27 = vadd.f32 %v2910_v54, %v2839_v13  ;;  %v2913_v13 = vmul.f32 0.5, %v2909_v25  ;;  %v7138_v54 = vrot.slane %v3188_v39, %v6701_v9 }
 0xadf   : > { %v2917_v22 = vmul.f32 %v2915_v16, %v2909_v25  ;;  %v2916_v28 = vmul.f32 0.044715, %v2911_v27  ;;  %v2914_v19 = vmul.f32 0.5, %v2911_v27 }
 0xae1   : > { %v2919_v32 = vmul.f32 %v2917_v22, %v2909_v25  ;;  %v2918_v10 = vmul.f32 %v2916_v28, %v2911_v27 }
 0xae3   : > { %v2921_v11 = vadd.f32 %v2919_v32, %v2909_v25  ;;  %v2920_v35 = vmul.f32 %v2918_v10, %v2911_v27 }
 0xae5   : > { %v2923_v24 = vmul.f32 0.7978846, %v2921_v11  ;;  %v2922_v36 = vadd.f32 %v2920_v35, %v2911_v27 }
 0xae7   : > { %5187 = vtanh.f32 %v2923_v24  ;;  %v2924_v37 = vmul.f32 0.7978846, %v2922_v36 }
 0xae9   : > { %5189 = vtanh.f32 %v2924_v37 }
 0xaf4   : > { %v5188_v38 = vpop.eup %5187 }
 0xaf5   : > { %v2927_v58 = vadd.f32 1.0, %v5188_v38 }
 0xaf6   : > { %v5190_v30 = vpop.eup %5189 }
 0xaf7   : > { %v2928_v20 = vadd.f32 1.0, %v5190_v30  ;;  %v2929_v22 = vmul.f32 %v2927_v58, %v2913_v13 }
 0xaf9   : > { %v2930_v23 = vmul.f32 %v2928_v20, %v2914_v19 }
 0xafa   : > { %v3266_v16 = vpop.f32.mrf.mxu1 }
 0xafb   : > { %v7141_v28 = vadd.f32 %v3266_v16, %v7135_v42  ;;  %3027 = vmatprep.mubr.f32.mxu0 %v2930_v23 }
 0xafc   : > { %v3268_v32 = vpop.f32.mrf.mxu1  ;;  %3028 = vmatmul.mubr.f32.vlgmr.msra.gmra.mxu0 %v2929_v22 }
 0xafd   : > { %v3329_v10 = vmul.f32 0.044715, %v7141_v28  ;;  %v7145_v0 = vadd.f32 %v3268_v32, %v7138_v54  ;;  %4554 = vmatpush3.msra.mxu0 %v7007_v43 }
 0xafe   : > { %v3272_v25 = vpop.f32.mrf.mxu1  ;;  %4555 = vmatprep.subr.mxu0 %v7010_v44 }
 0xaff   : > { %v3345_v9 = vmul.f32 %v3329_v10, %v7141_v28  ;;  %v3330_v27 = vmul.f32 0.044715, %v7145_v0  ;;  %v7152_v11 = vadd.f32 %v3272_v25, %v7135_v42  ;;  %4556 = vmatpush3.msra.mxu0 %v7014_v45 }
 0xb00   : > { %v3274_v35 = vpop.f32.mrf.mxu1  ;;  %4557 = vmatprep.subr.mxu0 %v7018_v46 }
 0xb01   : > { %v3361_v24 = vmul.f32 %v3345_v9, %v7141_v28  ;;  %v3346_v36 = vmul.f32 %v3330_v27, %v7145_v0  ;;  %v3331_v43 = vmul.f32 0.044715, %v7152_v11  ;;  %v7160_v44 = vadd.f32 %v3274_v35, %v7138_v54  ;;  %4558 = vmatpush3.msra.mxu0 %v7022_v61 }
 0xb02   : > { %v3278_v37 = vpop.f32.mrf.mxu1  ;;  %4559 = vmatprep.subr.mxu0 %v7026_v48 }
 0xb03   : > { %v3377_v38 = vadd.f32 %v3361_v24, %v7141_v28  ;;  %v3347_v45 = vmul.f32 %v3331_v43, %v7152_v11  ;;  %v3332_v46 = vmul.f32 0.044715, %v7160_v44  ;;  %v7168_v39 = vadd.f32 %v3278_v37, %v7135_v42  ;;  %4560 = vmatpush3.msra.mxu0 %v7030_v49 }
 0xb04   : > { %v3280_v30 = vpop.f32.mrf.mxu1  ;;  %4561 = vmatprep.subr.mxu0 %v7034_v51  ;;  %v3362_v58 = vmul.f32 %v3346_v36, %v7145_v0 }
 0xb05   : > { %v3348_v61 = vmul.f32 %v3332_v46, %v7160_v44  ;;  %v3333_v48 = vmul.f32 0.044715, %v7168_v39  ;;  %v7176_v19 = vadd.f32 %v3280_v30, %v7138_v54  ;;  %4562 = vmatpush3.msra.mxu0 %v7038_v50  ;;  %v3393_v20 = vmul.f32 0.7978846, %v3377_v38 }
 0xb06   : > { %v3284_v13 = vpop.f32.mrf.mxu1  ;;  %4563 = vmatprep.subr.mxu0 %v7042_v53  ;;  %v3378_v49 = vadd.f32 %v3362_v58, %v7145_v0  ;;  %v3363_v23 = vmul.f32 %v3347_v45, %v7152_v11 }
 0xb07   : > { %v3349_v51 = vmul.f32 %v3333_v48, %v7168_v39  ;;  %v3334_v16 = vmul.f32 0.044715, %v7176_v19  ;;  %v7185_v22 = vadd.f32 %v3284_v13, %v7135_v42  ;;  %4564 = vmatpush3.msra.mxu0 %v7046_v4  ;;  %5191 = vtanh.f32 %v3393_v20 }
 0xb08   : > { %v3286_v32 = vpop.f32.mrf.mxu1  ;;  %4565 = vmatprep.subr.mxu0 %v7050_v55  ;;  %v3394_v50 = vmul.f32 0.7978846, %v3378_v49  ;;  %v3364_v53 = vmul.f32 %v3348_v61, %v7160_v44  ;;  %v3379_v10 = vadd.f32 %v3363_v23, %v7152_v11 }
 0xb09   : > { %v3350_v25 = vmul.f32 %v3334_v16, %v7176_v19  ;;  %v3335_v9 = vmul.f32 0.044715, %v7185_v22  ;;  %v7194_v27 = vadd.f32 %v3286_v32, %v7138_v54  ;;  %4566 = vmatpush3.msra.mxu0 %v7054_v56  ;;  %v3365_v4 = vmul.f32 %v3349_v51, %v7168_v39 }
 0xb0a   : > { %v3290_v35 = vpop.f32.mrf.mxu1  ;;  %4567 = vmatprep.subr.mxu0 %v7058_v15  ;;  %5193 = vtanh.f32 %v3394_v50  ;;  %v3380_v55 = vadd.f32 %v3364_v53, %v7160_v44  ;;  %v3395_v24 = vmul.f32 0.7978846, %v3379_v10 }
 0xb0b   : > { %v3351_v36 = vmul.f32 %v3335_v9, %v7185_v22  ;;  %v3336_v43 = vmul.f32 0.044715, %v7194_v27  ;;  %v7203_v37 = vadd.f32 %v3290_v35, %v7135_v42  ;;  %4568 = vmatpush3.msra.mxu0 %v7062_v57  ;;  %v3366_v56 = vmul.f32 %v3350_v25, %v7176_v19 }
 0xb0c   : > { %v3292_v38 = vpop.f32.mrf.mxu1  ;;  %4569 = vmatprep.subr.mxu0 %v7066_v59  ;;  %v3396_v45 = vmul.f32 0.7978846, %v3380_v55  ;;  %5195 = vtanh.f32 %v3395_v24  ;;  %v3381_v15 = vadd.f32 %v3365_v4, %v7168_v39 }
 0xb0d   : > { %v3352_v46 = vmul.f32 %v3336_v43, %v7194_v27  ;;  %v3337_v30 = vmul.f32 0.044715, %v7203_v37  ;;  %v7212_v58 = vadd.f32 %v3292_v38, %v7138_v54  ;;  %4570 = vmatpush3.msra.mxu0 %v7070_v14  ;;  %v3382_v57 = vadd.f32 %v3366_v56, %v7176_v19 }
 0xb0e   : > { %v3296_v61 = vpop.f32.mrf.mxu1  ;;  %4571 = vmatprep.subr.mxu0 %v7074_v41  ;;  %5197 = vtanh.f32 %v3396_v45  ;;  %v3397_v59 = vmul.f32 0.7978846, %v3381_v15  ;;  %v3367_v48 = vmul.f32 %v3351_v36, %v7185_v22 }
 0xb0f   : > { %v3353_v20 = vmul.f32 %v3337_v30, %v7203_v37  ;;  %v3338_v13 = vmul.f32 0.044715, %v7212_v58  ;;  %v7221_v49 = vadd.f32 %v3296_v61, %v7135_v42  ;;  %4572 = vmatpush3.msra.mxu0 %v7078_v62  ;;  %v3398_v23 = vmul.f32 0.7978846, %v3382_v57 }
 0xb10   : > { %v3298_v14 = vpop.f32.mrf.mxu1  ;;  %4573 = vmatprep.subr.mxu0 %v7082_v60  ;;  %5199 = vtanh.f32 %v3397_v59  ;;  %v3368_v41 = vmul.f32 %v3352_v46, %v7194_v27  ;;  %v3383_v51 = vadd.f32 %v3367_v48, %v7185_v22 }
 0xb11   : > { %v3354_v16 = vmul.f32 %v3338_v13, %v7212_v58  ;;  %v3339_v32 = vmul.f32 0.044715, %v7221_v49  ;;  %v7230_v50 = vadd.f32 %v3298_v14, %v7138_v54  ;;  %4574 = vmatpush3.msra.mxu0 %v7086_v1  ;;  %5201 = vtanh.f32 %v3398_v23 }
 0xb12   : > { %v3302_v53 = vpop.f32.mrf.mxu1  ;;  %4575 = vmatprep.subr.mxu0 %v7090_v5  ;;  %v3384_v62 = vadd.f32 %v3368_v41, %v7194_v27  ;;  %v3399_v60 = vmul.f32 0.7978846, %v3383_v51  ;;  %v3369_v10 = vmul.f32 %v3353_v20, %v7203_v37  ;;  %v3313_v5 = vmul.f32 0.5, %v7141_v28 }
 0xb13   : > { %v3355_v25 = vmul.f32 %v3339_v32, %v7221_v49  ;;  %v3340_v9 = vmul.f32 0.044715, %v7230_v50  ;;  %v7239_v4 = vadd.f32 %v3302_v53, %v7135_v42  ;;  %4576 = vmatpush3.msra.mxu0 %v7094_v2  ;;  %v3370_v1 = vmul.f32 %v3354_v16, %v7212_v58 }
 0xb14   : > { %v5192_v35 = vpop.eup %5191  ;;  %v3304_v55 = vpop.f32.mrf.mxu1  ;;  %4577 = vmatprep.subr.mxu0 %v7098_v3  ;;  %v3400_v24 = vmul.f32 0.7978846, %v3384_v62  ;;  %5203 = vtanh.f32 %v3399_v60  ;;  %v3385_v36 = vadd.f32 %v3369_v10, %v7203_v37  ;;  %v3314_v2 = vmul.f32 0.5, %v7145_v0 }
 0xb15   : > { %v3371_v43 = vmul.f32 %v3355_v25, %v7221_v49  ;;  %v3341_v56 = vmul.f32 0.044715, %v7239_v4  ;;  %v7249_v38 = vadd.f32 %v3304_v55, %v7138_v54  ;;  %4578 = vmatpush3.msra.mxu0 %v7102_v7  ;;  %v3356_v45 = vmul.f32 %v3340_v9, %v7230_v50 }
 0xb16   : > { %v3308_v3 = vpop.f32.mrf.mxu1  ;;  %4579 = vmatprep.subr.mxu0 %v7106_v47  ;;  %5205 = vtanh.f32 %v3400_v24  ;;  %v3386_v28 = vadd.f32 %v3370_v1, %v7212_v58  ;;  %v3401_v15 = vmul.f32 0.7978846, %v3385_v36  ;;  %v3425_v7 = vadd.f32 1.0, %v5192_v35 }
 0xb17   : > { %v5194_v46 = vpop.eup %5193  ;;  %v3387_v30 = vadd.f32 %v3371_v43, %v7221_v49  ;;  %v3342_v57 = vmul.f32 0.044715, %v7249_v38  ;;  %v7259_v61 = vadd.f32 %v3308_v3, %v7135_v42  ;;  %4580 = vmatpush3.msra.mxu0 %v7110_v8  ;;  %v3357_v0 = vmul.f32 %v3341_v56, %v7239_v4 }
 0xb18   : > { %v3310_v59 = vpop.f32.mrf.mxu1  ;;  %4581 = vmatprep.subr.mxu0 %v7114_v12  ;;  %v3426_v47 = vadd.f32 1.0, %v5194_v46  ;;  %v3402_v48 = vmul.f32 0.7978846, %v3386_v28  ;;  %5207 = vtanh.f32 %v3401_v15  ;;  %v3315_v41 = vmul.f32 0.5, %v7152_v11 }
 0xb19   : > { %v5196_v20 = vpop.eup %5195  ;;  %v3403_v13 = vmul.f32 0.7978846, %v3387_v30  ;;  %v3358_v23 = vmul.f32 %v3342_v57, %v7249_v38  ;;  %v3343_v14 = vmul.f32 0.044715, %v7259_v61  ;;  %v7267_v42 = vadd.f32 %v3310_v59, %v7138_v54  ;;  %4582 = vmatpush3.msra.mxu0 %v7118_v63 }
 0xb1a   : > { %4583 = vmatprep.subr.mxu0 %v7122_v6  ;;  %v3442_v8 = vmul.f32 %v3426_v47, %v3314_v2  ;;  %5209 = vtanh.f32 %v3402_v48  ;;  %v3372_v12 = vmul.f32 %v3356_v45, %v7230_v50  ;;  %v3441_v53 = vmul.f32 %v3425_v7, %v3313_v5 }
 0xb1b   : > { %v5198_v51 = vpop.eup %5197  ;;  %v3359_v16 = vmul.f32 %v3343_v14, %v7259_v61  ;;  %v3344_v32 = vmul.f32 0.044715, %v7267_v42  ;;  %4584 = vmatpush3.msra.mxu0 %v7126_v18  ;;  %v3427_v54 = vadd.f32 1.0, %v5196_v20  ;;  %v3316_v63 = vmul.f32 0.5, %v7160_v44 }
 0xb1c   : > { %3553 = vmatprep.mubr.f32.mxu0 %v3442_v8  ;;  %v3428_v62 = vadd.f32 1.0, %v5198_v51  ;;  %v3388_v6 = vadd.f32 %v3372_v12, %v7230_v50  ;;  %v3374_v11 = vmul.f32 %v3358_v23, %v7249_v38  ;;  %5211 = vtanh.f32 %v3403_v13 }
 0xb1d   : > { %v5200_v60 = vpop.eup %5199  ;;  %v3360_v10 = vmul.f32 %v3344_v32, %v7267_v42  ;;  %3554 = vmatmul.mubr.f32.vlgmr.msra.gmra.mxu0 %v3441_v53  ;;  %v3317_v25 = vmul.f32 0.5, %v7168_v39  ;;  %v3373_v9 = vmul.f32 %v3357_v0, %v7239_v4  ;;  %v3443_v5 = vmul.f32 %v3427_v54, %v3315_v41 }
 0xb1e   : > { %v3444_v18 = vmul.f32 %v3428_v62, %v3316_v63  ;;  %v3429_v1 = vadd.f32 1.0, %v5200_v60  ;;  %v3404_v35 = vmul.f32 0.7978846, %v3388_v6  ;;  %v3390_v55 = vadd.f32 %v3374_v11, %v7249_v38  ;;  %v5202_v44 = vpop.eup %5201 }
 0xb1f   : > { %v3389_v24 = vadd.f32 %v3373_v9, %v7239_v4  ;;  %v3376_v36 = vmul.f32 %v3360_v10, %v7267_v42  ;;  %v3375_v43 = vmul.f32 %v3359_v16, %v7259_v61  ;;  %v3318_v56 = vmul.f32 0.5, %v7176_v19 }
 0xb20   : > { %3558 = vmatprep.mubr.f32.mxu0 %v3444_v18  ;;  %v3430_v2 = vadd.f32 1.0, %v5202_v44  ;;  %5213 = vtanh.f32 %v3404_v35  ;;  %v3406_v39 = vmul.f32 0.7978846, %v3390_v55  ;;  %v3445_v30 = vmul.f32 %v3429_v1, %v3317_v25 }
 0xb21   : > { %v5204_v45 = vpop.eup %5203  ;;  %3559 = vmatmul.mubr.f32.gmra.mxu0 %v3443_v5  ;;  %v3405_v3 = vmul.f32 0.7978846, %v3389_v24  ;;  %v3392_v28 = vadd.f32 %v3376_v36, %v7267_v42  ;;  %v3391_v15 = vadd.f32 %v3375_v43, %v7259_v61  ;;  %v3320_v19 = vmul.f32 0.5, %v7194_v27 }
 0xb22   : > { %v3446_v46 = vmul.f32 %v3430_v2, %v3318_v56  ;;  %5215 = vtanh.f32 %v3406_v39  ;;  %v3431_v7 = vadd.f32 1.0, %v5204_v45  ;;  %v3319_v20 = vmul.f32 0.5, %v7185_v22  ;;  %v4396_v2 = vld [vmem:[%s7732_s11] ss:$0 sm:$0xff] }
 0xb23   : > { %v5206_v57 = vpop.eup %5205  ;;  %5217 = vtanh.f32 %v3405_v3  ;;  %v3408_v0 = vmul.f32 0.7978846, %v3392_v28  ;;  %v3407_v59 = vmul.f32 0.7978846, %v3391_v15  ;;  %v3322_v41 = vmul.f32 0.5, %v7212_v58 }
 0xb24   : > { %3563 = vmatprep.mubr.f32.mxu0 %v3446_v46  ;;  %v3432_v47 = vadd.f32 1.0, %v5206_v57  ;;  %v3447_v14 = vmul.f32 %v3431_v7, %v3319_v20  ;;  %v3321_v51 = vmul.f32 0.5, %v7203_v37  ;;  %v3324_v54 = vmul.f32 0.5, %v7230_v50  ;;  %v4399_v28 = vld [vmem:[%s1189_s24] ss:$0 sm:$0xff] }
 0xb25   : > { %v5208_v48 = vpop.eup %5207  ;;  %3564 = vmatmul.mubr.f32.gmra.mxu0 %v3445_v30  ;;  %5219 = vtanh.f32 %v3408_v0  ;;  %v3323_v6 = vmul.f32 0.5, %v7221_v49  ;;  %v3326_v58 = vmul.f32 0.5, %v7249_v38  ;;  %v3325_v35 = vmul.f32 0.5, %v7239_v4 }
 0xb26   : > { %v3448_v13 = vmul.f32 %v3432_v47, %v3320_v19  ;;  %5221 = vtanh.f32 %v3407_v59  ;;  %v3433_v8 = vadd.f32 1.0, %v5208_v48  ;;  %v3328_v50 = vmul.f32 0.5, %v7267_v42 }
 0xb27   : > { %v5210_v23 = vpop.eup %5209  ;;  %v3327_v38 = vmul.f32 0.5, %v7259_v61 }
 0xb28   : > { %3568 = vmatprep.mubr.f32.mxu0 %v3448_v13  ;;  %v3434_v12 = vadd.f32 1.0, %v5210_v23  ;;  %v3449_v32 = vmul.f32 %v3433_v8, %v3321_v51 }
 0xb29   : > { %3569 = vmatmul.mubr.f32.gmra.mxu0 %v3447_v14  ;;  %v5212_v16 = vpop.eup %5211 }
 0xb2a   : > { %v3450_v27 = vmul.f32 %v3434_v12, %v3322_v41  ;;  %v3435_v22 = vadd.f32 1.0, %v5212_v16 }
 0xb2c   : > { %3573 = vmatprep.mubr.f32.mxu0 %v3450_v27  ;;  %v3451_v25 = vmul.f32 %v3435_v22, %v3323_v6 }
 0xb2d   : > { %v5214_v53 = vpop.eup %5213  ;;  %3574 = vmatmul.mubr.f32.gmra.mxu0 %v3449_v32 }
 0xb2e   : > { %v3436_v63 = vadd.f32 1.0, %v5214_v53 }
 0xb2f   : > { %v5216_v62 = vpop.eup %5215 }
 0xb30   : > { %v5218_v11 = vpop.eup %5217  ;;  %v3452_v60 = vmul.f32 %v3436_v63, %v3324_v54  ;;  %v3438_v10 = vadd.f32 1.0, %v5216_v62 }
 0xb31   : > { %v3437_v37 = vadd.f32 1.0, %v5218_v11 }
 0xb32   : > { %v5220_v9 = vpop.eup %5219  ;;  %3578 = vmatprep.mubr.f32.mxu1 %v3452_v60  ;;  %v3454_v18 = vmul.f32 %v3438_v10, %v3326_v58 }
 0xb33   : > { %v5222_v1 = vpop.eup %5221  ;;  %3579 = vmatmul.mubr.f32.vlgmr.msra.gmra.mxu1 %v3451_v25  ;;  %v3440_v55 = vadd.f32 1.0, %v5220_v9  ;;  %v3453_v49 = vmul.f32 %v3437_v37, %v3325_v35 }
 0xb34   : > { %3583 = vmatprep.mubr.f32.mxu1 %v3454_v18  ;;  %v3439_v5 = vadd.f32 1.0, %v5222_v1 }
 0xb35   : > { %v3456_v44 = vmul.f32 %v3440_v55, %v3328_v50 }
 0xb36   : > { %v3455_v24 = vmul.f32 %v3439_v5, %v3327_v38 }
 0xb37   : > { %3584 = vmatmul.mubr.f32.gmra.mxu1 %v3453_v49 }
 0xb38   : > { %3588 = vmatprep.mubr.f32.mxu1 %v3456_v44 }
 0xb3b   : > { %3589 = vmatmul.mubr.f32.gmra.mxu1 %v3455_v24 }
 0xbbc   : > { %v4550_v36 = vpop.f32.mrf.mxu0 }
 0xbbe   : > { %v4551_v43 = vpop.f32.mrf.mxu0 }
 0xbbf   : > { %v4552_v56 = vadd.f32 %v4551_v43, %v4550_v36 }
 0xbc1   : > { %v3033_v4 = vadd.f32 %v4552_v56, %v6813_v26 }
 0xbc3   : > { %v7302_v42 = vadd.f32 %v4396_v2, %v3033_v4 }
 0xbc5   : > { %3617 = vst [vmem:[#allocation2] sm:$0xff] %v7302_v42 }
 0xbdd   : > { %v4585_v39 = vpop.f32.mrf.mxu0 }
 0xbdf   : > { %v4586_v45 = vpop.f32.mrf.mxu0 }
 0xbe0   : > { %v4587_v3 = vadd.f32 %v4586_v45, %v4585_v39 }
 0xbe1   : > { %v4588_v61 = vpop.f32.mrf.mxu0 }
 0xbe2   : > { %v3594_v15 = vadd.f32 %v4587_v3, %v6755_v34 }
 0xbe3   : > { %v4589_v46 = vpop.f32.mrf.mxu0 }
 0xbe4   : > { %v3609_v30 = vadd.f32 %v4399_v28, %v3594_v15  ;;  %v4590_v57 = vadd.f32 %v4589_v46, %v4588_v61 }
 0xbe5   : > { %v4591_v7 = vpop.f32.mrf.mxu0 }
 0xbe6   : > { %3618 = vst [vmem:[#allocation3 + $0x30] sm:$0xff] %v3609_v30  ;;  %v3595_v0 = vadd.f32 %v4590_v57, %v6817_v31 }
 0xbe7   : > { %v4592_v26 = vpop.f32.mrf.mxu0 }
 0xbe8   : > { %v7309_v59 = vadd.f32 %v4399_v28, %v3595_v0  ;;  %v4593_v19 = vadd.f32 %v4592_v26, %v4591_v7 }
 0xbe9   : > { %v4594_v47 = vpop.f32.mrf.mxu0 }
 0xbea   : > { %3619 = vst [vmem:[#allocation3] sm:$0xff] %v7309_v59  ;;  %v3596_v48 = vadd.f32 %v4593_v19, %v6820_v33 }
 0xbeb   : > { %v4595_v20 = vpop.f32.mrf.mxu0 }
 0xbec   : > { %v7313_v13 = vadd.f32 %v4399_v28, %v3596_v48  ;;  %v4596_v34 = vadd.f32 %v4595_v20, %v4594_v47 }
 0xbed   : > { %v4597_v23 = vpop.f32.mrf.mxu0 }
 0xbee   : > { %3620 = vst [vmem:[#allocation3 + $0x18] sm:$0xff] %v7313_v13  ;;  %v3597_v14 = vadd.f32 %v4596_v34, %v6823_v17 }
 0xbef   : > { %v4598_v8 = vpop.f32.mrf.mxu0 }
 0xbf0   : > { %v7317_v31 = vadd.f32 %v4399_v28, %v3597_v14  ;;  %v4599_v41 = vadd.f32 %v4598_v8, %v4597_v23 }
 0xbf2   : > { %3621 = vst [vmem:[#allocation3 + $0x10] sm:$0xff] %v7317_v31  ;;  %v3598_v12 = vadd.f32 %v4599_v41, %v6826_v29 }
 0xbf3   : > { %v4600_v51 = vpop.f32.mrf.mxu1 }
 0xbf4   : > { %v7321_v16 = vadd.f32 %v4399_v28, %v3598_v12 }
 0xbf5   : > { %v4601_v33 = vpop.f32.mrf.mxu1 }
 0xbf6   : > { %3622 = vst [vmem:[#allocation3 + $0x8] sm:$0xff] %v7321_v16  ;;  %v4602_v27 = vadd.f32 %v4601_v33, %v4600_v51 }
 0xbf7   : > { %v4603_v32 = vpop.f32.mrf.mxu1 }
 0xbf8   : > { %v3599_v53 = vadd.f32 %v4602_v27, %v6829_v21 }
 0xbf9   : > { %v4604_v22 = vpop.f32.mrf.mxu1 }
 0xbfa   : > { %v7325_v17 = vadd.f32 %v4399_v28, %v3599_v53  ;;  %v4605_v54 = vadd.f32 %v4604_v22, %v4603_v32 }
 0xbfb   : > { %v4606_v63 = vpop.f32.mrf.mxu1 }
 0xbfc   : > { %3623 = vst [vmem:[#allocation3 + $0x20] sm:$0xff] %v7325_v17  ;;  %v3600_v62 = vadd.f32 %v4605_v54, %v6832_v52 }
 0xbfd   : > { %v4607_v29 = vpop.f32.mrf.mxu1 }
 0xbfe   : > { %v7329_v6 = vadd.f32 %v4399_v28, %v3600_v62  ;;  %v4608_v11 = vadd.f32 %v4607_v29, %v4606_v63 }
 0xc00   : > { %3624 = vst [vmem:[#allocation3 + $0x28] sm:$0xff] %v7329_v6  ;;  %v3601_v60 = vadd.f32 %v4608_v11, %v6835_v40  ;;  %3629 = sbr.rel (%p4400_p4) target bundleno = 3320 (0xcf8), region = 192 }
 0xc02   : > { %v7333_v58 = vadd.f32 %v4399_v28, %v3601_v60 }
 0xc04   : > { %3625 = vst [vmem:[#allocation3 + $0x38] sm:$0xff] %v7333_v58 }
 0xc05   : > { %v3740_v21 = vld [vmem:[%s7734_s15 + $0x78] sm:$0xff]  ;;  %v3739_v52 = vld [vmem:[%s7734_s15 + $0x70] sm:$0xff]  ;;  %4903 = vmatprep.mubr.f32.mxu1 %v3609_v30  ;;  %v5869_v10 = vmov 0.0   ;;  %v3738_v40 = vld [vmem:[%s7734_s15 + $0x68] sm:$0xff]  ;;  %vm5870_vm11 = vmmov 0   ;;  %vm3723_vm12 = vcmask 130048  }
 0xc06   : > { %4871 = vmatprep.subr.mxu1 %v3740_v21  ;;  %4836 = vmatprep.subr.mxu0 %v5869_v10  ;;  %v3645_v25 = vld [vmem:[%s7735_s25 + $0x78] sm:$0xff]  ;;  %v3644_v37 = vld [vmem:[%s7735_s25 + $0x70] sm:$0xff]  ;;  %v3737_v9 = vld [vmem:[%s7734_s15 + $0x60] sm:$0xff] }
 0xc07   : > { %4872 = vmatpush3.msra.mxu1 %v3740_v21  ;;  %4868 = vmatprep.mubr.msk.f32.mxu0 %vm5870_vm11, %v5869_v10  ;;  %v3643_v18 = vld [vmem:[%s7735_s25 + $0x68] sm:$0xff]  ;;  %v3736_v1 = vld [vmem:[%s7734_s15 + $0x58] sm:$0xff]  ;;  %v3642_v35 = vld [vmem:[%s7735_s25 + $0x60] sm:$0xff] }
 0xc08   : > { %4873 = vmatprep.subr.mxu1 %v3739_v52  ;;  %4837 = vmatpush3.msra.mxu0 %v3645_v25  ;;  %v3735_v50 = vld [vmem:[%s7734_s15 + $0x50] sm:$0xff]  ;;  %v3641_v55 = vld [vmem:[%s7735_s25 + $0x58] sm:$0xff]  ;;  %v3734_v49 = vld [vmem:[%s7734_s15 + $0x48] sm:$0xff] }
 0xc09   : > { %4874 = vmatpush3.msra.mxu1 %v3739_v52  ;;  %4838 = vmatprep.subr.mxu0 %v5869_v10  ;;  %v3640_v44 = vld [vmem:[%s7735_s25 + $0x50] sm:$0xff]  ;;  %v3733_v5 = vld [vmem:[%s7734_s15 + $0x40] sm:$0xff]  ;;  %v3639_v38 = vld [vmem:[%s7735_s25 + $0x48] sm:$0xff] }
 0xc0a   : > { %4875 = vmatprep.subr.mxu1 %v3738_v40  ;;  %4839 = vmatpush3.msra.mxu0 %v3644_v37  ;;  %v3732_v24 = vld [vmem:[%s7734_s15 + $0x38] sm:$0xff]  ;;  %v3638_v36 = vld [vmem:[%s7735_s25 + $0x40] sm:$0xff]  ;;  %v3731_v43 = vld [vmem:[%s7734_s15 + $0x30] sm:$0xff] }
 0xc0b   : > { %4876 = vmatpush3.msra.mxu1 %v3738_v40  ;;  %4840 = vmatprep.subr.mxu0 %v5869_v10  ;;  %v3637_v56 = vld [vmem:[%s7735_s25 + $0x38] sm:$0xff]  ;;  %v3730_v2 = vld [vmem:[%s7734_s15 + $0x28] sm:$0xff]  ;;  %v3636_v4 = vld [vmem:[%s7735_s25 + $0x30] sm:$0xff] }
 0xc0c   : > { %4877 = vmatprep.subr.mxu1 %v3737_v9  ;;  %4841 = vmatpush3.msra.mxu0 %v3643_v18  ;;  %v3729_v39 = vld [vmem:[%s7734_s15 + $0x20] sm:$0xff]  ;;  %v3635_v45 = vld [vmem:[%s7735_s25 + $0x28] sm:$0xff]  ;;  %v3728_v3 = vld [vmem:[%s7734_s15 + $0x18] sm:$0xff] }
 0xc0d   : > { %4878 = vmatpush3.msra.mxu1 %v3737_v9  ;;  %4842 = vmatprep.subr.mxu0 %v5869_v10  ;;  %v3634_v28 = vld [vmem:[%s7735_s25 + $0x20] sm:$0xff]  ;;  %v3727_v61 = vld [vmem:[%s7734_s15 + $0x10] sm:$0xff]  ;;  %v3633_v15 = vld [vmem:[%s7735_s25 + $0x18] sm:$0xff] }
 0xc0e   : > { %4879 = vmatprep.subr.mxu1 %v3736_v1  ;;  %4843 = vmatpush3.msra.mxu0 %v3642_v35  ;;  %v3726_v46 = vld [vmem:[%s7734_s15 + $0x8] sm:$0xff]  ;;  %v3632_v30 = vld [vmem:[%s7735_s25 + $0x10] sm:$0xff]  ;;  %v3725_v57 = vld [vmem:[%s7734_s15] sm:$0xff] }
 0xc0f   : > { %4880 = vmatpush3.msra.mxu1 %v3736_v1  ;;  %4844 = vmatprep.subr.mxu0 %v5869_v10  ;;  %v3631_v7 = vld [vmem:[%s7735_s25 + $0x8] sm:$0xff]  ;;  %v3630_v0 = vld [vmem:[%s7735_s25] sm:$0xff] }
 0xc10   : > { %4881 = vmatprep.subr.mxu1 %v3735_v50  ;;  %4845 = vmatpush3.msra.mxu0 %v3641_v55  ;;  %v4402_v26 = vld [vmem:[%s7736_s2] ss:$0 sm:$0xff] }
 0xc11   : > { %4882 = vmatpush3.msra.mxu1 %v3735_v50  ;;  %4846 = vmatprep.subr.mxu0 %v5869_v10 }
 0xc12   : > { %4883 = vmatprep.subr.mxu1 %v3734_v49  ;;  %4847 = vmatpush3.msra.mxu0 %v3640_v44 }
 0xc13   : > { %4884 = vmatpush3.msra.mxu1 %v3734_v49  ;;  %4848 = vmatprep.subr.mxu0 %v5869_v10 }
 0xc14   : > { %4885 = vmatprep.subr.mxu1 %v3733_v5  ;;  %4849 = vmatpush3.msra.mxu0 %v3639_v38 }
 0xc15   : > { %4886 = vmatpush3.msra.mxu1 %v3733_v5  ;;  %4850 = vmatprep.subr.mxu0 %v5869_v10 }
 0xc16   : > { %4887 = vmatprep.subr.mxu1 %v3732_v24  ;;  %4851 = vmatpush3.msra.mxu0 %v3638_v36 }
 0xc17   : > { %4888 = vmatpush3.msra.mxu1 %v3732_v24  ;;  %4852 = vmatprep.subr.mxu0 %v5869_v10 }
 0xc18   : > { %4889 = vmatprep.subr.mxu1 %v3731_v43  ;;  %4853 = vmatpush3.msra.mxu0 %v3637_v56 }
 0xc19   : > { %4890 = vmatpush3.msra.mxu1 %v3731_v43  ;;  %4854 = vmatprep.subr.mxu0 %v5869_v10 }
 0xc1a   : > { %4891 = vmatprep.subr.mxu1 %v3730_v2  ;;  %4855 = vmatpush3.msra.mxu0 %v3636_v4 }
 0xc1b   : > { %4892 = vmatpush3.msra.mxu1 %v3730_v2  ;;  %4856 = vmatprep.subr.mxu0 %v5869_v10 }
 0xc1c   : > { %4893 = vmatprep.subr.mxu1 %v3729_v39  ;;  %4857 = vmatpush3.msra.mxu0 %v3635_v45 }
 0xc1d   : > { %4894 = vmatpush3.msra.mxu1 %v3729_v39  ;;  %4858 = vmatprep.subr.mxu0 %v5869_v10 }
 0xc1e   : > { %4895 = vmatprep.subr.mxu1 %v3728_v3  ;;  %4859 = vmatpush3.msra.mxu0 %v3634_v28 }
 0xc1f   : > { %4896 = vmatpush3.msra.mxu1 %v3728_v3  ;;  %4860 = vmatprep.subr.mxu0 %v5869_v10 }
 0xc20   : > { %4897 = vmatprep.subr.mxu1 %v3727_v61  ;;  %4861 = vmatpush3.msra.mxu0 %v3633_v15 }
 0xc21   : > { %4898 = vmatpush3.msra.mxu1 %v3727_v61  ;;  %4862 = vmatprep.subr.mxu0 %v5869_v10 }
 0xc22   : > { %4899 = vmatprep.subr.mxu1 %v3726_v46  ;;  %4863 = vmatpush3.msra.mxu0 %v3632_v30 }
 0xc23   : > { %4900 = vmatpush3.msra.mxu1 %v3726_v46  ;;  %4864 = vmatprep.subr.mxu0 %v5869_v10 }
 0xc24   : > { %4901 = vmatprep.subr.mxu1 %v3725_v57  ;;  %4865 = vmatpush3.msra.mxu0 %v3631_v7 }
 0xc25   : > { %4902 = vmatpush3.msra.mxu1 %v3725_v57  ;;  %4866 = vmatprep.subr.mxu0 %v5869_v10 }
 0xc26   : > { %4904 = vmatmul.mubr.f32.vlgmr.msra.gmra.mxu1 %v7309_v59  ;;  %4867 = vmatpush3.msra.mxu0 %v3630_v0 }
 0xc27   : > { %4906 = vmatprep.mubr.f32.mxu1 %v7313_v13  ;;  %4869 = vmatmul.mubr.f32.vlgmr.msra.gmra.mxu0 %v7302_v42  ;;  %v4401_v42 = vld [vmem:[%s7737_s22] ss:$0 sm:$0xff] }
 0xc2a   : > { %4907 = vmatmul.mubr.f32.gmra.mxu1 %v7317_v31 }
 0xc2b   : > { %4909 = vmatprep.mubr.f32.mxu1 %v7321_v16 }
 0xc2e   : > { %4910 = vmatmul.mubr.f32.gmra.mxu1 %v7325_v17 }
 0xc2f   : > { %4912 = vmatprep.mubr.f32.mxu1 %v7329_v6 }
 0xc32   : > { %4913 = vmatmul.mubr.f32.gmra.mxu1 %v7333_v58 }
 0xce6   : > { %v4905_v59 = vpop.f32.mrf.mxu1 }
 0xce7   : > { %v3820_v19 = vadd.f32 %v4905_v59, %v4402_v26  ;;  %v3719_v47 = vpop.f32.mrf.mxu0 }
 0xce8   : > { %v3814_v48 = vpop.f32.mrf.mxu1  ;;  %v3720_v20 = vadd.f32 %v4401_v42, %v3719_v47 }
 0xce9   : > { %3854 = vst.msk [vmem:[%s6446_s1 + $0x8] sm:$0xff] %vm3723_vm12, %v3820_v19  ;;  %v3815_v13 = vadd.f32 %v4402_v26, %v3814_v48  ;;  %v4870_v34 = vpop.f32.mrf.mxu0 }
 0xcea   : > { %v4908_v23 = vpop.f32.mrf.mxu1  ;;  %3724 = vst.msk [vmem:[%s6442_s0] sm:$0xff] %vm3723_vm12, %v3720_v20 }
 0xceb   : > { %3853 = vst.msk [vmem:[%s6446_s1] sm:$0xff] %vm3723_vm12, %v3815_v13  ;;  %v3830_v14 = vadd.f32 %v4908_v23, %v4402_v26 }
 0xcec   : > { %v3824_v8 = vpop.f32.mrf.mxu1 }
 0xced   : > { %3856 = vst.msk [vmem:[%s6446_s1 + $0x18] sm:$0xff] %vm3723_vm12, %v3830_v14  ;;  %v3825_v31 = vadd.f32 %v4402_v26, %v3824_v8 }
 0xcee   : > { %v4911_v41 = vpop.f32.mrf.mxu1 }
 0xcef   : > { %3855 = vst.msk [vmem:[%s6446_s1 + $0x10] sm:$0xff] %vm3723_vm12, %v3825_v31  ;;  %v3840_v12 = vadd.f32 %v4911_v41, %v4402_v26 }
 0xcf0   : > { %v3834_v51 = vpop.f32.mrf.mxu1 }
 0xcf1   : > { %3858 = vst.msk [vmem:[%s6446_s1 + $0x28] sm:$0xff] %vm3723_vm12, %v3840_v12  ;;  %v3835_v16 = vadd.f32 %v4402_v26, %v3834_v51 }
 0xcf2   : > { %v4914_v33 = vpop.f32.mrf.mxu1 }
 0xcf3   : > { %3857 = vst.msk [vmem:[%s6446_s1 + $0x20] sm:$0xff] %vm3723_vm12, %v3835_v16  ;;  %v3850_v27 = vadd.f32 %v4914_v33, %v4402_v26 }
 0xcf4   : > { %v3844_v32 = vpop.f32.mrf.mxu1 }
 0xcf5   : > { %3860 = vst.msk [vmem:[%s6446_s1 + $0x38] sm:$0xff] %vm3723_vm12, %v3850_v27  ;;  %v3845_v53 = vadd.f32 %v4402_v26, %v3844_v32 }
 0xcf7   : > { %3859 = vst.msk [vmem:[%s6446_s1 + $0x30] sm:$0xff] %vm3723_vm12, %v3845_v53 }
 0xcf8 PF: > { %s7738_s19 = sld [smem:[#allocation40_spill]]  ;;  %s3880_s27 = sshll.u32 %s6442_s0, 4  ;;  %s3881_s27 = int_to_ptr.vmem [resolvable:$true] %s3880_s27 }
 0xcf9   : > { %s7739_s26 = sld [smem:[#allocation50_spill]]  ;;  %s3862_s29 = scalar_lea.sflag [#allocation6], %s6372_s3 }
 0xcfa   : > { %s7740_s24 = sld [smem:[#allocation74_spill]]  ;;  %s5674_s7 = scalar_lea.vmem %s3881_s27, 128 }
 0xcfb   : > { %p5675_p11 = scmp.ne.s32.totalorder %s3881_s27, %s5674_s7  ;;  %s5871_s4 = smov [#allocation25]  }
 0xcfc   : > { %s5678_s21 = sshll.u32 %s5871_s4, 4  ;;  %s5679_s21 = int_to_ptr.vmem [resolvable:$false] %s5678_s21 }
 0xcfd   : > { %s5680_s11 = scalar_lea.vmem %s5679_s21, 256  ;;  %p5681_p8 = scmp.lt.s32.totalorder %s3881_s27, %s5679_s21 }
 0xcfe   : > { %s4405_s23 = sshll.u32 %s7738_s19, 7  ;;  %p5682_p12 = scmp.lt.s32.totalorder %s5680_s11, %s5674_s7 }
 0xcff   : > { %p7741_p3 = scmp.ne.s32.totalorder %s7739_s26, 0 }
 0xd00   : > { %s3878_s5 = scalar_lea.hbm %s7740_s24, %s4405_s23  ;;  %p5683_p2 = por %p5682_p12, %p5681_p8 }
 0xd01   : > { %p5676_p6 = pnand %p5675_p11, %p7741_p3 }
 0xd03   : > { %p5677_p13 = pneg %p5676_p6 }
 0xd05   : > { %p5684_p0 = pnand %p5683_p2, %p5677_p13 }
 0xd07   : > { %5687 = shalt.err (!%p5684_p0)
}
 0xd08   : > { %s5688_s12 = scalar_lea.hbm %s3878_s5, 128  ;;  %s5692_s14 = scalar_lea.hbm %s7740_s24, 256 }
 0xd09   : > { %p5689_p5 = scmp.ne.s32.totalorder %s3878_s5, %s5688_s12  ;;  %p5693_p10 = scmp.lt.s32.totalorder %s3878_s5, %s7740_s24 }
 0xd0a   : > { %p5694_p9 = scmp.lt.s32.totalorder %s5692_s14, %s5688_s12 }
 0xd0b   : > { %p5690_p7 = pnand %p5689_p5, %p7741_p3 }
 0xd0c   : > { %p5695_p4 = por %p5694_p9, %p5693_p10 }
 0xd0d   : > { %p5691_p1 = pneg %p5690_p7 }
 0xd0f   : > { %p5696_p11 = pnand %p5695_p4, %p5691_p1 }
 0xd11   : > { %5699 = shalt.err (!%p5696_p11)
}
 0xd12   : > { %4994 = dma.vmem_to_hbm [thread:$0]  (%p7741_p3), %s3881_s27, 128, %s3878_s5, %s3862_s29  }
 0xd13   : > { %s4420_s28 = sshll.u32 %s7738_s19, 10  ;;  %s3893_s6 = sshll.u32 %s6446_s1, 4  ;;  %s7507_s6 = int_to_ptr.vmem [resolvable:$true] %s3893_s6 }
 0xd14   : > { %s7742_s30 = sld [smem:[#allocation75_spill]]  ;;  %s3867_s4 = scalar_lea.sflag [#allocation27], %s6372_s3 }
 0xd15   : > { %s5700_s21 = scalar_lea.vmem %s7507_s6, 1024  ;;  %s5872_s11 = smov [#allocation26]  }
 0xd16   : > { %p5701_p6 = scmp.ne.s32.totalorder %s7507_s6, %s5700_s21  ;;  %s5704_s5 = sshll.u32 %s5872_s11, 4  ;;  %s5705_s5 = int_to_ptr.vmem [resolvable:$false] %s5704_s5 }
 0xd17   : > { %s5706_s1 = scalar_lea.vmem %s5705_s5, 2048  ;;  %p5707_p12 = scmp.lt.s32.totalorder %s7507_s6, %s5705_s5 }
 0xd18   : > { %p5702_p13 = pnand %p5701_p6, %p7741_p3  ;;  %p5708_p2 = scmp.lt.s32.totalorder %s5706_s1, %s5700_s21 }
 0xd1a   : > { %s7743_s10 = smov %s7742_s30  ;;  %s7505_s7 = scalar_lea.hbm %s7742_s30, %s4420_s28 }
 0xd1b   : > { %p5703_p8 = pneg %p5702_p13  ;;  %p5709_p0 = por %p5708_p2, %p5707_p12 }
 0xd1d   : > { %p5710_p5 = pnand %p5709_p0, %p5703_p8 }
 0xd1f   : > { %5713 = shalt.err (!%p5710_p5)
}
 0xd20   : > { %s5714_s19 = scalar_lea.hbm %s7505_s7, 1024  ;;  %s5718_s12 = scalar_lea.hbm %s7743_s10, 2048 }
 0xd21   : > { %p5715_p7 = scmp.ne.s32.totalorder %s7505_s7, %s5714_s19  ;;  %p5719_p9 = scmp.lt.s32.totalorder %s7505_s7, %s7743_s10 }
 0xd22   : > { %p5720_p4 = scmp.lt.s32.totalorder %s5718_s12, %s5714_s19 }
 0xd23   : > { %p5716_p1 = pnand %p5715_p7, %p7741_p3 }
 0xd24   : > { %p5721_p11 = por %p5720_p4, %p5719_p9 }
 0xd25   : > { %p5717_p10 = pneg %p5716_p1 }
 0xd27   : > { %p5722_p6 = pnand %p5721_p11, %p5717_p10 }
 0xd29   : > { %5725 = shalt.err (!%p5722_p6)
}
 0xd2a   : > { %s5873_s14 = smov 128   ;;  %s5874_s9 = smov 8  }
 0xd2b   : > { %4995 = dma.vmem_to_hbm [thread:$0]  (%p7741_p3), %s7507_s6, 1024, %s7505_s7, %s3867_s4, %s5873_s14, %s5873_s14, %s5874_s9  }
 0xd2c PF: > { %s7744_s2 = sld [smem:[#allocation42_spill]] }
 0xd2d   : > { %s7745_s28 = sld [smem:[#allocation36_spill]] }
 0xd2e   : > { %s7746_s22 = sld [smem:[#allocation51_spill]] }
 0xd32   : > { %p5021_p13 = scmp.ge.s32.totalorder %s7744_s2, 2 }
 0xd33   : > { %s3908_s23 = sand.u32 1, %s7745_s28  }
 0xd34   : > { %p7747_p8 = scmp.ne.s32.totalorder %s7746_s22, 0  ;;  %s3909_s30 = scalar_lea.sflag [#allocation6], %s3908_s23 }
 0xd36   : > { %p5009_p12 = pnand %p5021_p13, %p7747_p8 }
 0xd38   : > { %p5010_p2 = pneg %p5009_p12 }
 0xd3a   : > { %5787 = dma.done.wait (%p5010_p2), %s3909_s30, 128  }
 0xd3b   : > { %5789 = vsyncadd (%p5010_p2), %s3909_s30, 4294967168  ;;  %s3918_s21 = scalar_lea.sflag [#allocation27], %s3908_s23 }
 0xd3c   : > { %5791 = dma.done.wait (%p5010_p2), %s3918_s21, 1024  }
 0xd3d   : > { %5793 = vsyncadd (%p5010_p2), %s3918_s21, 4294966272  ;;  %s47_s4 = sadd.s32 1, %s7744_s2   ;;  %s7748_s29 = sld [smem:[#allocation34_spill]] }
 0xd3e   : > { %p44_p0 = scmp.ge.s32.totalorder %s47_s4, 6   ;;  %s7749_s2 = sld [smem:[#allocation35_spill]] }
 0xd3f   : > { %s7750_s6 = sld [smem:[#allocation47_spill]]  ;;  %s7757_s26 = smov %s5828_s8 }
 0xd40   : > { %s7751_s30 = sld [smem:[#allocation37_spill]] }
 0xd41   : > { %s7752_s7 = sld [smem:[#allocation38_spill]] }
 0xd42   : > { %s7753_s3 = sld [smem:[#allocation48_spill]] }
 0xd43   : > { %s7754_s1 = sld [smem:[#allocation41_spill]] }
 0xd44   : > { %s7755_s11 = sld [smem:[#allocation44_spill]] }
 0xd45   : > { %s7756_s27 = sld [smem:[#allocation45_spill]] }
 0xd46   :  { %46 = sbr.rel (!%p44_p0) target bundleno = 37 (0x25), region = 347 }
 0xd4a   : > { %s7758_s8 = smov %s7755_s11 }
 0xd4b   :  { %3923 = vsyncpa [#allocation5], 1 }
 0xd4c   :  { %3925 = vsyncpa [#allocation5 + $0x1], 1 }
 0xd4d   :  { %3926 = vsyncpa [#allocation8], 1 }
 0xd4e   :  { %3927 = vsyncpa [#allocation11], 1 }
 0xd4f   :  { %3928 = vsyncpa [#allocation6], 1 }
 0xd50   :  { %3930 = vsyncpa [#allocation6 + $0x1], 1 }
 0xd51   :  { %3931 = vsyncpa [#allocation27], 1 }
 0xd52   :  { %3933 = vsyncpa [#allocation27 + $0x1], 1 }

</bundles_post_ra>
